<compile_context>
chip_gen: v6e
topology: v6e:2x2x1
jax: 0.10.0
libtpu: 0.0.40
codegen_flags: <defaults>
</compile_context>

<pallas_src>
import functools

import jax
import jax.numpy as jnp
from jax.experimental import pallas as pl
from jax.experimental.pallas import tpu as pltpu


# --------------------------------------------------------------------------
# Pallas kernel: shared MLP over every neighbor edge feature + masked max.
# --------------------------------------------------------------------------
def pointconv_kernel(feat_ref, w1_ref, b1_ref, w2_ref, b2_ref, s2_ref, t2_ref,
                     out_ref, *, k_slots, din):
    # feat_ref: [TM*K, Din] bf16; last channel is the validity mask in {0, 1}.
    f = feat_ref[...]
    mask = f[:, din - 1:din].astype(jnp.float32)                 # [TM*K, 1]

    # layer 1: Linear -> ReLU (BN1 scale/shift are folded into layer 2 params;
    # the extra mask channel hits a zero row of W1 so it does not contribute).
    z1 = jnp.dot(f, w1_ref[...], preferred_element_type=jnp.float32)
    a1 = jnp.maximum(z1 + b1_ref[...], 0.0)                       # [TM*K, H1] f32

    # layer 2: Linear (BN1-folded, columns zero-padded to 128 lanes) -> ReLU.
    z2 = jnp.dot(a1.astype(jnp.bfloat16), w2_ref[...],
                 preferred_element_type=jnp.float32)
    a2 = jnp.maximum(z2 + b2_ref[...], 0.0)                       # [TM*K, 128] f32

    # Zero out invalid neighbor slots.  a2 >= 0 and every sampled point has at
    # least one valid slot, so multiplying by the {0,1} mask preserves the
    # masked max exactly (and is safer than a -inf sentinel).
    a2 = a2 * mask

    # Max over neighbor slots.  [TM*K, 128] -> [TM, K, 128] is a free sublane
    # regroup (K is a multiple of 8 and lanes are already dense at 128).
    tm = out_ref.shape[0]
    agg = jnp.max(a2.reshape(tm, k_slots, a2.shape[-1]), axis=1)  # [TM, 128]

    # BN2 affine applied after the max (scale > 0, max is monotone).
    out_ref[...] = agg * s2_ref[...] + t2_ref[...]


def pointconv_pallas(feat_flat, kparams, *, k_slots, tile_m=32):
    mk, din = feat_flat.shape
    m = mk // k_slots
    assert m * k_slots == mk
    assert m % tile_m == 0, (m, tile_m)
    w1, b1, w2, b2, s2, t2 = kparams
    h1 = w1.shape[1]
    h2p = w2.shape[1]                     # padded to 128 -> lane-dense output

    kern = functools.partial(pointconv_kernel, k_slots=k_slots, din=din)

    def resident(shape):                  # weights: same block every grid step
        return pl.BlockSpec(shape, lambda i: (0, 0))

    return pl.pallas_call(
        kern,
        out_shape=jax.ShapeDtypeStruct((m, h2p), jnp.float32),
        grid=(m // tile_m,),
        in_specs=[
            pl.BlockSpec((tile_m * k_slots, din), lambda i: (i, 0)),
            resident((din, h1)), resident((1, h1)),
            resident((h1, h2p)), resident((1, h2p)),
            resident((1, h2p)), resident((1, h2p)),
        ],
        out_specs=pl.BlockSpec((tile_m, h2p), lambda i: (i, 0)),
        compiler_params=pltpu.CompilerParams(
            dimension_semantics=("parallel",),
            vmem_limit_bytes=32 * 1024 * 1024),   # safe on v7x's 64 MiB VMEM
    )(feat_flat, w1, b1, w2, b2, s2, t2)


# --------------------------------------------------------------------------
# Glue in plain JAX: FPS sampling, radius neighbor search, gather/concat.
# --------------------------------------------------------------------------
def fps_equal_batches(pos, batch_size, n_per, ratio):
    """Farthest-point sampling per batch graph (equal-sized graphs,
    deterministic start at the first point of each graph)."""
    n_samples = int(n_per * ratio)
    pos_b = pos.reshape(batch_size, n_per, 3)

    def fps_one(p):
        def body(i, state):
            sel, mind = state
            d = jnp.sum((p - p[sel[i - 1]]) ** 2, axis=-1)
            mind = jnp.minimum(mind, d)
            nxt = jnp.argmax(mind).astype(jnp.int32)
            return sel.at[i].set(nxt), mind

        sel0 = jnp.zeros((n_samples,), jnp.int32)
        mind0 = jnp.sum((p - p[0]) ** 2, axis=-1)
        sel, _ = jax.lax.fori_loop(1, n_samples, body, (sel0, mind0))
        return sel

    local = jax.vmap(fps_one)(pos_b)                           # [B, n_samples]
    offs = (jnp.arange(batch_size, dtype=jnp.int32) * n_per)[:, None]
    return (local + offs).reshape(-1)                          # [B*n_samples]


def radius_neighbors(pos, batch, pos_s, batch_s, r, max_k):
    """For each sampled point: first `max_k` points (by index) within radius r
    and in the same batch graph, plus a validity mask."""
    n = pos.shape[0]
    d2 = jnp.sum((pos_s[:, None, :] - pos[None, :, :]) ** 2, axis=-1)   # [M, N]
    within = (d2 <= r * r) & (batch_s[:, None] == batch[None, :])
    col_ids = jnp.broadcast_to(jnp.arange(n, dtype=jnp.int32)[None, :],
                               within.shape)
    key = jnp.where(within, col_ids, col_ids + n)
    nbr = jnp.argsort(key, axis=1)[:, :max_k].astype(jnp.int32)         # [M, K]
    valid = jnp.take_along_axis(within, nbr, axis=1)                    # [M, K]
    return nbr, valid


def sa_module_forward(x, pos, batch, kparams, *, ratio, r, batch_size, n_per,
                      h_out, max_k=64, tile_m=32):
    idx = fps_equal_batches(pos, batch_size, n_per, ratio)
    pos_s = pos[idx]                                   # [M, 3]
    batch_s = batch[idx]                               # [M]
    nbr, valid = radius_neighbors(pos, batch, pos_s, batch_s, r, max_k)

    # TODO(synk): the neighbor gather still materializes [M, K, Din] in HBM;
    # fusing the gather into the kernel (scalar-prefetch of nbr + in-kernel
    # DMA gather of x/pos rows) is not implemented here.
    x_j = x[nbr]                                       # [M, K, C]
    rel = pos[nbr] - pos_s[:, None, :]                 # [M, K, 3]
    mask = valid.astype(jnp.float32)[..., None]        # [M, K, 1]
    feat = jnp.concatenate([x_j, rel, mask], axis=-1).astype(jnp.bfloat16)
    m_pts, k_slots, din = feat.shape
    feat_flat = feat.reshape(m_pts * k_slots, din)     # [M*K, C+3+1]

    out_pad = pointconv_pallas(feat_flat, kparams, k_slots=k_slots,
                               tile_m=tile_m)          # [M, 128]
    return out_pad[:, :h_out], pos_s, batch_s


# --------------------------------------------------------------------------
# Parameters: raw eval-mode params, then trace-time folding into kernel layout.
# --------------------------------------------------------------------------
def init_params(key, c_in, h1, h2):
    k1, k2, k3, k4 = jax.random.split(key, 4)
    din = c_in + 3
    w1 = jax.random.normal(k1, (din, h1), jnp.float32) * 0.1
    b1 = jax.random.normal(k2, (h1,), jnp.float32) * 0.1
    w2 = jax.random.normal(k3, (h1, h2), jnp.float32) * 0.1
    b2 = jax.random.normal(k4, (h2,), jnp.float32) * 0.1
    # TODO(synk): BatchNorm in eval mode only (running stats folded to
    # scale/shift, scale > 0 as in a freshly-initialized BN); train-mode batch
    # statistics over edges are not implemented.
    eps = 1e-5
    s1 = jnp.full((h1,), 1.0 / jnp.sqrt(1.0 + eps), jnp.float32)
    t1 = jnp.zeros((h1,), jnp.float32)
    s2 = jnp.full((h2,), 1.0 / jnp.sqrt(1.0 + eps), jnp.float32)
    t2 = jnp.zeros((h2,), jnp.float32)
    return (w1, b1, s1, t1, w2, b2, s2, t2)


def prepare_kernel_params(raw, *, h2_pad=128):
    """Fold BN affines + pad to the layout the kernel consumes."""
    w1, b1, s1, t1, w2, b2, s2, t2 = raw
    _, h1 = w1.shape
    h2 = w2.shape[1]
    assert h2 <= h2_pad

    # extra zero input row so the packed mask channel does not affect layer 1
    w1p = jnp.concatenate([w1, jnp.zeros((1, h1), jnp.float32)], axis=0)

    # fold BN1: (relu(z1)*s1 + t1) @ W2 + b2 == relu(z1) @ (s1*W2) + (t1@W2 + b2)
    w2f = w2 * s1[:, None]
    b2f = b2 + t1 @ w2

    def pad_cols(v):
        return jnp.pad(v, ((0, 0), (0, h2_pad - h2)))

    return (w1p.astype(jnp.bfloat16),
            b1[None, :],
            pad_cols(w2f).astype(jnp.bfloat16),
            pad_cols(b2f[None, :]),
            pad_cols(s2[None, :]),
            pad_cols(t2[None, :]))


if __name__ == "__main__":
    key = jax.random.PRNGKey(0)
    kx, kp, kw = jax.random.split(key, 3)

    B, N_per, C = 2, 64, 4            # 2 graphs of 64 points, 4 feature channels
    ratio, r = 0.5, 0.4               # sample 50%, radius 0.4 in the unit cube
    H1, H2 = 32, 32                   # MLP([C+3, 32, 32])
    MAX_K = 64                        # max_num_neighbors
    TILE_M = 32                       # M=64 -> 2 parallel grid steps (v7x: 2 TCs)
    N = B * N_per

    x = jax.random.normal(kx, (N, C), jnp.float32)
    pos = jax.random.uniform(kp, (N, 3), jnp.float32)
    batch = jnp.repeat(jnp.arange(B, dtype=jnp.int32), N_per)

    raw_params = init_params(kw, C, H1, H2)
    kparams = prepare_kernel_params(raw_params)

    fwd = jax.jit(functools.partial(
        sa_module_forward, ratio=ratio, r=r, batch_size=B, n_per=N_per,
        h_out=H2, max_k=MAX_K, tile_m=TILE_M))
    out, pos_s, batch_s = fwd(x, pos, batch, kparams)
    jax.block_until_ready((out, pos_s, batch_s))

    M = int(N * ratio)
    assert out.shape == (M, H2), out.shape
    assert pos_s.shape == (M, 3)
    assert batch_s.shape == (M,)
    assert bool(jnp.all(jnp.isfinite(out)))
    print("KERNEL_OK")
</pallas_src>

<mosaic_0001>
module attributes {stable_mosaic.version = 11 : i64} {
  func.func @pointconv_kernel(%arg0: i32, %arg1: memref<2048x8xbf16, #tpu.memory_space<vmem>>, %arg2: memref<8x32xbf16, #tpu.memory_space<vmem>>, %arg3: memref<1x32xf32, #tpu.memory_space<vmem>>, %arg4: memref<32x128xbf16, #tpu.memory_space<vmem>>, %arg5: memref<1x128xf32, #tpu.memory_space<vmem>>, %arg6: memref<1x128xf32, #tpu.memory_space<vmem>>, %arg7: memref<1x128xf32, #tpu.memory_space<vmem>>, %arg8: memref<32x128xf32, #tpu.memory_space<vmem>>) attributes {dimension_semantics = [#tpu.dimension_semantics<parallel>], iteration_bounds = array<i64: 2>, scalar_prefetch = 0 : i64, scratch_operands = 0 : i64, tpu.core_type = #tpu.core_type<tc>, window_params = [{transform_indices = @transform_0, window_bounds = array<i64: 2048, 8>}, {pipeline_mode = #tpu.pipeline_mode<synchronous>, transform_indices = @transform_1, window_bounds = array<i64: 8, 32>}, {pipeline_mode = #tpu.pipeline_mode<synchronous>, transform_indices = @transform_2, window_bounds = array<i64: 1, 32>}, {pipeline_mode = #tpu.pipeline_mode<synchronous>, transform_indices = @transform_3, window_bounds = array<i64: 32, 128>}, {pipeline_mode = #tpu.pipeline_mode<synchronous>, transform_indices = @transform_4, window_bounds = array<i64: 1, 128>}, {pipeline_mode = #tpu.pipeline_mode<synchronous>, transform_indices = @transform_5, window_bounds = array<i64: 1, 128>}, {pipeline_mode = #tpu.pipeline_mode<synchronous>, transform_indices = @transform_6, window_bounds = array<i64: 1, 128>}, {transform_indices = @transform_7, window_bounds = array<i64: 32, 128>}]} {
    %c0 = arith.constant 0 : index
    %c0_0 = arith.constant 0 : index
    %0 = vector.load %arg1[%c0, %c0_0] : memref<2048x8xbf16, #tpu.memory_space<vmem>>, vector<2048x8xbf16>
    %1 = vector.extract_strided_slice %0 {offsets = [0, 7], sizes = [2048, 1], strides = [1, 1]} : vector<2048x8xbf16> to vector<2048x1xbf16>
    %2 = arith.extf %1 : vector<2048x1xbf16> to vector<2048x1xf32>
    %c0_1 = arith.constant 0 : index
    %c0_2 = arith.constant 0 : index
    %3 = vector.load %arg2[%c0_1, %c0_2] : memref<8x32xbf16, #tpu.memory_space<vmem>>, vector<8x32xbf16>
    %cst = arith.constant dense<0.000000e+00> : vector<2048x32xf32>
    %4 = tpu.matmul %0, %3, %cst {dimension_numbers = #tpu.dot_dimension_numbers<[1], [0], [0], [1], [0, 0, 1, 1], [], []>} : vector<2048x8xbf16>, vector<8x32xbf16>, vector<2048x32xf32> -> vector<2048x32xf32>
    %c0_3 = arith.constant 0 : index
    %c0_4 = arith.constant 0 : index
    %5 = vector.load %arg3[%c0_3, %c0_4] : memref<1x32xf32, #tpu.memory_space<vmem>>, vector<1x32xf32>
    %6 = vector.broadcast %5 : vector<1x32xf32> to vector<2048x32xf32>
    %7 = arith.addf %4, %6 : vector<2048x32xf32>
    %cst_5 = arith.constant 0.000000e+00 : f32
    %8 = vector.broadcast %cst_5 : f32 to vector<2048x32xf32>
    %9 = arith.maximumf %7, %8 : vector<2048x32xf32>
    %10 = arith.truncf %9 : vector<2048x32xf32> to vector<2048x32xbf16>
    %c0_6 = arith.constant 0 : index
    %c0_7 = arith.constant 0 : index
    %11 = vector.load %arg4[%c0_6, %c0_7] : memref<32x128xbf16, #tpu.memory_space<vmem>>, vector<32x128xbf16>
    %cst_8 = arith.constant dense<0.000000e+00> : vector<2048x128xf32>
    %12 = tpu.matmul %10, %11, %cst_8 {dimension_numbers = #tpu.dot_dimension_numbers<[1], [0], [0], [1], [0, 0, 1, 1], [], []>} : vector<2048x32xbf16>, vector<32x128xbf16>, vector<2048x128xf32> -> vector<2048x128xf32>
    %c0_9 = arith.constant 0 : index
    %c0_10 = arith.constant 0 : index
    %13 = vector.load %arg5[%c0_9, %c0_10] : memref<1x128xf32, #tpu.memory_space<vmem>>, vector<1x128xf32>
    %14 = vector.broadcast %13 : vector<1x128xf32> to vector<2048x128xf32>
    %15 = arith.addf %12, %14 : vector<2048x128xf32>
    %cst_11 = arith.constant 0.000000e+00 : f32
    %16 = vector.broadcast %cst_11 : f32 to vector<2048x128xf32>
    %17 = arith.maximumf %15, %16 : vector<2048x128xf32>
    %18 = vector.broadcast %2 : vector<2048x1xf32> to vector<2048x128xf32>
    %19 = arith.mulf %17, %18 : vector<2048x128xf32>
    %20 = vector.shape_cast %19 : vector<2048x128xf32> to vector<32x64x128xf32>
    %cst_12 = arith.constant dense<0xFF800000> : vector<32x128xf32>
    %21 = vector.multi_reduction <maximumf>, %20, %cst_12 [1] : vector<32x64x128xf32> to vector<32x128xf32>
    %c0_13 = arith.constant 0 : index
    %c0_14 = arith.constant 0 : index
    %22 = vector.load %arg6[%c0_13, %c0_14] : memref<1x128xf32, #tpu.memory_space<vmem>>, vector<1x128xf32>
    %23 = vector.broadcast %22 : vector<1x128xf32> to vector<32x128xf32>
    %24 = arith.mulf %21, %23 : vector<32x128xf32>
    %c0_15 = arith.constant 0 : index
    %c0_16 = arith.constant 0 : index
    %25 = vector.load %arg7[%c0_15, %c0_16] : memref<1x128xf32, #tpu.memory_space<vmem>>, vector<1x128xf32>
    %26 = vector.broadcast %25 : vector<1x128xf32> to vector<32x128xf32>
    %27 = arith.addf %24, %26 : vector<32x128xf32>
    %c0_17 = arith.constant 0 : index
    %c0_18 = arith.constant 0 : index
    %28 = vector.load %arg8[%c0_17, %c0_18] : memref<32x128xf32, #tpu.memory_space<vmem>>, vector<32x128xf32>
    tpu.vector_store %arg8[%c0_17, %c0_18], %27 {strides = array<i32>} : memref<32x128xf32, #tpu.memory_space<vmem>>, vector<32x128xf32>,
    return
  }
  func.func @transform_0(%arg0: i32) -> (i32, i32) {
    %c0_i32 = arith.constant 0 : i32
    %c0_i32_0 = arith.constant 0 : i32
    return %arg0, %c0_i32 : i32, i32
  }
  func.func @transform_1(%arg0: i32) -> (i32, i32) {
    %c0_i32 = arith.constant 0 : i32
    %c0_i32_0 = arith.constant 0 : i32
    %c0_i32_1 = arith.constant 0 : i32
    return %c0_i32, %c0_i32_0 : i32, i32
  }
  func.func @transform_2(%arg0: i32) -> (i32, i32) {
    %c0_i32 = arith.constant 0 : i32
    %c0_i32_0 = arith.constant 0 : i32
    %c0_i32_1 = arith.constant 0 : i32
    return %c0_i32, %c0_i32_0 : i32, i32
  }
  func.func @transform_3(%arg0: i32) -> (i32, i32) {
    %c0_i32 = arith.constant 0 : i32
    %c0_i32_0 = arith.constant 0 : i32
    %c0_i32_1 = arith.constant 0 : i32
    return %c0_i32, %c0_i32_0 : i32, i32
  }
  func.func @transform_4(%arg0: i32) -> (i32, i32) {
    %c0_i32 = arith.constant 0 : i32
    %c0_i32_0 = arith.constant 0 : i32
    %c0_i32_1 = arith.constant 0 : i32
    return %c0_i32, %c0_i32_0 : i32, i32
  }
  func.func @transform_5(%arg0: i32) -> (i32, i32) {
    %c0_i32 = arith.constant 0 : i32
    %c0_i32_0 = arith.constant 0 : i32
    %c0_i32_1 = arith.constant 0 : i32
    return %c0_i32, %c0_i32_0 : i32, i32
  }
  func.func @transform_6(%arg0: i32) -> (i32, i32) {
    %c0_i32 = arith.constant 0 : i32
    %c0_i32_0 = arith.constant 0 : i32
    %c0_i32_1 = arith.constant 0 : i32
    return %c0_i32, %c0_i32_0 : i32, i32
  }
  func.func @transform_7(%arg0: i32) -> (i32, i32) {
    %c0_i32 = arith.constant 0 : i32
    %c0_i32_0 = arith.constant 0 : i32
    return %arg0, %c0_i32 : i32, i32
  }
}

</mosaic_0001>

<bundles_post_ra>
// kernel: sa_module_forward.1
= control target key start
LH: loop header
LB: loop body
LE: loop exit
PB: predicated region body
PF: predicated region fallthrough
CT: control target
= control target key end

     0   :  { %s9340_s24 = smov 0   ;;  %s12156_s0 = inlined_call_operand.vmem [shape: bf16[4096,8], index: 0, kind: input, shape index: {}]   ;;  %s12157_s1 = inlined_call_operand.vmem [shape: bf16[8,32], index: 1, kind: input, shape index: {}]   ;;  %s12158_s2 = inlined_call_operand.vmem [shape: f32[1,32], index: 2, kind: input, shape index: {}]   ;;  %s12159_s3 = inlined_call_operand.vmem [shape: bf16[32,128], index: 3, kind: input, shape index: {}]   ;;  %s12160_s4 = inlined_call_operand.vmem [shape: f32[1,128], index: 4, kind: input, shape index: {}]   ;;  %s12161_s5 = inlined_call_operand.vmem [shape: f32[1,128], index: 5, kind: input, shape index: {}]   ;;  %s12162_s6 = inlined_call_operand.vmem [shape: f32[1,128], index: 6, kind: input, shape index: {}]   ;;  %s12163_s7 = inlined_call_operand.vmem [shape: f32[64,128], index: 7, kind: output, shape index: {}]  }
   0x1 LB: > { %s7183_s25 = sadd.s32 4294967295, %s9297_s24   ;;  %p7187_p0 = scmp.ge.s32.totalorder %s9297_s24, 1  ;;  %s9297_s24 = sphi %s9340_s24, %s17_s24  }
   0x2   : > { %p238_p1 = scmp.lt.s32.totalorder %s9297_s24, 3 }
   0x4   : > { %p239_p2 = pnand %p7187_p0, %p238_p1 }
   0x6   : > { %242 = sbr.rel (%p239_p2) target bundleno = 992 (0x3e0), region = 48 }
   0xb   : > { %v795_v0 = vld [vmem:[%s12157_s1] sm:$0xf]  ;;  %vm1828_vm0 = vcmask 1043456   ;;  %s7188_s28 = sshll.u32 %s7183_s25, 8  ;;  %vm1443_vm1 = vcmask 64512   ;;  %v9063_v23 = vld [vmem:[%s12159_s3 + $0x8] sm:$0xff]  }
   0xc   : > { %8361 = vmatprep.subr.msk.bf16.mxu0 %vm1828_vm0, %v795_v0  ;;  %v1830_v1 = vsel %vm1828_vm0, %v795_v0, 0  ;;  %p271_p3 = scmp.lt.s32.totalorder %s7188_s28, 511  ;;  %8101 = vmatprep.subr.bf16.mxu1 %v9063_v23  ;;  %v9066_v24 = vld [vmem:[%s12159_s3] sm:$0xff]   ;;  %v9299_v46 = vmov 7   ;;  %vm3296_vm2 = vcmask 261120   ;;  %vm7057_vm3 = vcmask 1041409  }
   0xd   : > { %7844 = vmatpush3.bf16.msra.mxu0 %v1830_v1  ;;  %8102 = vmatpush3.bf16.msra.mxu1 %v9063_v23  ;;  %vm7060_vm4 = vcmask 1042434   ;;  %vm7063_vm5 = vcmask 1043459   ;;  %vm7066_vm6 = vcmask 1044484   ;;  %vm7069_vm7 = vcmask 1045509  }
   0xe   : > { %s12314_s28 = smov (!%p271_p3, %s7188_s28), 511  ;;  %8103 = vmatprep.subr.bf16.mxu1 %v9066_v24  ;;  %8371 = vset.pattern.permute.xlu0 %v9299_v46  ;;  %vm7072_vm8 = vcmask 1046534   ;;  %vm7075_vm9 = vcmask 1047559  }
   0xf   : > { %s7189_s29 = sshll.u32 %s12314_s28, 2  ;;  %8382 = vset.pattern.permute.xlu1 %v9299_v46 }
  0x10   : > { %s9356_s9 = scalar_lea.vmem %s12156_s0, %s7189_s29 }
  0x11   : > { %v9359_v2 = vld [vmem:[%s9356_s9] sm:$0xff]   ;;  %v9362_v3 = vld [vmem:[%s9356_s9 + $0x8] sm:$0xff]   ;;  %v9365_v4 = vld [vmem:[%s9356_s9 + $0x10] sm:$0xff]   ;;  %8104 = vmatpush3.bf16.msra.mxu1 %v9066_v24 }
  0x12   : > { %7845 = vmatprep.mubr.msk.bf16.mxu0 %vm1443_vm1, %v9359_v2  ;;  %v9374_v5 = vld [vmem:[%s9356_s9 + $0x18] sm:$0xff]   ;;  %v9377_v6 = vld [vmem:[%s9356_s9 + $0x20] sm:$0xff]   ;;  %v9384_v7 = vld [vmem:[%s9356_s9 + $0x28] sm:$0xff]   ;;  %v539_v43 = vunpack.c.l.bf16 %v9359_v2  ;;  %v540_v44 = vunpack.c.h.bf16 %v9359_v2  ;;  %v541_v48 = vunpack.c.l.bf16 %v9362_v3  ;;  %v542_v49 = vunpack.c.h.bf16 %v9362_v3 }
  0x13   : > { %7846 = vmatmul.mubr.msk.bf16.vlgmr.msra.gmra.mxu0 %vm1443_vm1, %v9362_v3  ;;  %v9387_v8 = vld [vmem:[%s9356_s9 + $0x30] sm:$0xff]   ;;  %v9394_v9 = vld [vmem:[%s9356_s9 + $0x38] sm:$0xff]   ;;  %v9397_v10 = vld [vmem:[%s9356_s9 + $0x40] sm:$0xff]   ;;  %v543_v52 = vunpack.c.l.bf16 %v9365_v4  ;;  %v544_v53 = vunpack.c.h.bf16 %v9365_v4  ;;  %v545_v56 = vunpack.c.l.bf16 %v9374_v5  ;;  %v546_v57 = vunpack.c.h.bf16 %v9374_v5 }
  0x14   : > { %7849 = vmatprep.mubr.msk.bf16.mxu0 %vm1443_vm1, %v9365_v4  ;;  %v9404_v11 = vld [vmem:[%s9356_s9 + $0x48] sm:$0xff]   ;;  %v9407_v12 = vld [vmem:[%s9356_s9 + $0x50] sm:$0xff]   ;;  %v9414_v13 = vld [vmem:[%s9356_s9 + $0x58] sm:$0xff]   ;;  %v8372_v45 = vpack.i.bf16 %v540_v44, %v539_v43  ;;  %v8377_v51 = vpack.i.bf16 %v542_v49, %v541_v48  ;;  %v549_v61 = vunpack.c.l.bf16 %v9384_v7  ;;  %v550_v62 = vunpack.c.h.bf16 %v9384_v7 }
  0x15   : > { %v9417_v14 = vld [vmem:[%s9356_s9 + $0x60] sm:$0xff]   ;;  %v9424_v15 = vld [vmem:[%s9356_s9 + $0x68] sm:$0xff]   ;;  %v9427_v16 = vld [vmem:[%s9356_s9 + $0x70] sm:$0xff]   ;;  %v8383_v54 = vpack.i.bf16 %v544_v53, %v543_v52  ;;  %v8388_v59 = vpack.i.bf16 %v546_v57, %v545_v56  ;;  %v547_v63 = vunpack.c.l.bf16 %v9377_v6  ;;  %v548_v0 = vunpack.c.h.bf16 %v9377_v6 }
  0x16   : > { %v9434_v17 = vld [vmem:[%s9356_s9 + $0x78] sm:$0xff]   ;;  %v9437_v18 = vld [vmem:[%s9356_s9 + $0x80] sm:$0xff]   ;;  %v9444_v19 = vld [vmem:[%s9356_s9 + $0x88] sm:$0xff]   ;;  %8373 = vperm.xlu0 %8371, %v8372_v45   ;;  %v8398_v2 = vpack.i.bf16 %v550_v62, %v549_v61  ;;  %v551_v4 = vunpack.c.l.bf16 %v9387_v8  ;;  %v553_v23 = vunpack.c.l.bf16 %v9394_v9  ;;  %v555_v44 = vunpack.c.l.bf16 %v9397_v10 }
  0x17   : > { %v9447_v20 = vld [vmem:[%s9356_s9 + $0x90] sm:$0xff]   ;;  %v9454_v21 = vld [vmem:[%s9356_s9 + $0x98] sm:$0xff]   ;;  %v9457_v22 = vld [vmem:[%s9356_s9 + $0xa0] sm:$0xff]   ;;  %8384 = vperm.xlu1 %8382, %v8383_v54   ;;  %v8393_v3 = vpack.i.bf16 %v548_v0, %v547_v63  ;;  %v556_v45 = vunpack.c.h.bf16 %v9397_v10  ;;  %v558_v46 = vunpack.c.h.bf16 %v9404_v11  ;;  %v560_v52 = vunpack.c.h.bf16 %v9407_v12 }
  0x18   : > { %v9470_v25 = vld [vmem:[%s9356_s9 + $0xa8] sm:$0xff]   ;;  %v9473_v26 = vld [vmem:[%s9356_s9 + $0xb0] sm:$0xff]   ;;  %v9480_v27 = vld [vmem:[%s9356_s9 + $0xb8] sm:$0xff]   ;;  %v561_v53 = vunpack.c.l.bf16 %v9414_v13  ;;  %v563_v57 = vunpack.c.l.bf16 %v9417_v14  ;;  %v566_v61 = vunpack.c.h.bf16 %v9424_v15  ;;  %v567_v0 = vunpack.c.l.bf16 %v9427_v16 }
  0x19   : > { %v9483_v28 = vld [vmem:[%s9356_s9 + $0xc0] sm:$0xff]   ;;  %v9490_v29 = vld [vmem:[%s9356_s9 + $0xc8] sm:$0xff]   ;;  %v9493_v30 = vld [vmem:[%s9356_s9 + $0xd0] sm:$0xff]   ;;  %v8413_v48 = vpack.i.bf16 %v556_v45, %v555_v44  ;;  %v575_v45 = vunpack.c.l.bf16 %v9447_v20 }
  0x1a   : > { %v9500_v31 = vld [vmem:[%s9356_s9 + $0xd8] sm:$0xff]   ;;  %v9503_v32 = vld [vmem:[%s9356_s9 + $0xe0] sm:$0xff]   ;;  %v9510_v33 = vld [vmem:[%s9356_s9 + $0xe8] sm:$0xff]   ;;  %8378 = vperm.xlu0 %8371, %v8377_v51   ;;  %v559_v51 = vunpack.c.l.bf16 %v9407_v12 }
  0x1b   : > { %7850 = vmatmul.mubr.msk.bf16.gmra.mxu0 %vm1443_vm1, %v9374_v5  ;;  %v9513_v34 = vld [vmem:[%s9356_s9 + $0xf0] sm:$0xff]   ;;  %v9520_v35 = vld [vmem:[%s9356_s9 + $0xf8] sm:$0xff]   ;;  %v9523_v36 = vld [vmem:[%s9356_s9 + $0x100] sm:$0xff]   ;;  %8389 = vperm.xlu1 %8382, %v8388_v59   ;;  %v552_v5 = vunpack.c.h.bf16 %v9387_v8 }
  0x1c   : > { %7853 = vmatprep.mubr.msk.bf16.mxu0 %vm1443_vm1, %v9377_v6  ;;  %v9530_v37 = vld [vmem:[%s9356_s9 + $0x108] sm:$0xff]   ;;  %v9533_v38 = vld [vmem:[%s9356_s9 + $0x110] sm:$0xff]   ;;  %v9540_v39 = vld [vmem:[%s9356_s9 + $0x118] sm:$0xff]   ;;  %v8423_v54 = vpack.i.bf16 %v560_v52, %v559_v51  ;;  %v579_v52 = vunpack.c.l.bf16 %v9457_v22 }
  0x1d   : > { %v9543_v40 = vld [vmem:[%s9356_s9 + $0x120] sm:$0xff]   ;;  %v9550_v41 = vld [vmem:[%s9356_s9 + $0x128] sm:$0xff]   ;;  %v9553_v42 = vld [vmem:[%s9356_s9 + $0x130] sm:$0xff]   ;;  %v8403_v24 = vpack.i.bf16 %v552_v5, %v551_v4 }
  0x1e   : > { %v9562_v47 = vld [vmem:[%s9356_s9 + $0x138] sm:$0xff]   ;;  %v9567_v50 = vld [vmem:[%s9356_s9 + $0x140] sm:$0xff]   ;;  %v9576_v55 = vld [vmem:[%s9356_s9 + $0x148] sm:$0xff]   ;;  %8394 = vperm.xlu0 %8371, %v8393_v3   ;;  %v569_v3 = vunpack.c.l.bf16 %v9434_v17 }
  0x1f   : > { %v9581_v58 = vld [vmem:[%s9356_s9 + $0x150] sm:$0xff]   ;;  %v9588_v60 = vld [vmem:[%s9356_s9 + $0x158] sm:$0xff]   ;;  %v9595_v1 = vld [vmem:[%s9356_s9 + $0x160] sm:$0xff]   ;;  %8399 = vperm.xlu1 %8382, %v8398_v2   ;;  %v568_v2 = vunpack.c.h.bf16 %v9427_v16 }
  0x20   : > { %v9606_v43 = vld [vmem:[%s9356_s9 + $0x168] sm:$0xff]   ;;  %v9629_v59 = vld [vmem:[%s9356_s9 + $0x180] sm:$0xff]  }
  0x21   : > { %v8443_v4 = vpack.i.bf16 %v568_v2, %v567_v0  ;;  %v585_v2 = vunpack.c.l.bf16 %v9480_v27 }
  0x22   : > { %8404 = vperm.xlu0 %8371, %v8403_v24   ;;  %v574_v24 = vunpack.c.h.bf16 %v9444_v19 }
  0x23   : > { %7854 = vmatmul.mubr.msk.bf16.gmra.mxu0 %vm1443_vm1, %v9384_v7  ;;  %v554_v7 = vunpack.c.h.bf16 %v9394_v9 }
  0x24   : > { %7857 = vmatprep.mubr.msk.bf16.mxu0 %vm1443_vm1, %v9387_v8  ;;  %v9611_v8 = vld [vmem:[%s9356_s9 + $0x170] sm:$0xff]  }
  0x25   : > { %v8408_v6 = vpack.i.bf16 %v554_v7, %v553_v23  ;;  %v571_v23 = vunpack.c.l.bf16 %v9437_v18  ;;  %v9647_v7 = vld [vmem:[%s9356_s9 + $0x190] sm:$0xff]  }
  0x26   : > { %8414 = vperm.xlu0 %8371, %v8413_v48  }
  0x27   : > { %8409 = vperm.xlu1 %8382, %v8408_v6  }
  0x2a   : > { %8424 = vperm.xlu0 %8371, %v8423_v54   ;;  %v582_v54 = vunpack.c.h.bf16 %v9470_v25 }
  0x2b   : > { %7858 = vmatmul.mubr.msk.bf16.gmra.mxu0 %vm1443_vm1, %v9394_v9  ;;  %v557_v9 = vunpack.c.l.bf16 %v9404_v11 }
  0x2c   : > { %7861 = vmatprep.mubr.msk.bf16.mxu0 %vm1443_vm1, %v9397_v10  ;;  %v562_v10 = vunpack.c.h.bf16 %v9414_v13 }
  0x2d   : > { %v8418_v49 = vpack.i.bf16 %v558_v46, %v557_v9  ;;  %v576_v9 = vunpack.c.h.bf16 %v9447_v20  ;;  %v577_v46 = vunpack.c.l.bf16 %v9454_v21 }
  0x2e   : > { %v8428_v56 = vpack.i.bf16 %v562_v10, %v561_v53  ;;  %v9665_v10 = vld [vmem:[%s9356_s9 + $0x1a0] sm:$0xff]  }
  0x2f   : > { %8419 = vperm.xlu1 %8382, %v8418_v49   ;;  %v8463_v48 = vpack.i.bf16 %v576_v9, %v575_v45  ;;  %v9691_v45 = vld [vmem:[%s9356_s9 + $0x1b0] sm:$0xff]   ;;  %v588_v9 = vunpack.c.h.bf16 %v9483_v28 }
  0x33   : > { %7862 = vmatmul.mubr.msk.bf16.gmra.mxu0 %vm1443_vm1, %v9404_v11  ;;  %v9624_v11 = vld [vmem:[%s9356_s9 + $0x178] sm:$0xff]   ;;  %8429 = vperm.xlu1 %8382, %v8428_v56   ;;  %v9672_v56 = vld [vmem:[%s12158_s2] ss:$0 sm:$0xff] }
  0x34   : > { %7865 = vmatprep.mubr.msk.bf16.mxu0 %vm1443_vm1, %v9407_v12  ;;  %v564_v12 = vunpack.c.h.bf16 %v9417_v14 }
  0x36   : > { %v8433_v62 = vpack.i.bf16 %v564_v12, %v563_v57 }
  0x38   : > { %8434 = vperm.xlu0 %8371, %v8433_v62   ;;  %v583_v62 = vunpack.c.l.bf16 %v9473_v26 }
  0x3b   : > { %7866 = vmatmul.mubr.msk.bf16.gmra.mxu0 %vm1443_vm1, %v9414_v13  ;;  %v565_v13 = vunpack.c.l.bf16 %v9424_v15 }
  0x3c   : > { %7869 = vmatprep.mubr.msk.bf16.mxu0 %vm1443_vm1, %v9417_v14  ;;  %v570_v14 = vunpack.c.h.bf16 %v9434_v17  ;;  %8444 = vperm.xlu0 %8371, %v8443_v4  }
  0x3d   : > { %v8438_v63 = vpack.i.bf16 %v566_v61, %v565_v13 }
  0x3e   : > { %v8448_v5 = vpack.i.bf16 %v570_v14, %v569_v3  ;;  %v586_v3 = vunpack.c.h.bf16 %v9480_v27 }
  0x3f   : > { %8439 = vperm.xlu1 %8382, %v8438_v63  }
  0x43   : > { %7870 = vmatmul.mubr.msk.bf16.gmra.mxu0 %vm1443_vm1, %v9424_v15  ;;  %v9642_v15 = vld [vmem:[%s9356_s9 + $0x188] sm:$0xff]   ;;  %8449 = vperm.xlu1 %8382, %v8448_v5  }
  0x44   : > { %7873 = vmatprep.mubr.msk.bf16.mxu0 %vm1443_vm1, %v9427_v16  ;;  %v572_v16 = vunpack.c.h.bf16 %v9437_v18 }
  0x46   : > { %v8453_v6 = vpack.i.bf16 %v572_v16, %v571_v23  ;;  %v8488_v16 = vpack.i.bf16 %v586_v3, %v585_v2  ;;  %v595_v3 = vunpack.c.l.bf16 %v9503_v32 }
  0x48   : > { %8454 = vperm.xlu0 %8371, %v8453_v6   ;;  %v587_v6 = vunpack.c.l.bf16 %v9483_v28 }
  0x4b   : > { %7874 = vmatmul.mubr.msk.bf16.gmra.mxu0 %vm1443_vm1, %v9434_v17  ;;  %v573_v17 = vunpack.c.l.bf16 %v9444_v19 }
  0x4c   : > { %7877 = vmatprep.mubr.msk.bf16.mxu0 %vm1443_vm1, %v9437_v18  ;;  %v578_v18 = vunpack.c.h.bf16 %v9454_v21  ;;  %8464 = vperm.xlu0 %8371, %v8463_v48  }
  0x4d   : > { %v8458_v44 = vpack.i.bf16 %v574_v24, %v573_v17 }
  0x4e   : > { %v8468_v51 = vpack.i.bf16 %v578_v18, %v577_v46  ;;  %v589_v46 = vunpack.c.l.bf16 %v9490_v29  ;;  %v590_v18 = vunpack.c.h.bf16 %v9490_v29 }
  0x4f   : > { %8459 = vperm.xlu1 %8382, %v8458_v44  }
  0x53   : > { %7878 = vmatmul.mubr.msk.bf16.gmra.mxu0 %vm1443_vm1, %v9444_v19  ;;  %v9660_v19 = vld [vmem:[%s9356_s9 + $0x198] sm:$0xff]   ;;  %8469 = vperm.xlu1 %8382, %v8468_v51  }
  0x54   : > { %7881 = vmatprep.mubr.msk.bf16.mxu0 %vm1443_vm1, %v9447_v20  ;;  %v580_v20 = vunpack.c.h.bf16 %v9457_v22 }
  0x56   : > { %v8473_v57 = vpack.i.bf16 %v580_v20, %v579_v52  ;;  %v8493_v52 = vpack.i.bf16 %v588_v9, %v587_v6  ;;  %v8498_v20 = vpack.i.bf16 %v590_v18, %v589_v46  ;;  %v599_v18 = vunpack.c.l.bf16 %v9513_v34 }
  0x58   : > { %8474 = vperm.xlu0 %8371, %v8473_v57  }
  0x5b   : > { %7882 = vmatmul.mubr.msk.bf16.gmra.mxu0 %vm1443_vm1, %v9454_v21  ;;  %v581_v21 = vunpack.c.l.bf16 %v9470_v25 }
  0x5c   : > { %7885 = vmatprep.mubr.msk.bf16.mxu0 %vm1443_vm1, %v9457_v22 }
  0x5d   : > { %v8478_v13 = vpack.i.bf16 %v582_v54, %v581_v21  ;;  %v591_v54 = vunpack.c.l.bf16 %v9493_v30 }
  0x5f   : > { %8479 = vperm.xlu1 %8382, %v8478_v13   ;;  %v594_v13 = vunpack.c.h.bf16 %v9500_v31 }
  0x63   : > { %7886 = vmatmul.mubr.msk.bf16.gmra.mxu0 %vm1443_vm1, %v9470_v25  ;;  %v584_v25 = vunpack.c.h.bf16 %v9473_v26  ;;  %8489 = vperm.xlu1 %8382, %v8488_v16   ;;  %v598_v16 = vunpack.c.h.bf16 %v9510_v33 }
  0x64   : > { %7889 = vmatprep.mubr.msk.bf16.mxu0 %vm1443_vm1, %v9473_v26  ;;  %v9687_v26 = vld [vmem:[%s9356_s9 + $0x1a8] sm:$0xff]  }
  0x65   : > { %v8483_v23 = vpack.i.bf16 %v584_v25, %v583_v62 }
  0x67   : > { %8484 = vperm.xlu0 %8371, %v8483_v23   ;;  %8499 = vperm.xlu1 %8382, %v8498_v20   ;;  %v597_v23 = vunpack.c.l.bf16 %v9510_v33 }
  0x6b   : > { %7890 = vmatmul.mubr.msk.bf16.gmra.mxu0 %vm1443_vm1, %v9480_v27  ;;  %8494 = vperm.xlu0 %8371, %v8493_v52  }
  0x6c   : > { %7893 = vmatprep.mubr.msk.bf16.mxu0 %vm1443_vm1, %v9483_v28 }
  0x73   : > { %7894 = vmatmul.mubr.msk.bf16.gmra.mxu0 %vm1443_vm1, %v9490_v29  ;;  %v592_v29 = vunpack.c.h.bf16 %v9493_v30 }
  0x74   : > { %7897 = vmatprep.mubr.msk.bf16.mxu0 %vm1443_vm1, %v9493_v30  ;;  %v9711_v30 = vld [vmem:[%s9356_s9 + $0x1b8] sm:$0xff]  }
  0x7b   : > { %7898 = vmatmul.mubr.msk.bf16.gmra.mxu0 %vm1443_vm1, %v9500_v31 }
  0x7c   : > { %7901 = vmatprep.mubr.msk.bf16.mxu0 %vm1443_vm1, %v9503_v32 }
  0x83   : > { %7902 = vmatmul.mubr.msk.bf16.gmra.mxu0 %vm1443_vm1, %v9510_v33  ;;  %v600_v33 = vunpack.c.h.bf16 %v9513_v34 }
  0x84   : > { %7905 = vmatprep.mubr.msk.bf16.mxu0 %vm1443_vm1, %v9513_v34  ;;  %v9735_v34 = vld [vmem:[%s9356_s9 + $0x1c8] sm:$0xff]  }
  0x8b   : > { %7906 = vmatmul.mubr.msk.bf16.gmra.mxu0 %vm1443_vm1, %v9520_v35 }
  0x8c   : > { %7909 = vmatprep.mubr.msk.bf16.mxu0 %vm1443_vm1, %v9523_v36 }
  0x93   : > { %7910 = vmatmul.mubr.msk.bf16.gmra.mxu0 %vm1443_vm1, %v9530_v37 }
  0x94   : > { %7913 = vmatprep.mubr.msk.bf16.mxu0 %vm1443_vm1, %v9533_v38 }
  0x9b   : > { %7914 = vmatmul.mubr.msk.bf16.gmra.mxu0 %vm1443_vm1, %v9540_v39 }
  0x9c   : > { %7917 = vmatprep.mubr.msk.bf16.mxu0 %vm1443_vm1, %v9543_v40 }
  0xa3   : > { %7918 = vmatmul.mubr.msk.bf16.gmra.mxu0 %vm1443_vm1, %v9550_v41 }
  0xa4   : > { %7921 = vmatprep.mubr.msk.bf16.mxu0 %vm1443_vm1, %v9553_v42 }
  0xab   : > { %7922 = vmatmul.mubr.msk.bf16.gmra.mxu0 %vm1443_vm1, %v9562_v47 }
  0xac   : > { %7925 = vmatprep.mubr.msk.bf16.mxu0 %vm1443_vm1, %v9567_v50 }
  0xb3   : > { %7926 = vmatmul.mubr.msk.bf16.gmra.mxu0 %vm1443_vm1, %v9576_v55 }
  0xb4   : > { %7929 = vmatprep.mubr.msk.bf16.mxu0 %vm1443_vm1, %v9581_v58 }
  0xbb   : > { %7930 = vmatmul.mubr.msk.bf16.gmra.mxu0 %vm1443_vm1, %v9588_v60 }
  0xbc   : > { %7933 = vmatprep.mubr.msk.bf16.mxu0 %vm1443_vm1, %v9595_v1 }
  0xc3   : > { %7934 = vmatmul.mubr.msk.bf16.gmra.mxu0 %vm1443_vm1, %v9606_v43 }
  0xc4   : > { %7937 = vmatprep.mubr.msk.bf16.mxu0 %vm1443_vm1, %v9611_v8 }
  0xcb   : > { %7938 = vmatmul.mubr.msk.bf16.gmra.mxu0 %vm1443_vm1, %v9624_v11 }
  0xcc   : > { %7941 = vmatprep.mubr.msk.bf16.mxu0 %vm1443_vm1, %v9629_v59 }
  0xd3   : > { %v7847_v49 = vpop.f32.mrf.mxu0  ;;  %7942 = vmatmul.mubr.msk.bf16.gmra.mxu0 %vm1443_vm1, %v9642_v15 }
  0xd4   : > { %7945 = vmatprep.mubr.msk.bf16.mxu0 %vm1443_vm1, %v9647_v7  ;;  %v1875_v63 = vadd.f32 %v7847_v49, %v9672_v56 }
  0xd5   : > { %v1866_v53 = vpop.f32.mrf.mxu0 }
  0xd6   : > { %v1867_v61 = vadd.f32 %v9672_v56, %v1866_v53  ;;  %v2891_v27 = vmax.f32 %v1875_v63, 0.0  ;;  %v8503_v63 = vpack.i.bf16 %v592_v29, %v591_v54  ;;  %v603_v29 = vunpack.c.l.bf16 %v9523_v36 }
  0xd7   : > { %v7848_v12 = vpop.f32.mrf.mxu0 }
  0xd8   : > { %v1878_v22 = vadd.f32 %v7848_v12, %v9672_v56  ;;  %v2889_v17 = vmax.f32 %v1867_v61, 0.0  ;;  %v593_v12 = vunpack.c.l.bf16 %v9500_v31  ;;  %8504 = vperm.xlu0 %8371, %v8503_v63  }
  0xd9   : > { %v1869_v0 = vpop.f32.mrf.mxu0 }
  0xda   : > { %v1870_v14 = vadd.f32 %v9672_v56, %v1869_v0  ;;  %v2892_v4 = vmax.f32 %v1878_v22, 0.0  ;;  %v8508_v0 = vpack.i.bf16 %v594_v13, %v593_v12  ;;  %v9739_v13 = vld [vmem:[%s9356_s9 + $0x1d0] sm:$0xff]  }
  0xdb   : > { %v7851_v5 = vpop.f32.mrf.mxu0  ;;  %7946 = vmatmul.mubr.msk.bf16.gmra.mxu0 %vm1443_vm1, %v9660_v19 }
  0xdc   : > { %v2890_v24 = vmax.f32 %v1870_v14, 0.0  ;;  %7949 = vmatprep.mubr.msk.bf16.mxu0 %vm1443_vm1, %v9665_v10  ;;  %v3146_v49 = vpack.c.bf16 %v2892_v4, %v2891_v27  ;;  %v1891_v57 = vadd.f32 %v7851_v5, %v9672_v56  ;;  %v9715_v4 = vld [vmem:[%s9356_s9 + $0x1c0] sm:$0xff]   ;;  %v596_v5 = vunpack.c.h.bf16 %v9503_v32  ;;  %8509 = vperm.xlu1 %8382, %v8508_v0  }
  0xdd   : > { %v1882_v44 = vpop.f32.mrf.mxu0 }
  0xde   : > { %v3145_v48 = vpack.c.bf16 %v2890_v24, %v2889_v17  ;;  %v1883_v53 = vadd.f32 %v9672_v56, %v1882_v44  ;;  %v2895_v31 = vmax.f32 %v1891_v57, 0.0  ;;  %v8513_v27 = vpack.i.bf16 %v596_v5, %v595_v3 }
  0xdf   : > { %v7852_v51 = vpop.f32.mrf.mxu0  ;;  %v8518_v44 = vpack.i.bf16 %v598_v16, %v597_v23  ;;  %v607_v5 = vunpack.c.l.bf16 %v9533_v38  ;;  %v609_v16 = vunpack.c.l.bf16 %v9540_v39 }
  0xe0   : > { %v1894_v21 = vadd.f32 %v7852_v51, %v9672_v56  ;;  %8105 = vmatprep.mubr.msk.bf16.mxu1 %vm3296_vm2, %v3145_v48  ;;  %v2893_v25 = vmax.f32 %v1883_v53, 0.0  ;;  %8514 = vperm.xlu0 %8371, %v8513_v27   ;;  %v602_v51 = vunpack.c.h.bf16 %v9520_v35 }
  0xe1   : > { %v1885_v28 = vpop.f32.mrf.mxu0  ;;  %8106 = vmatmul.mubr.msk.bf16.vlgmr.msra.gmra.mxu1 %vm3296_vm2, %v3146_v49  ;;  %v601_v49 = vunpack.c.l.bf16 %v9520_v35  ;;  %8519 = vperm.xlu1 %8382, %v8518_v44  }
  0xe2   : > { %v1886_v61 = vadd.f32 %v9672_v56, %v1885_v28  ;;  %v2896_v22 = vmax.f32 %v1894_v21, 0.0  ;;  %v8523_v21 = vpack.i.bf16 %v600_v33, %v599_v18  ;;  %v9763_v33 = vld [vmem:[%s9356_s9 + $0x1e0] sm:$0xff]  }
  0xe3   : > { %v7855_v62 = vpop.f32.mrf.mxu0  ;;  %7950 = vmatmul.mubr.msk.bf16.gmra.mxu0 %vm1443_vm1, %v9687_v26  ;;  %v8528_v54 = vpack.i.bf16 %v602_v51, %v601_v49  ;;  %v612_v49 = vunpack.c.h.bf16 %v9543_v40  ;;  %v613_v51 = vunpack.c.l.bf16 %v9550_v41 }
  0xe4   : > { %v2894_v2 = vmax.f32 %v1886_v61, 0.0  ;;  %7953 = vmatprep.mubr.msk.bf16.mxu0 %vm1443_vm1, %v9691_v45  ;;  %v3148_v24 = vpack.c.bf16 %v2896_v22, %v2895_v31  ;;  %v1907_v32 = vadd.f32 %v7855_v62, %v9672_v56  ;;  %8524 = vperm.xlu0 %8371, %v8523_v21   ;;  %v604_v61 = vunpack.c.h.bf16 %v9523_v36 }
  0xe5   : > { %v1898_v14 = vpop.f32.mrf.mxu0  ;;  %v605_v22 = vunpack.c.l.bf16 %v9530_v37  ;;  %v606_v62 = vunpack.c.h.bf16 %v9530_v37  ;;  %8529 = vperm.xlu1 %8382, %v8528_v54   ;;  %v608_v37 = vunpack.c.h.bf16 %v9533_v38  ;;  %v9759_v38 = vld [vmem:[%s9356_s9 + $0x1d8] sm:$0xff]  }
  0xe6   : > { %v3147_v17 = vpack.c.bf16 %v2894_v2, %v2893_v25  ;;  %v1899_v9 = vadd.f32 %v9672_v56, %v1898_v14  ;;  %v2899_v35 = vmax.f32 %v1907_v32, 0.0  ;;  %v8533_v2 = vpack.i.bf16 %v604_v61, %v603_v29 }
  0xe7   : > { %v7856_v6 = vpop.f32.mrf.mxu0  ;;  %v8538_v3 = vpack.i.bf16 %v606_v62, %v605_v22  ;;  %v8543_v44 = vpack.i.bf16 %v608_v37, %v607_v5  ;;  %v611_v32 = vunpack.c.l.bf16 %v9543_v40  ;;  %v617_v61 = vunpack.c.l.bf16 %v9562_v47 }
  0xe8   : > { %v1910_v46 = vadd.f32 %v7856_v6, %v9672_v56  ;;  %8109 = vmatprep.mubr.msk.bf16.mxu1 %vm3296_vm2, %v3147_v17  ;;  %v2897_v57 = vmax.f32 %v1899_v9, 0.0  ;;  %8534 = vperm.xlu0 %8371, %v8533_v2   ;;  %v610_v17 = vunpack.c.h.bf16 %v9540_v39  ;;  %v618_v22 = vunpack.c.h.bf16 %v9562_v47 }
  0xe9   : > { %v1901_v48 = vpop.f32.mrf.mxu0  ;;  %8110 = vmatmul.mubr.msk.bf16.gmra.mxu1 %vm3296_vm2, %v3148_v24  ;;  %8539 = vperm.xlu1 %8382, %v8538_v3   ;;  %v8553_v54 = vpack.i.bf16 %v612_v49, %v611_v32  ;;  %v621_v37 = vunpack.c.l.bf16 %v9576_v55 }
  0xea   : > { %v1902_v52 = vadd.f32 %v9672_v56, %v1901_v48  ;;  %v2900_v20 = vmax.f32 %v1910_v46, 0.0  ;;  %v8548_v9 = vpack.i.bf16 %v610_v17, %v609_v16  ;;  %v8568_v2 = vpack.i.bf16 %v618_v22, %v617_v61 }
  0xeb   : > { %v7859_v53 = vpop.f32.mrf.mxu0  ;;  %7954 = vmatmul.mubr.msk.bf16.gmra.mxu0 %vm1443_vm1, %v9711_v30  ;;  %v622_v16 = vunpack.c.h.bf16 %v9576_v55  ;;  %v624_v55 = vunpack.c.h.bf16 %v9581_v58 }
  0xec   : > { %v2898_v28 = vmax.f32 %v1902_v52, 0.0  ;;  %7957 = vmatprep.mubr.msk.bf16.mxu0 %vm1443_vm1, %v9715_v4  ;;  %v3150_v0 = vpack.c.bf16 %v2900_v20, %v2899_v35  ;;  %v1923_v36 = vadd.f32 %v7859_v53, %v9672_v56  ;;  %8544 = vperm.xlu0 %8371, %v8543_v44   ;;  %v614_v52 = vunpack.c.h.bf16 %v9550_v41 }
  0xed   : > { %v1914_v12 = vpop.f32.mrf.mxu0  ;;  %8549 = vperm.xlu1 %8382, %v8548_v9   ;;  %v615_v35 = vunpack.c.l.bf16 %v9553_v42  ;;  %v616_v41 = vunpack.c.h.bf16 %v9553_v42  ;;  %v9783_v42 = vld [vmem:[%s9356_s9 + $0x1e8] sm:$0xff]   ;;  %v8578_v44 = vpack.i.bf16 %v622_v16, %v621_v37 }
  0xee   : > { %v3149_v63 = vpack.c.bf16 %v2898_v28, %v2897_v57  ;;  %v1915_v31 = vadd.f32 %v9672_v56, %v1914_v12  ;;  %v2903_v39 = vmax.f32 %v1923_v36, 0.0  ;;  %v8558_v57 = vpack.i.bf16 %v614_v52, %v613_v51  ;;  %v9787_v36 = vld [vmem:[%s9356_s9 + $0x1f0] sm:$0xff]  }
  0xef   : > { %v7860_v25 = vpop.f32.mrf.mxu0 }
  0xf0   : > { %v1926_v14 = vadd.f32 %v7860_v25, %v9672_v56  ;;  %8113 = vmatprep.mubr.msk.bf16.mxu1 %vm3296_vm2, %v3149_v63  ;;  %v2901_v46 = vmax.f32 %v1915_v31, 0.0  ;;  %8554 = vperm.xlu0 %8371, %v8553_v54   ;;  %v8563_v25 = vpack.i.bf16 %v616_v41, %v615_v35  ;;  %v628_v35 = vunpack.c.h.bf16 %v9595_v1 }
  0xf1   : > { %v1917_v23 = vpop.f32.mrf.mxu0  ;;  %8114 = vmatmul.mubr.msk.bf16.gmra.mxu1 %vm3296_vm2, %v3150_v0  ;;  %8559 = vperm.xlu1 %8382, %v8558_v57   ;;  %v627_v57 = vunpack.c.l.bf16 %v9595_v1 }
  0xf2   : > { %v1918_v24 = vadd.f32 %v9672_v56, %v1917_v23  ;;  %v2904_v6 = vmax.f32 %v1926_v14, 0.0  ;;  %v619_v14 = vunpack.c.l.bf16 %v9567_v50  ;;  %v620_v23 = vunpack.c.h.bf16 %v9567_v50 }
  0xf3   : > { %v7863_v27 = vpop.f32.mrf.mxu0  ;;  %7958 = vmatmul.mubr.msk.bf16.gmra.mxu0 %vm1443_vm1, %v9735_v34 }
  0xf4   : > { %v2902_v18 = vmax.f32 %v1918_v24, 0.0  ;;  %7961 = vmatprep.mubr.msk.bf16.mxu0 %vm1443_vm1, %v9739_v13  ;;  %v3152_v53 = vpack.c.bf16 %v2904_v6, %v2903_v39  ;;  %v1939_v40 = vadd.f32 %v7863_v27, %v9672_v56  ;;  %8564 = vperm.xlu0 %8371, %v8563_v25   ;;  %v8573_v27 = vpack.i.bf16 %v620_v23, %v619_v14 }
  0xf5   : > { %v1930_v48 = vpop.f32.mrf.mxu0  ;;  %8569 = vperm.xlu1 %8382, %v8568_v2   ;;  %v625_v39 = vunpack.c.l.bf16 %v9588_v60  ;;  %v631_v2 = vunpack.c.l.bf16 %v9611_v8  ;;  %v634_v14 = vunpack.c.h.bf16 %v9624_v11 }
  0xf6   : > { %v3151_v20 = vpack.c.bf16 %v2902_v18, %v2901_v46  ;;  %v1931_v28 = vadd.f32 %v9672_v56, %v1930_v48  ;;  %v2907_v47 = vmax.f32 %v1939_v40, 0.0  ;;  %v623_v18 = vunpack.c.l.bf16 %v9581_v58  ;;  %v9807_v58 = vld [vmem:[%s9356_s9 + $0x1f8] sm:$0xff]  }
  0xf7   : > { %v7864_v21 = vpop.f32.mrf.mxu0  ;;  %v626_v48 = vunpack.c.h.bf16 %v9588_v60  ;;  %v629_v40 = vunpack.c.l.bf16 %v9606_v43 }
  0xf8   : > { %v1942_v29 = vadd.f32 %v7864_v21, %v9672_v56  ;;  %8117 = vmatprep.mubr.msk.bf16.mxu1 %vm3296_vm2, %v3151_v20  ;;  %v2905_v3 = vmax.f32 %v1931_v28, 0.0  ;;  %8574 = vperm.xlu0 %8371, %v8573_v27   ;;  %v8583_v20 = vpack.i.bf16 %v624_v55, %v623_v18  ;;  %v638_v18 = vunpack.c.h.bf16 %v9642_v15 }
  0xf9   : > { %v1933_v12 = vpop.f32.mrf.mxu0  ;;  %8118 = vmatmul.mubr.msk.bf16.gmra.mxu1 %vm3296_vm2, %v3152_v53  ;;  %8579 = vperm.xlu1 %8382, %v8578_v44   ;;  %v8588_v53 = vpack.i.bf16 %v626_v48, %v625_v39  ;;  %v9835_v44 = vld [vmem:[%s9356_s9 + $0x210] sm:$0xff]  }
  0xfa   : > { %v1934_v62 = vadd.f32 %v9672_v56, %v1933_v12  ;;  %v2908_v63 = vmax.f32 %v1942_v29, 0.0  ;;  %v9811_v29 = vld [vmem:[%s9356_s9 + $0x200] sm:$0xff]   ;;  %v630_v12 = vunpack.c.h.bf16 %v9606_v43  ;;  %v632_v43 = vunpack.c.h.bf16 %v9611_v8  ;;  %v9831_v8 = vld [vmem:[%s9356_s9 + $0x208] sm:$0xff]  }
  0xfb   : > { %v7867_v0 = vpop.f32.mrf.mxu0  ;;  %7962 = vmatmul.mubr.msk.bf16.gmra.mxu0 %vm1443_vm1, %v9759_v38 }
  0xfc   : > { %v2906_v31 = vmax.f32 %v1934_v62, 0.0  ;;  %7965 = vmatprep.mubr.msk.bf16.mxu0 %vm1443_vm1, %v9763_v33  ;;  %v3154_v24 = vpack.c.bf16 %v2908_v63, %v2907_v47  ;;  %v1955_v50 = vadd.f32 %v7867_v0, %v9672_v56  ;;  %8584 = vperm.xlu0 %8371, %v8583_v20   ;;  %v8593_v62 = vpack.i.bf16 %v628_v35, %v627_v57 }
  0xfd   : > { %v1946_v5 = vpop.f32.mrf.mxu0  ;;  %8589 = vperm.xlu1 %8382, %v8588_v53   ;;  %v8598_v63 = vpack.i.bf16 %v630_v12, %v629_v40  ;;  %v8603_v37 = vpack.i.bf16 %v632_v43, %v631_v2  ;;  %v641_v53 = vunpack.c.l.bf16 %v9660_v19 }
  0xfe   : > { %v3153_v17 = vpack.c.bf16 %v2906_v31, %v2905_v3  ;;  %v1947_v9 = vadd.f32 %v9672_v56, %v1946_v5  ;;  %v2911_v60 = vmax.f32 %v1955_v50, 0.0  ;;  %v633_v31 = vunpack.c.l.bf16 %v9624_v11 }
  0xff   : > { %v7868_v6 = vpop.f32.mrf.mxu0 }
 0x100   : > { %v1958_v46 = vadd.f32 %v7868_v6, %v9672_v56  ;;  %8121 = vmatprep.mubr.msk.bf16.mxu1 %vm3296_vm2, %v3153_v17  ;;  %v2909_v21 = vmax.f32 %v1947_v9, 0.0  ;;  %8594 = vperm.xlu0 %8371, %v8593_v62   ;;  %v8608_v16 = vpack.i.bf16 %v634_v14, %v633_v31  ;;  %v635_v6 = vunpack.c.l.bf16 %v9629_v59 }
 0x101   : > { %v1949_v32 = vpop.f32.mrf.mxu0  ;;  %8122 = vmatmul.mubr.msk.bf16.gmra.mxu1 %vm3296_vm2, %v3154_v24  ;;  %8599 = vperm.xlu1 %8382, %v8598_v63   ;;  %v636_v9 = vunpack.c.h.bf16 %v9629_v59  ;;  %v644_v62 = vunpack.c.h.bf16 %v9665_v10  ;;  %v645_v63 = vunpack.c.l.bf16 %v9687_v26 }
 0x102   : > { %v1950_v49 = vadd.f32 %v9672_v56, %v1949_v32  ;;  %v2912_v51 = vmax.f32 %v1958_v46, 0.0  ;;  %v637_v46 = vunpack.c.l.bf16 %v9642_v15  ;;  %v640_v15 = vunpack.c.h.bf16 %v9647_v7 }
 0x103   : > { %v7871_v52 = vpop.f32.mrf.mxu0  ;;  %7966 = vmatmul.mubr.msk.bf16.gmra.mxu0 %vm1443_vm1, %v9783_v42  ;;  %v8613_v39 = vpack.i.bf16 %v636_v9, %v635_v6 }
 0x104   : > { %v2910_v54 = vmax.f32 %v1950_v49, 0.0  ;;  %7969 = vmatprep.mubr.msk.bf16.mxu0 %vm1443_vm1, %v9787_v36  ;;  %v3156_v61 = vpack.c.bf16 %v2912_v51, %v2911_v60  ;;  %v1971_v1 = vadd.f32 %v7871_v52, %v9672_v56  ;;  %8604 = vperm.xlu0 %8371, %v8603_v37   ;;  %v8618_v48 = vpack.i.bf16 %v638_v18, %v637_v46 }
 0x105   : > { %v1962_v28 = vpop.f32.mrf.mxu0  ;;  %8609 = vperm.xlu1 %8382, %v8608_v16   ;;  %v639_v52 = vunpack.c.l.bf16 %v9647_v7  ;;  %v9855_v7 = vld [vmem:[%s9356_s9 + $0x218] sm:$0xff]   ;;  %v650_v37 = vunpack.c.h.bf16 %v9711_v30  ;;  %v651_v46 = vunpack.c.l.bf16 %v9715_v4 }
 0x106   : > { %v3155_v41 = vpack.c.bf16 %v2910_v54, %v2909_v21  ;;  %v1963_v0 = vadd.f32 %v9672_v56, %v1962_v28  ;;  %v2915_v11 = vmax.f32 %v1971_v1, 0.0  ;;  %v642_v21 = vunpack.c.h.bf16 %v9660_v19 }
 0x107   : > { %v7872_v22 = vpop.f32.mrf.mxu0  ;;  %v8623_v28 = vpack.i.bf16 %v640_v15, %v639_v52 }
 0x108   : > { %v1974_v25 = vadd.f32 %v7872_v22, %v9672_v56  ;;  %8125 = vmatprep.mubr.msk.bf16.mxu1 %vm3296_vm2, %v3155_v41  ;;  %v2913_v17 = vmax.f32 %v1963_v0, 0.0  ;;  %8614 = vperm.xlu0 %8371, %v8613_v39   ;;  %v8628_v35 = vpack.i.bf16 %v642_v21, %v641_v53  ;;  %v643_v41 = vunpack.c.l.bf16 %v9665_v10  ;;  %v9859_v22 = vld [vmem:[%s9356_s9 + $0x220] sm:$0xff]  }
 0x109   : > { %v1965_v3 = vpop.f32.mrf.mxu0  ;;  %8126 = vmatmul.mubr.msk.bf16.gmra.mxu1 %vm3296_vm2, %v3156_v61  ;;  %8619 = vperm.xlu1 %8382, %v8618_v48   ;;  %v646_v0 = vunpack.c.h.bf16 %v9687_v26  ;;  %v648_v26 = vunpack.c.h.bf16 %v9691_v45  ;;  %v654_v39 = vunpack.c.h.bf16 %v9735_v34 }
 0x10a   : > { %v1966_v47 = vadd.f32 %v9672_v56, %v1965_v3  ;;  %v2916_v5 = vmax.f32 %v1974_v25, 0.0  ;;  %v8633_v3 = vpack.i.bf16 %v644_v62, %v643_v41  ;;  %v9906_v62 = vld [vmem:[%s9356_s9 + $0x240] sm:$0xff]  }
 0x10b   : > { %v7875_v23 = vpop.f32.mrf.mxu0  ;;  %7970 = vmatmul.mubr.msk.bf16.gmra.mxu0 %vm1443_vm1, %v9807_v58  ;;  %v8638_v43 = vpack.i.bf16 %v646_v0, %v645_v63 }
 0x10c   : > { %v2914_v24 = vmax.f32 %v1966_v47, 0.0  ;;  %7973 = vmatprep.mubr.msk.bf16.mxu0 %vm1443_vm1, %v9811_v29  ;;  %v3158_v32 = vpack.c.bf16 %v2916_v5, %v2915_v11  ;;  %v1987_v59 = vadd.f32 %v7875_v23, %v9672_v56  ;;  %8624 = vperm.xlu0 %8371, %v8623_v28   ;;  %v647_v47 = vunpack.c.l.bf16 %v9691_v45  ;;  %v9879_v45 = vld [vmem:[%s9356_s9 + $0x228] sm:$0xff]  }
 0x10d   : > { %v1978_v27 = vpop.f32.mrf.mxu0  ;;  %8629 = vperm.xlu1 %8382, %v8628_v35   ;;  %v649_v23 = vunpack.c.l.bf16 %v9711_v30 }
 0x10e   : > { %v3157_v50 = vpack.c.bf16 %v2914_v24, %v2913_v17  ;;  %v1979_v49 = vadd.f32 %v9672_v56, %v1978_v27  ;;  %v2919_v19 = vmax.f32 %v1987_v59, 0.0  ;;  %v8643_v6 = vpack.i.bf16 %v648_v26, %v647_v47 }
 0x10f   : > { %v7876_v55 = vpop.f32.mrf.mxu0  ;;  %v8648_v11 = vpack.i.bf16 %v650_v37, %v649_v23  ;;  %v663_v26 = vunpack.c.l.bf16 %v9787_v36 }
 0x110   : > { %v1990_v51 = vadd.f32 %v7876_v55, %v9672_v56  ;;  %8129 = vmatprep.mubr.msk.bf16.mxu1 %vm3296_vm2, %v3157_v50  ;;  %v2917_v40 = vmax.f32 %v1979_v49, 0.0  ;;  %8634 = vperm.xlu0 %8371, %v8633_v3   ;;  %v9883_v50 = vld [vmem:[%s9356_s9 + $0x230] sm:$0xff]   ;;  %v653_v55 = vunpack.c.l.bf16 %v9735_v34  ;;  %v656_v34 = vunpack.c.h.bf16 %v9739_v13 }
 0x111   : > { %v1981_v20 = vpop.f32.mrf.mxu0  ;;  %8130 = vmatmul.mubr.msk.bf16.gmra.mxu1 %vm3296_vm2, %v3158_v32  ;;  %8639 = vperm.xlu1 %8382, %v8638_v43   ;;  %v652_v32 = vunpack.c.h.bf16 %v9715_v4  ;;  %v655_v4 = vunpack.c.l.bf16 %v9739_v13  ;;  %v661_v3 = vunpack.c.l.bf16 %v9783_v42  ;;  %v662_v43 = vunpack.c.h.bf16 %v9783_v42 }
 0x112   : > { %v1982_v54 = vadd.f32 %v9672_v56, %v1981_v20  ;;  %v2920_v57 = vmax.f32 %v1990_v51, 0.0  ;;  %v8658_v59 = vpack.i.bf16 %v654_v39, %v653_v55  ;;  %v664_v42 = vunpack.c.h.bf16 %v9787_v36 }
 0x113   : > { %v7879_v60 = vpop.f32.mrf.mxu0  ;;  %7974 = vmatmul.mubr.msk.bf16.gmra.mxu0 %vm1443_vm1, %v9831_v8  ;;  %v8653_v52 = vpack.i.bf16 %v652_v32, %v651_v46  ;;  %v667_v32 = vunpack.c.l.bf16 %v9811_v29  ;;  %v668_v55 = vunpack.c.h.bf16 %v9811_v29 }
 0x114   : > { %v2918_v12 = vmax.f32 %v1982_v54, 0.0  ;;  %7977 = vmatprep.mubr.msk.bf16.mxu0 %vm1443_vm1, %v9835_v44  ;;  %v3160_v2 = vpack.c.bf16 %v2920_v57, %v2919_v19  ;;  %v2003_v10 = vadd.f32 %v7879_v60, %v9672_v56  ;;  %8644 = vperm.xlu0 %8371, %v8643_v6   ;;  %v657_v57 = vunpack.c.l.bf16 %v9759_v38  ;;  %v9903_v19 = vld [vmem:[%s9356_s9 + $0x238] sm:$0xff]  }
 0x115   : > { %v1994_v61 = vpop.f32.mrf.mxu0  ;;  %8649 = vperm.xlu1 %8382, %v8648_v11   ;;  %v658_v60 = vunpack.c.h.bf16 %v9759_v38  ;;  %v659_v38 = vunpack.c.l.bf16 %v9763_v33 }
 0x116   : > { %v3159_v25 = vpack.c.bf16 %v2918_v12, %v2917_v40  ;;  %v1995_v31 = vadd.f32 %v9672_v56, %v1994_v61  ;;  %v2923_v30 = vmax.f32 %v2003_v10, 0.0  ;;  %v8663_v40 = vpack.i.bf16 %v656_v34, %v655_v4 }
 0x117   : > { %v7880_v1 = vpop.f32.mrf.mxu0  ;;  %v8668_v63 = vpack.i.bf16 %v658_v60, %v657_v57  ;;  %v672_v4 = vunpack.c.h.bf16 %v9835_v44  ;;  %v673_v34 = vunpack.c.l.bf16 %v9855_v7 }
 0x118   : > { %v2006_v14 = vadd.f32 %v7880_v1, %v9672_v56  ;;  %8133 = vmatprep.mubr.msk.bf16.mxu1 %vm3296_vm2, %v3159_v25  ;;  %v2921_v27 = vmax.f32 %v1995_v31, 0.0  ;;  %8654 = vperm.xlu0 %8371, %v8653_v52   ;;  %v660_v25 = vunpack.c.h.bf16 %v9763_v33  ;;  %v8678_v33 = vpack.i.bf16 %v662_v43, %v661_v3 }
 0x119   : > { %v1997_v5 = vpop.f32.mrf.mxu0  ;;  %8134 = vmatmul.mubr.msk.bf16.gmra.mxu1 %vm3296_vm2, %v3160_v2  ;;  %8659 = vperm.xlu1 %8382, %v8658_v59   ;;  %v670_v52 = vunpack.c.h.bf16 %v9831_v8  ;;  %v678_v3 = vunpack.c.h.bf16 %v9879_v45 }
 0x11a   : > { %v1998_v16 = vadd.f32 %v9672_v56, %v1997_v5  ;;  %v2924_v17 = vmax.f32 %v2006_v14, 0.0  ;;  %v8673_v47 = vpack.i.bf16 %v660_v25, %v659_v38  ;;  %v676_v38 = vunpack.c.h.bf16 %v9859_v22 }
 0x11b   : > { %v7883_v24 = vpop.f32.mrf.mxu0  ;;  %7978 = vmatmul.mubr.msk.bf16.gmra.mxu0 %vm1443_vm1, %v9855_v7 }
 0x11c   : > { %v2922_v9 = vmax.f32 %v1998_v16, 0.0  ;;  %7981 = vmatprep.mubr.msk.bf16.mxu0 %vm1443_vm1, %v9859_v22  ;;  %v3162_v49 = vpack.c.bf16 %v2924_v17, %v2923_v30  ;;  %v2019_v53 = vadd.f32 %v7883_v24, %v9672_v56  ;;  %8664 = vperm.xlu0 %8371, %v8663_v40   ;;  %v665_v17 = vunpack.c.l.bf16 %v9807_v58  ;;  %v9930_v30 = vld [vmem:[%s9356_s9 + $0x250] sm:$0xff]  }
 0x11d   : > { %v2010_v18 = vpop.f32.mrf.mxu0  ;;  %8669 = vperm.xlu1 %8382, %v8668_v63   ;;  %v666_v24 = vunpack.c.h.bf16 %v9807_v58  ;;  %v669_v58 = vunpack.c.l.bf16 %v9831_v8  ;;  %v675_v63 = vunpack.c.l.bf16 %v9859_v22 }
 0x11e   : > { %v3161_v48 = vpack.c.bf16 %v2922_v9, %v2921_v27  ;;  %v2011_v20 = vadd.f32 %v9672_v56, %v2010_v18  ;;  %v2927_v13 = vmax.f32 %v2019_v53, 0.0  ;;  %v9927_v27 = vld [vmem:[%s9356_s9 + $0x248] sm:$0xff]   ;;  %v8683_v9 = vpack.i.bf16 %v664_v42, %v663_v26 }
 0x11f   : > { %v7884_v51 = vpop.f32.mrf.mxu0  ;;  %v8688_v18 = vpack.i.bf16 %v666_v24, %v665_v17  ;;  %v8698_v29 = vpack.i.bf16 %v670_v52, %v669_v58  ;;  %v682_v42 = vunpack.c.h.bf16 %v9903_v19  ;;  %v437_v17 = vld [vmem:[%s9356_s9 + $0x268] sm:$0xff]   ;;  %v686_v58 = vunpack.c.h.bf16 %v9927_v27 }
 0x120   : > { %v2022_v15 = vadd.f32 %v7884_v51, %v9672_v56  ;;  %8137 = vmatprep.mubr.msk.bf16.mxu1 %vm3296_vm2, %v3161_v48  ;;  %v2925_v12 = vmax.f32 %v2011_v20, 0.0  ;;  %8674 = vperm.xlu0 %8371, %v8673_v47   ;;  %v8693_v51 = vpack.i.bf16 %v668_v55, %v667_v32 }
 0x121   : > { %v2013_v21 = vpop.f32.mrf.mxu0  ;;  %8138 = vmatmul.mubr.msk.bf16.gmra.mxu1 %vm3296_vm2, %v3162_v49  ;;  %8679 = vperm.xlu1 %8382, %v8678_v33  }
 0x122   : > { %v2014_v54 = vadd.f32 %v9672_v56, %v2013_v21  ;;  %v2928_v28 = vmax.f32 %v2022_v15, 0.0  ;;  %v671_v21 = vunpack.c.l.bf16 %v9835_v44  ;;  %v9951_v44 = vld [vmem:[%s9356_s9 + $0x258] sm:$0xff]  }
 0x123   : > { %v7887_v35 = vpop.f32.mrf.mxu0  ;;  %7982 = vmatmul.mubr.msk.bf16.gmra.mxu0 %vm1443_vm1, %v9879_v45 }
 0x124   : > { %v2926_v41 = vmax.f32 %v2014_v54, 0.0  ;;  %7985 = vmatprep.mubr.msk.bf16.mxu0 %vm1443_vm1, %v9883_v50  ;;  %v3164_v2 = vpack.c.bf16 %v2928_v28, %v2927_v13  ;;  %v2035_v10 = vadd.f32 %v7887_v35, %v9672_v56  ;;  %8684 = vperm.xlu0 %8371, %v8683_v9   ;;  %v8703_v60 = vpack.i.bf16 %v672_v4, %v671_v21  ;;  %v9954_v13 = vld [vmem:[%s9356_s9 + $0x260] sm:$0xff]  }
 0x125   : > { %v2026_v61 = vpop.f32.mrf.mxu0  ;;  %8689 = vperm.xlu1 %8382, %v8688_v18   ;;  %v674_v28 = vunpack.c.h.bf16 %v9855_v7  ;;  %v677_v7 = vunpack.c.l.bf16 %v9879_v45  ;;  %v680_v45 = vunpack.c.h.bf16 %v9883_v50  ;;  %v690_v21 = vunpack.c.h.bf16 %v9951_v44 }
 0x126   : > { %v3163_v0 = vpack.c.bf16 %v2926_v41, %v2925_v12  ;;  %v2027_v31 = vadd.f32 %v9672_v56, %v2026_v61  ;;  %v2931_v46 = vmax.f32 %v2035_v10, 0.0  ;;  %v679_v10 = vunpack.c.l.bf16 %v9883_v50  ;;  %v9976_v50 = vld [vmem:[%s9356_s9 + $0x270] sm:$0xff]  }
 0x127   : > { %v7888_v1 = vpop.f32.mrf.mxu0  ;;  %v8708_v61 = vpack.i.bf16 %v674_v28, %v673_v34  ;;  %v8718_v22 = vpack.i.bf16 %v678_v3, %v677_v7  ;;  %v441_v34 = vld [vmem:[%s9356_s9 + $0x278] sm:$0xff]   ;;  %v691_v28 = vunpack.c.l.bf16 %v9954_v13 }
 0x128   : > { %v2038_v14 = vadd.f32 %v7888_v1, %v9672_v56  ;;  %8141 = vmatprep.mubr.msk.bf16.mxu1 %vm3296_vm2, %v3163_v0  ;;  %v2929_v6 = vmax.f32 %v2027_v31, 0.0  ;;  %8694 = vperm.xlu0 %8371, %v8693_v51   ;;  %v8713_v1 = vpack.i.bf16 %v676_v38, %v675_v63  ;;  %v8723_v24 = vpack.i.bf16 %v680_v45, %v679_v10  ;;  %v10002_v38 = vld [vmem:[%s12158_s2] ss:$0 sm:$0xff]  ;;  %v445_v45 = vld [vmem:[%s9356_s9 + $0x288] sm:$0xff]  }
 0x129   : > { %v2029_v5 = vpop.f32.mrf.mxu0  ;;  %8142 = vmatmul.mubr.msk.bf16.gmra.mxu1 %vm3296_vm2, %v3164_v2  ;;  %8699 = vperm.xlu1 %8382, %v8698_v29   ;;  %v689_v29 = vunpack.c.l.bf16 %v9951_v44  ;;  %v694_v63 = vunpack.c.h.bf16 %v437_v17 }
 0x12a   : > { %v2030_v23 = vadd.f32 %v9672_v56, %v2029_v5  ;;  %v2932_v37 = vmax.f32 %v2038_v14, 0.0 }
 0x12b   : > { %v7891_v16 = vpop.f32.mrf.mxu0  ;;  %7986 = vmatmul.mubr.msk.bf16.gmra.mxu0 %vm1443_vm1, %v9903_v19 }
 0x12c   : > { %v2930_v11 = vmax.f32 %v2030_v23, 0.0  ;;  %7989 = vmatprep.mubr.msk.bf16.mxu0 %vm1443_vm1, %v9906_v62  ;;  %v3166_v48 = vpack.c.bf16 %v2932_v37, %v2931_v46  ;;  %v2051_v15 = vadd.f32 %v7891_v16, %v9672_v56  ;;  %8704 = vperm.xlu0 %8371, %v8703_v60   ;;  %v681_v23 = vunpack.c.l.bf16 %v9903_v19  ;;  %v443_v60 = vld [vmem:[%s9356_s9 + $0x280] sm:$0xff]  }
 0x12d   : > { %v2042_v36 = vpop.f32.mrf.mxu0  ;;  %8709 = vperm.xlu1 %8382, %v8708_v61   ;;  %v683_v46 = vunpack.c.l.bf16 %v9906_v62  ;;  %v685_v19 = vunpack.c.l.bf16 %v9927_v27 }
 0x12e   : > { %v3165_v39 = vpack.c.bf16 %v2930_v11, %v2929_v6  ;;  %v2043_v59 = vadd.f32 %v9672_v56, %v2042_v36  ;;  %v2935_v12 = vmax.f32 %v2051_v15, 0.0  ;;  %v8728_v9 = vpack.i.bf16 %v682_v42, %v681_v23  ;;  %v447_v23 = vld [vmem:[%s9356_s9 + $0x290] sm:$0xff]  }
 0x12f   : > { %v7892_v49 = vpop.f32.mrf.mxu0  ;;  %v684_v36 = vunpack.c.h.bf16 %v9906_v62  ;;  %v8738_v62 = vpack.i.bf16 %v686_v58, %v685_v19 }
 0x130   : > { %v2054_v20 = vadd.f32 %v7892_v49, %v9672_v56  ;;  %8145 = vmatprep.mubr.msk.bf16.mxu1 %vm3296_vm2, %v3165_v39  ;;  %v2933_v35 = vmax.f32 %v2043_v59, 0.0  ;;  %8714 = vperm.xlu0 %8371, %v8713_v1   ;;  %v687_v59 = vunpack.c.l.bf16 %v9930_v30  ;;  %v695_v1 = vunpack.c.l.bf16 %v9976_v50 }
 0x131   : > { %v2045_v53 = vpop.f32.mrf.mxu0  ;;  %8146 = vmatmul.mubr.msk.bf16.gmra.mxu1 %vm3296_vm2, %v3166_v48  ;;  %8719 = vperm.xlu1 %8382, %v8718_v22   ;;  %v8733_v39 = vpack.i.bf16 %v684_v36, %v683_v46  ;;  %v698_v22 = vunpack.c.h.bf16 %v441_v34 }
 0x132   : > { %v2046_v8 = vadd.f32 %v9672_v56, %v2045_v53  ;;  %v2936_v54 = vmax.f32 %v2054_v20, 0.0 }
 0x133   : > { %v7895_v57 = vpop.f32.mrf.mxu0  ;;  %7990 = vmatmul.mubr.msk.bf16.gmra.mxu0 %vm1443_vm1, %v9927_v27  ;;  %v688_v27 = vunpack.c.h.bf16 %v9930_v30 }
 0x134   : > { %v2934_v40 = vmax.f32 %v2046_v8, 0.0  ;;  %7993 = vmatprep.mubr.msk.bf16.mxu0 %vm1443_vm1, %v9930_v30  ;;  %v3168_v25 = vpack.c.bf16 %v2936_v54, %v2935_v12  ;;  %v2067_v14 = vadd.f32 %v7895_v57, %v9672_v56  ;;  %8724 = vperm.xlu0 %8371, %v8723_v24   ;;  %v8748_v30 = vpack.i.bf16 %v690_v21, %v689_v29 }
 0x135   : > { %v2058_v41 = vpop.f32.mrf.mxu0  ;;  %8729 = vperm.xlu1 %8382, %v8728_v9   ;;  %v693_v12 = vunpack.c.l.bf16 %v437_v17  ;;  %v700_v24 = vunpack.c.h.bf16 %v443_v60  ;;  %v702_v9 = vunpack.c.h.bf16 %v445_v45 }
 0x136   : > { %v3167_v0 = vpack.c.bf16 %v2934_v40, %v2933_v35  ;;  %v2059_v43 = vadd.f32 %v9672_v56, %v2058_v41  ;;  %v2939_v6 = vmax.f32 %v2067_v14, 0.0  ;;  %v692_v35 = vunpack.c.h.bf16 %v9954_v13 }
 0x137   : > { %v7896_v2 = vpop.f32.mrf.mxu0  ;;  %v696_v14 = vunpack.c.h.bf16 %v9976_v50 }
 0x138   : > { %v2070_v31 = vadd.f32 %v7896_v2, %v9672_v56  ;;  %8149 = vmatprep.mubr.msk.bf16.mxu1 %vm3296_vm2, %v3167_v0  ;;  %v2937_v37 = vmax.f32 %v2059_v43, 0.0  ;;  %8734 = vperm.xlu0 %8371, %v8733_v39   ;;  %v8753_v61 = vpack.i.bf16 %v692_v35, %v691_v28  ;;  %v8758_v2 = vpack.i.bf16 %v694_v63, %v693_v12 }
 0x139   : > { %v2061_v47 = vpop.f32.mrf.mxu0  ;;  %8150 = vmatmul.mubr.msk.bf16.gmra.mxu1 %vm3296_vm2, %v3168_v25  ;;  %8739 = vperm.xlu1 %8382, %v8738_v62   ;;  %v8763_v42 = vpack.i.bf16 %v696_v14, %v695_v1  ;;  %v703_v39 = vunpack.c.l.bf16 %v447_v23 }
 0x13a   : > { %v2062_v5 = vadd.f32 %v9672_v56, %v2061_v47  ;;  %v2940_v33 = vmax.f32 %v2070_v31, 0.0  ;;  %v697_v47 = vunpack.c.l.bf16 %v441_v34 }
 0x13b   : > { %v7899_v26 = vpop.f32.mrf.mxu0  ;;  %7994 = vmatmul.mubr.msk.bf16.gmra.mxu0 %vm1443_vm1, %v9951_v44 }
 0x13c   : > { %v2938_v16 = vmax.f32 %v2062_v5, 0.0  ;;  %7997 = vmatprep.mubr.msk.bf16.mxu0 %vm1443_vm1, %v9954_v13  ;;  %v3170_v32 = vpack.c.bf16 %v2940_v33, %v2939_v6  ;;  %v2083_v51 = vadd.f32 %v7899_v26, %v9672_v56 }
 0x13d   : > { %v2074_v11 = vpop.f32.mrf.mxu0  ;;  %8749 = vperm.xlu1 %8382, %v8748_v30  }
 0x13e   : > { %v3169_v18 = vpack.c.bf16 %v2938_v16, %v2937_v37  ;;  %v2075_v48 = vadd.f32 %v9672_v56, %v2074_v11  ;;  %v2943_v54 = vmax.f32 %v2083_v51, 0.0  ;;  %v8768_v37 = vpack.i.bf16 %v698_v22, %v697_v47 }
 0x13f   : > { %v7900_v55 = vpop.f32.mrf.mxu0  ;;  %v699_v16 = vunpack.c.l.bf16 %v443_v60 }
 0x140   : > { %v2086_v49 = vadd.f32 %v7900_v55, %v9672_v56  ;;  %8153 = vmatprep.mubr.msk.bf16.mxu1 %vm3296_vm2, %v3169_v18  ;;  %v2941_v4 = vmax.f32 %v2075_v48, 0.0  ;;  %v449_v48 = vld [vmem:[%s9356_s9 + $0x298] sm:$0xff]  }
 0x141   : > { %v2077_v52 = vpop.f32.mrf.mxu0  ;;  %8154 = vmatmul.mubr.msk.bf16.gmra.mxu1 %vm3296_vm2, %v3170_v32  ;;  %8759 = vperm.xlu1 %8382, %v8758_v2   ;;  %v8773_v18 = vpack.i.bf16 %v700_v24, %v699_v16  ;;  %v705_v62 = vunpack.c.l.bf16 %v449_v48  ;;  %v10050_v24 = vld [vmem:[%s9356_s9 + $0x2c8] sm:$0xff]  }
 0x142   : > { %v2078_v20 = vadd.f32 %v9672_v56, %v2077_v52  ;;  %v2944_v15 = vmax.f32 %v2086_v49, 0.0  ;;  %v8743_v56 = vpack.i.bf16 %v688_v27, %v687_v59  ;;  %v704_v49 = vunpack.c.h.bf16 %v447_v23 }
 0x143   : > { %v7903_v53 = vpop.f32.mrf.mxu0  ;;  %7998 = vmatmul.mubr.msk.bf16.gmra.mxu0 %vm1443_vm1, %v437_v17  ;;  %v706_v59 = vunpack.c.h.bf16 %v449_v48 }
 0x144   : > { %v2942_v8 = vmax.f32 %v2078_v20, 0.0  ;;  %8001 = vmatprep.mubr.msk.bf16.mxu0 %vm1443_vm1, %v9976_v50  ;;  %8744 = vperm.xlu0 %8371, %v8743_v56   ;;  %v3172_v41 = vpack.c.bf16 %v2944_v15, %v2943_v54  ;;  %v2099_v13 = vadd.f32 %v10002_v38, %v7903_v53  ;;  %v701_v50 = vunpack.c.l.bf16 %v445_v45  ;;  %v451_v15 = vld [vmem:[%s9356_s9 + $0x2a0] sm:$0xff]  }
 0x145   : > { %v2090_v57 = vpop.f32.mrf.mxu0  ;;  %8769 = vperm.xlu1 %8382, %v8768_v37   ;;  %v8783_v53 = vpack.i.bf16 %v704_v49, %v703_v39  ;;  %v708_v56 = vunpack.c.h.bf16 %v451_v15 }
 0x146   : > { %v3171_v40 = vpack.c.bf16 %v2942_v8, %v2941_v4  ;;  %v2091_v0 = vadd.f32 %v10002_v38, %v2090_v57  ;;  %v2947_v33 = vmax.f32 %v2099_v13, 0.0  ;;  %v8778_v55 = vpack.i.bf16 %v702_v9, %v701_v50  ;;  %v453_v4 = vld [vmem:[%s9356_s9 + $0x2a8] sm:$0xff]   ;;  %v10035_v13 = vld [vmem:[%s9356_s9 + $0x2b8] sm:$0xff]  }
 0x147   : > { %v7904_v44 = vpop.f32.mrf.mxu0  ;;  %v8788_v8 = vpack.i.bf16 %v706_v59, %v705_v62  ;;  %v709_v57 = vunpack.c.l.bf16 %v453_v4  ;;  %v710_v35 = vunpack.c.h.bf16 %v453_v4  ;;  %v717_v9 = vunpack.c.l.bf16 %v10050_v24 }
 0x148   : > { %v2102_v7 = vadd.f32 %v10002_v38, %v7904_v44  ;;  %8157 = vmatprep.mubr.msk.bf16.mxu1 %vm3296_vm2, %v3171_v40  ;;  %8754 = vperm.xlu0 %8371, %v8753_v61   ;;  %v2945_v10 = vmax.f32 %v2091_v0, 0.0 }
 0x149   : > { %v2093_v25 = vpop.f32.mrf.mxu0  ;;  %8158 = vmatmul.mubr.msk.bf16.gmra.mxu1 %vm3296_vm2, %v3172_v41  ;;  %8779 = vperm.xlu1 %8382, %v8778_v55   ;;  %v455_v41 = vld [vmem:[%s9356_s9 + $0x2b0] sm:$0xff]   ;;  %v8798_v63 = vpack.i.bf16 %v710_v35, %v709_v57  ;;  %v10063_v55 = vld [vmem:[%s9356_s9 + $0x2d8] sm:$0xff]  }
 0x14a   : > { %v2094_v3 = vadd.f32 %v10002_v38, %v2093_v25  ;;  %v2948_v43 = vmax.f32 %v2102_v7, 0.0  ;;  %v711_v0 = vunpack.c.l.bf16 %v455_v41  ;;  %v712_v25 = vunpack.c.h.bf16 %v455_v41 }
 0x14b   : > { %v7907_v31 = vpop.f32.mrf.mxu0  ;;  %8002 = vmatmul.mubr.msk.bf16.gmra.mxu0 %vm1443_vm1, %v441_v34  ;;  %v707_v34 = vunpack.c.l.bf16 %v451_v15  ;;  %v721_v62 = vunpack.c.l.bf16 %v10063_v55 }
 0x14c   : > { %v2946_v5 = vmax.f32 %v2094_v3, 0.0  ;;  %8005 = vmatprep.mubr.msk.bf16.mxu0 %vm1443_vm1, %v443_v60  ;;  %v3174_v6 = vpack.c.bf16 %v2948_v43, %v2947_v33  ;;  %8764 = vperm.xlu0 %8371, %v8763_v42   ;;  %v2115_v19 = vadd.f32 %v10002_v38, %v7907_v31  ;;  %v713_v3 = vunpack.c.l.bf16 %v10035_v13  ;;  %v10042_v33 = vld [vmem:[%s9356_s9 + $0x2c0] sm:$0xff]  }
 0x14d   : > { %v2106_v26 = vpop.f32.mrf.mxu0  ;;  %v8793_v28 = vpack.i.bf16 %v708_v56, %v707_v34  ;;  %8789 = vperm.xlu1 %8382, %v8788_v8   ;;  %v714_v43 = vunpack.c.h.bf16 %v10035_v13  ;;  %v8803_v47 = vpack.i.bf16 %v712_v25, %v711_v0  ;;  %v715_v42 = vunpack.c.l.bf16 %v10042_v33 }
 0x14e   : > { %v3173_v17 = vpack.c.bf16 %v2946_v5, %v2945_v10  ;;  %v2107_v46 = vadd.f32 %v10002_v38, %v2106_v26  ;;  %v2951_v29 = vmax.f32 %v2115_v19, 0.0  ;;  %v716_v50 = vunpack.c.h.bf16 %v10042_v33 }
 0x14f   : > { %v7908_v11 = vpop.f32.mrf.mxu0  ;;  %v8808_v5 = vpack.i.bf16 %v714_v43, %v713_v3 }
 0x150   : > { %v2118_v36 = vadd.f32 %v10002_v38, %v7908_v11  ;;  %8161 = vmatprep.mubr.msk.bf16.mxu1 %vm3296_vm2, %v3173_v17  ;;  %8774 = vperm.xlu0 %8371, %v8773_v18   ;;  %v2949_v20 = vmax.f32 %v2107_v46, 0.0  ;;  %v10054_v11 = vld [vmem:[%s9356_s9 + $0x2d0] sm:$0xff]   ;;  %v718_v46 = vunpack.c.h.bf16 %v10050_v24  ;;  %v8813_v39 = vpack.i.bf16 %v716_v50, %v715_v42 }
 0x151   : > { %v2109_v32 = vpop.f32.mrf.mxu0  ;;  %8162 = vmatmul.mubr.msk.bf16.gmra.mxu1 %vm3296_vm2, %v3174_v6  ;;  %8799 = vperm.xlu1 %8382, %v8798_v63   ;;  %v719_v19 = vunpack.c.l.bf16 %v10054_v11 }
 0x152   : > { %v2110_v58 = vadd.f32 %v10002_v38, %v2109_v32  ;;  %v2952_v51 = vmax.f32 %v2118_v36, 0.0 }
 0x153   : > { %v7911_v52 = vpop.f32.mrf.mxu0  ;;  %8006 = vmatmul.mubr.msk.bf16.gmra.mxu0 %vm1443_vm1, %v445_v45 }
 0x154   : > { %v2950_v27 = vmax.f32 %v2110_v58, 0.0  ;;  %8009 = vmatprep.mubr.msk.bf16.mxu0 %vm1443_vm1, %v447_v23  ;;  %v3176_v60 = vpack.c.bf16 %v2952_v51, %v2951_v29  ;;  %8784 = vperm.xlu0 %8371, %v8783_v53   ;;  %v2131_v44 = vadd.f32 %v10002_v38, %v7911_v52  ;;  %v8818_v58 = vpack.i.bf16 %v718_v46, %v717_v9 }
 0x155   : > { %v2122_v21 = vpop.f32.mrf.mxu0  ;;  %8809 = vperm.xlu1 %8382, %v8808_v5  }
 0x156   : > { %v3175_v54 = vpack.c.bf16 %v2950_v27, %v2949_v20  ;;  %v2123_v40 = vadd.f32 %v10002_v38, %v2122_v21  ;;  %v2955_v22 = vmax.f32 %v2131_v44, 0.0  ;;  %v10069_v20 = vld [vmem:[%s9356_s9 + $0x2e0] sm:$0xff]   ;;  %v10073_v21 = vld [vmem:[%s9356_s9 + $0x2e8] sm:$0xff]  }
 0x157   : > { %v7912_v30 = vpop.f32.mrf.mxu0  ;;  %v724_v56 = vunpack.c.h.bf16 %v10069_v20  ;;  %v726_v57 = vunpack.c.h.bf16 %v10073_v21 }
 0x158   : > { %v2134_v12 = vadd.f32 %v10002_v38, %v7912_v30  ;;  %8165 = vmatprep.mubr.msk.bf16.mxu1 %vm3296_vm2, %v3175_v54  ;;  %8794 = vperm.xlu0 %8371, %v8793_v28   ;;  %v2953_v31 = vmax.f32 %v2123_v40, 0.0  ;;  %v725_v54 = vunpack.c.l.bf16 %v10073_v21  ;;  %v10082_v28 = vpop.permute.xlu0 %8373 }
 0x159   : > { %v2125_v61 = vpop.f32.mrf.mxu0  ;;  %8166 = vmatmul.mubr.msk.bf16.gmra.mxu1 %vm3296_vm2, %v3176_v60  ;;  %8819 = vperm.xlu1 %8382, %v8818_v58  }
 0x15a   : > { %v2126_v7 = vadd.f32 %v10002_v38, %v2125_v61  ;;  %v2956_v2 = vmax.f32 %v2134_v12, 0.0  ;;  %v10087_v12 = vld [vmem:[%s9356_s9 + $0x2f0] sm:$0xff]   ;;  %v10091_v61 = vld [vmem:[%s9356_s9 + $0x2f8] sm:$0xff]   ;;  %v8838_v63 = vpack.i.bf16 %v726_v57, %v725_v54 }
 0x15b   : > { %v7915_v1 = vpop.f32.mrf.mxu0  ;;  %8010 = vmatmul.mubr.msk.bf16.gmra.mxu0 %vm1443_vm1, %v449_v48  ;;  %v720_v48 = vunpack.c.h.bf16 %v10054_v11  ;;  %v727_v0 = vunpack.c.l.bf16 %v10087_v12  ;;  %v730_v3 = vunpack.c.h.bf16 %v10091_v61 }
 0x15c   : > { %v2954_v14 = vmax.f32 %v2126_v7, 0.0  ;;  %8013 = vmatprep.mubr.msk.bf16.mxu0 %vm1443_vm1, %v451_v15  ;;  %v3178_v26 = vpack.c.bf16 %v2956_v2, %v2955_v22  ;;  %8804 = vperm.xlu0 %8371, %v8803_v47   ;;  %v2147_v37 = vadd.f32 %v10002_v38, %v7915_v1  ;;  %v722_v15 = vunpack.c.h.bf16 %v10063_v55 }
 0x15d   : > { %v2138_v10 = vpop.f32.mrf.mxu0  ;;  %v8823_v27 = vpack.i.bf16 %v720_v48, %v719_v19  ;;  %v728_v2 = vunpack.c.h.bf16 %v10087_v12  ;;  %v729_v1 = vunpack.c.l.bf16 %v10091_v61  ;;  %v10122_v19 = vld [vmem:[%s9356_s9 + $0x308] sm:$0xff]  }
 0x15e   : > { %v3177_v45 = vpack.c.bf16 %v2954_v14, %v2953_v31  ;;  %v2139_v16 = vadd.f32 %v10002_v38, %v2138_v10  ;;  %v2959_v49 = vmax.f32 %v2147_v37, 0.0  ;;  %v8828_v34 = vpack.i.bf16 %v722_v15, %v721_v62  ;;  %v10101_v14 = vpop.permute.xlu1 %8384 }
 0x15f   : > { %v7916_v23 = vpop.f32.mrf.mxu0  ;;  %v8843_v10 = vpack.i.bf16 %v728_v2, %v727_v0 }
 0x160   : > { %v2150_v17 = vadd.f32 %v10002_v38, %v7916_v23  ;;  %8169 = vmatprep.mubr.msk.bf16.mxu1 %vm3296_vm2, %v3177_v45  ;;  %v2957_v51 = vmax.f32 %v2139_v16, 0.0  ;;  %8814 = vperm.xlu0 %8371, %v8813_v39   ;;  %v8848_v45 = vpack.i.bf16 %v730_v3, %v729_v1  ;;  %v10110_v16 = vld [vmem:[%s9356_s9 + $0x300] sm:$0xff]   ;;  %v10160_v3 = vld [vmem:[%s9356_s9 + $0x330] sm:$0xff]  }
 0x161   : > { %v2141_v6 = vpop.f32.mrf.mxu0  ;;  %8170 = vmatmul.mubr.msk.bf16.gmra.mxu1 %vm3296_vm2, %v3178_v26  ;;  %8829 = vperm.xlu1 %8382, %v8828_v34  }
 0x162   : > { %v2960_v36 = vmax.f32 %v2150_v17, 0.0  ;;  %v2142_v18 = vadd.f32 %v10002_v38, %v2141_v6  ;;  %v731_v6 = vunpack.c.l.bf16 %v10110_v16  ;;  %v10115_v46 = vpop.permute.xlu1 %8389 }
 0x163   : > { %v7919_v32 = vpop.f32.mrf.mxu0  ;;  %8014 = vmatmul.mubr.msk.bf16.gmra.mxu0 %vm1443_vm1, %v453_v4  ;;  %v723_v4 = vunpack.c.l.bf16 %v10069_v20 }
 0x164   : > { %v2958_v52 = vmax.f32 %v2142_v18, 0.0  ;;  %8017 = vmatprep.mubr.msk.bf16.mxu0 %vm1443_vm1, %v455_v41  ;;  %v3180_v53 = vpack.c.bf16 %v2960_v36, %v2959_v49  ;;  %v2163_v35 = vadd.f32 %v10002_v38, %v7919_v32  ;;  %8824 = vperm.xlu0 %8371, %v8823_v27   ;;  %v732_v32 = vunpack.c.h.bf16 %v10110_v16 }
 0x165   : > { %v2154_v59 = vpop.f32.mrf.mxu0  ;;  %v8833_v41 = vpack.i.bf16 %v724_v56, %v723_v4  ;;  %8839 = vperm.xlu1 %8382, %v8838_v63   ;;  %v733_v49 = vunpack.c.l.bf16 %v10122_v19 }
 0x166   : > { %v3179_v29 = vpack.c.bf16 %v2958_v52, %v2957_v51  ;;  %v2155_v60 = vadd.f32 %v10002_v38, %v2154_v59  ;;  %v2963_v47 = vmax.f32 %v2163_v35, 0.0  ;;  %v10129_v52 = vld [vmem:[%s9356_s9 + $0x310] sm:$0xff]   ;;  %v8853_v62 = vpack.i.bf16 %v732_v32, %v731_v6  ;;  %v10149_v35 = vld [vmem:[%s9356_s9 + $0x328] sm:$0xff]  }
 0x167   : > { %v7920_v8 = vpop.f32.mrf.mxu0  ;;  %v734_v59 = vunpack.c.h.bf16 %v10122_v19  ;;  %v735_v4 = vunpack.c.l.bf16 %v10129_v52  ;;  %v736_v56 = vunpack.c.h.bf16 %v10129_v52  ;;  %v742_v2 = vunpack.c.h.bf16 %v10149_v35 }
 0x168   : > { %v2166_v30 = vadd.f32 %v10002_v38, %v7920_v8  ;;  %8173 = vmatprep.mubr.msk.bf16.mxu1 %vm3296_vm2, %v3179_v29  ;;  %v2961_v43 = vmax.f32 %v2155_v60, 0.0  ;;  %8834 = vperm.xlu0 %8371, %v8833_v41   ;;  %v10136_v29 = vpop.permute.xlu1 %8399  ;;  %v10140_v8 = vld [vmem:[%s9356_s9 + $0x320] sm:$0xff]  }
 0x169   : > { %v2157_v40 = vpop.f32.mrf.mxu0  ;;  %8174 = vmatmul.mubr.msk.bf16.gmra.mxu1 %vm3296_vm2, %v3180_v53  ;;  %8849 = vperm.xlu1 %8382, %v8848_v45   ;;  %v10134_v53 = vld [vmem:[%s9356_s9 + $0x318] sm:$0xff]   ;;  %v8858_v34 = vpack.i.bf16 %v734_v59, %v733_v49  ;;  %v739_v41 = vunpack.c.l.bf16 %v10140_v8  ;;  %v8863_v0 = vpack.i.bf16 %v736_v56, %v735_v4  ;;  %v10343_v4 = vld [vmem:[%s9356_s9 + $0x3e0] sm:$0xff]  }
 0x16a   : > { %v2158_v44 = vadd.f32 %v10002_v38, %v2157_v40  ;;  %v2964_v7 = vmax.f32 %v2166_v30, 0.0  ;;  %v737_v54 = vunpack.c.l.bf16 %v10134_v53  ;;  %v738_v57 = vunpack.c.h.bf16 %v10134_v53  ;;  %12192 = vst [vmem:[#allocation6_spill] sm:$0xff] %v10343_v4 }
 0x16b   : > { %v7923_v25 = vpop.f32.mrf.mxu0  ;;  %8018 = vmatmul.mubr.msk.bf16.gmra.mxu0 %vm1443_vm1, %v10035_v13  ;;  %v10103_v13 = vpop.permute.xlu0 %8378 }
 0x16c   : > { %v2962_v31 = vmax.f32 %v2158_v44, 0.0  ;;  %8021 = vmatprep.mubr.msk.bf16.mxu0 %vm1443_vm1, %v10042_v33  ;;  %v3182_v26 = vpack.c.bf16 %v2964_v7, %v2963_v47  ;;  %v2179_v42 = vadd.f32 %v10002_v38, %v7923_v25  ;;  %8844 = vperm.xlu0 %8371, %v8843_v10   ;;  %v740_v44 = vunpack.c.h.bf16 %v10140_v8 }
 0x16d   : > { %v2170_v22 = vpop.f32.mrf.mxu0  ;;  %8859 = vperm.xlu1 %8382, %v8858_v34   ;;  %v8868_v7 = vpack.i.bf16 %v738_v57, %v737_v54  ;;  %v741_v25 = vunpack.c.l.bf16 %v10149_v35  ;;  %v744_v10 = vunpack.c.h.bf16 %v10160_v3  ;;  %v10198_v57 = vld [vmem:[%s9356_s9 + $0x350] sm:$0xff]  }
 0x16e   : > { %v3181_v5 = vpack.c.bf16 %v2962_v31, %v2961_v43  ;;  %v2171_v37 = vadd.f32 %v10002_v38, %v2170_v22  ;;  %v2967_v39 = vmax.f32 %v2179_v42, 0.0  ;;  %v8873_v47 = vpack.i.bf16 %v740_v44, %v739_v41 }
 0x16f   : > { %v7924_v23 = vpop.f32.mrf.mxu0  ;;  %v10117_v36 = vpop.permute.xlu0 %8394  ;;  %v743_v22 = vunpack.c.l.bf16 %v10160_v3 }
 0x170   : > { %v2182_v33 = vadd.f32 %v10002_v38, %v7924_v23  ;;  %8177 = vmatprep.mubr.msk.bf16.mxu1 %vm3296_vm2, %v3181_v5  ;;  %v2965_v58 = vmax.f32 %v2171_v37, 0.0  ;;  %8854 = vperm.xlu0 %8371, %v8853_v62   ;;  %v10171_v23 = vpop.permute.xlu1 %8409 }
 0x171   : > { %v2173_v17 = vpop.f32.mrf.mxu0  ;;  %8178 = vmatmul.mubr.msk.bf16.gmra.mxu1 %vm3296_vm2, %v3182_v26  ;;  %v10169_v26 = vld [vmem:[%s9356_s9 + $0x338] sm:$0xff]   ;;  %8869 = vperm.xlu1 %8382, %v8868_v7   ;;  %v8883_v49 = vpack.i.bf16 %v744_v10, %v743_v22 }
 0x172   : > { %v2968_v50 = vmax.f32 %v2182_v33, 0.0  ;;  %v2174_v9 = vadd.f32 %v10002_v38, %v2173_v17  ;;  %v8878_v17 = vpack.i.bf16 %v742_v2, %v741_v25  ;;  %v745_v59 = vunpack.c.l.bf16 %v10169_v26 }
 0x173   : > { %v7927_v18 = vpop.f32.mrf.mxu0  ;;  %8022 = vmatmul.mubr.msk.bf16.gmra.mxu0 %vm1443_vm1, %v10050_v24  ;;  %v10151_v40 = vpop.permute.xlu0 %8404 }
 0x174   : > { %v2966_v48 = vmax.f32 %v2174_v9, 0.0  ;;  %8025 = vmatprep.mubr.msk.bf16.mxu0 %vm1443_vm1, %v10054_v11  ;;  %v3184_v24 = vpack.c.bf16 %v2968_v50, %v2967_v39  ;;  %v2195_v15 = vadd.f32 %v10002_v38, %v7927_v18  ;;  %8864 = vperm.xlu0 %8371, %v8863_v0   ;;  %v10208_v0 = vld [vmem:[%s9356_s9 + $0x358] sm:$0xff]  }
 0x175   : > { %v2186_v51 = vpop.f32.mrf.mxu0  ;;  %8879 = vperm.xlu1 %8382, %v8878_v17  }
 0x176   : > { %v3183_v27 = vpack.c.bf16 %v2966_v48, %v2965_v58  ;;  %v2187_v60 = vadd.f32 %v10002_v38, %v2186_v51  ;;  %v2971_v42 = vmax.f32 %v2195_v15, 0.0  ;;  %v10181_v58 = vld [vmem:[%s9356_s9 + $0x340] sm:$0xff]   ;;  %v10184_v48 = vld [vmem:[%s9356_s9 + $0x348] sm:$0xff]  }
 0x177   : > { %v7928_v11 = vpop.f32.mrf.mxu0  ;;  %v747_v7 = vunpack.c.l.bf16 %v10181_v58  ;;  %v749_v22 = vunpack.c.l.bf16 %v10184_v48  ;;  %v750_v10 = vunpack.c.h.bf16 %v10184_v48 }
 0x178   : > { %v2198_v30 = vadd.f32 %v10002_v38, %v7928_v11  ;;  %8181 = vmatprep.mubr.msk.bf16.mxu1 %vm3296_vm2, %v3183_v27  ;;  %v2969_v5 = vmax.f32 %v2187_v60, 0.0  ;;  %8874 = vperm.xlu0 %8371, %v8873_v47   ;;  %v10200_v60 = vpop.permute.xlu1 %8419  ;;  %v748_v47 = vunpack.c.h.bf16 %v10181_v58 }
 0x179   : > { %v2189_v63 = vpop.f32.mrf.mxu0  ;;  %8182 = vmatmul.mubr.msk.bf16.gmra.mxu1 %vm3296_vm2, %v3184_v24  ;;  %v746_v24 = vunpack.c.h.bf16 %v10169_v26 }
 0x17a   : > { %v2190_v1 = vadd.f32 %v10002_v38, %v2189_v63  ;;  %v2972_v43 = vmax.f32 %v2198_v30, 0.0  ;;  %v8893_v17 = vpack.i.bf16 %v748_v47, %v747_v7 }
 0x17b   : > { %v7931_v31 = vpop.f32.mrf.mxu0  ;;  %8026 = vmatmul.mubr.msk.bf16.gmra.mxu0 %vm1443_vm1, %v10063_v55  ;;  %v10375_v55 = vld [vmem:[%s12160_s4] ss:$0 sm:$0xff] }
 0x17c   : > { %v2970_v45 = vmax.f32 %v2190_v1, 0.0  ;;  %8029 = vmatprep.mubr.msk.bf16.mxu0 %vm1443_vm1, %v10069_v20  ;;  %v10177_v20 = vpop.permute.xlu0 %8414  ;;  %v3186_v18 = vpack.c.bf16 %v2972_v43, %v2971_v42  ;;  %v2211_v32 = vadd.f32 %v10002_v38, %v7931_v31  ;;  %8884 = vperm.xlu0 %8371, %v8883_v49   ;;  %v10224_v49 = vpop.permute.xlu1 %8429 }
 0x17d   : > { %v2202_v37 = vpop.f32.mrf.mxu0 }
 0x17e   : > { %v3185_v6 = vpack.c.bf16 %v2970_v45, %v2969_v5  ;;  %v2203_v51 = vadd.f32 %v10002_v38, %v2202_v37  ;;  %v2975_v25 = vmax.f32 %v2211_v32, 0.0 }
 0x17f   : > { %v7932_v39 = vpop.f32.mrf.mxu0 }
 0x180   : > { %v2214_v62 = vadd.f32 %v10002_v38, %v7932_v39  ;;  %8185 = vmatprep.mubr.msk.bf16.mxu1 %vm3296_vm2, %v3185_v6  ;;  %v2973_v2 = vmax.f32 %v2203_v51, 0.0  ;;  %v10213_v43 = vpop.permute.xlu0 %8424  ;;  %v751_v6 = vunpack.c.l.bf16 %v10198_v57  ;;  %v10227_v51 = vld [vmem:[%s9356_s9 + $0x360] sm:$0xff]   ;;  %8894 = vperm.xlu0 %8371, %v8893_v17  }
 0x181   : > { %v2205_v27 = vpop.f32.mrf.mxu0  ;;  %8186 = vmatmul.mubr.msk.bf16.gmra.mxu1 %vm3296_vm2, %v3186_v18  ;;  %v752_v18 = vunpack.c.h.bf16 %v10198_v57  ;;  %v755_v7 = vunpack.c.l.bf16 %v10227_v51 }
 0x182   : > { %v2976_v56 = vmax.f32 %v2214_v62, 0.0  ;;  %v2206_v54 = vadd.f32 %v10002_v38, %v2205_v27  ;;  %v753_v62 = vunpack.c.l.bf16 %v10208_v0 }
 0x183   : > { %v7935_v30 = vpop.f32.mrf.mxu0  ;;  %8030 = vmatmul.mubr.msk.bf16.gmra.mxu0 %vm1443_vm1, %v10073_v21  ;;  %v8888_v21 = vpack.i.bf16 %v746_v24, %v745_v59  ;;  %v754_v59 = vunpack.c.h.bf16 %v10208_v0 }
 0x184   : > { %v2974_v1 = vmax.f32 %v2206_v54, 0.0  ;;  %8033 = vmatprep.mubr.msk.bf16.mxu0 %vm1443_vm1, %v10087_v12  ;;  %v3188_v5 = vpack.c.bf16 %v2976_v56, %v2975_v25  ;;  %v8898_v12 = vpack.i.bf16 %v750_v10, %v749_v22  ;;  %v2227_v24 = vadd.f32 %v10002_v38, %v7935_v30  ;;  %v10234_v56 = vld [vmem:[%s9356_s9 + $0x368] sm:$0xff]  }
 0x185   : > { %v2218_v31 = vpop.f32.mrf.mxu0  ;;  %8889 = vperm.xlu1 %8382, %v8888_v21   ;;  %v8903_v54 = vpack.i.bf16 %v752_v18, %v751_v6  ;;  %v756_v25 = vunpack.c.h.bf16 %v10227_v51  ;;  %v8908_v21 = vpack.i.bf16 %v754_v59, %v753_v62  ;;  %v757_v30 = vunpack.c.l.bf16 %v10234_v56 }
 0x186   : > { %v3187_v45 = vpack.c.bf16 %v2974_v1, %v2973_v2  ;;  %v2219_v32 = vadd.f32 %v10002_v38, %v2218_v31  ;;  %v10239_v1 = vpop.permute.xlu0 %8434  ;;  %v758_v31 = vunpack.c.h.bf16 %v10234_v56  ;;  %v2979_v6 = vmax.f32 %v2227_v24, 0.0 }
 0x187   : > { %v7936_v37 = vpop.f32.mrf.mxu0  ;;  %8904 = vperm.xlu0 %8371, %v8903_v54   ;;  %v8913_v62 = vpack.i.bf16 %v756_v25, %v755_v7 }
 0x188   : > { %v2230_v39 = vadd.f32 %v10002_v38, %v7936_v37  ;;  %8189 = vmatprep.mubr.msk.bf16.mxu1 %vm3296_vm2, %v3187_v45  ;;  %v2977_v37 = vmax.f32 %v2219_v32, 0.0  ;;  %v8918_v24 = vpack.i.bf16 %v758_v31, %v757_v30  ;;  %v10271_v32 = vld [vmem:[%s9356_s9 + $0x380] sm:$0xff]  }
 0x189   : > { %v2221_v27 = vpop.f32.mrf.mxu0  ;;  %8190 = vmatmul.mubr.msk.bf16.gmra.mxu1 %vm3296_vm2, %v3188_v5  ;;  %8899 = vperm.xlu1 %8382, %v8898_v12   ;;  %v10251_v12 = vld [vmem:[%s9356_s9 + $0x370] sm:$0xff]  }
 0x18a   : > { %v2222_v2 = vadd.f32 %v10002_v38, %v2221_v27  ;;  %v2980_v47 = vmax.f32 %v2230_v39, 0.0  ;;  %v759_v54 = vunpack.c.l.bf16 %v10251_v12  ;;  %v760_v30 = vunpack.c.h.bf16 %v10251_v12 }
 0x18b   : > { %v7939_v22 = vpop.f32.mrf.mxu0  ;;  %8034 = vmatmul.mubr.msk.bf16.gmra.mxu0 %vm1443_vm1, %v10091_v61  ;;  %8914 = vperm.xlu0 %8371, %v8913_v62   ;;  %v763_v62 = vunpack.c.l.bf16 %v10271_v32 }
 0x18c   : > { %v2978_v17 = vmax.f32 %v2222_v2, 0.0  ;;  %8037 = vmatprep.mubr.msk.bf16.mxu0 %vm1443_vm1, %v10110_v16  ;;  %v10257_v2 = vpop.permute.xlu1 %8439  ;;  %v10260_v16 = vld [vmem:[%s9356_s9 + $0x378] sm:$0xff]   ;;  %v3190_v5 = vpack.c.bf16 %v2980_v47, %v2979_v6  ;;  %v2243_v7 = vadd.f32 %v10002_v38, %v7939_v22  ;;  %v8923_v61 = vpack.i.bf16 %v760_v30, %v759_v54 }
 0x18d   : > { %v2234_v18 = vpop.f32.mrf.mxu0  ;;  %8909 = vperm.xlu1 %8382, %v8908_v21   ;;  %v10274_v21 = vld [vmem:[%s9356_s9 + $0x388] sm:$0xff]   ;;  %v761_v22 = vunpack.c.l.bf16 %v10260_v16 }
 0x18e   : > { %v3189_v59 = vpack.c.bf16 %v2978_v17, %v2977_v37  ;;  %v2235_v25 = vadd.f32 %v10002_v38, %v2234_v18  ;;  %v10268_v17 = vpop.permute.xlu0 %8444  ;;  %v2983_v47 = vmax.f32 %v2243_v7, 0.0  ;;  %v766_v7 = vunpack.c.h.bf16 %v10274_v21 }
 0x18f   : > { %v7940_v45 = vpop.f32.mrf.mxu0  ;;  %8924 = vperm.xlu0 %8371, %v8923_v61  }
 0x190   : > { %v2246_v37 = vadd.f32 %v10002_v38, %v7940_v45  ;;  %8193 = vmatprep.mubr.msk.bf16.mxu1 %vm3296_vm2, %v3189_v59  ;;  %v762_v45 = vunpack.c.h.bf16 %v10260_v16  ;;  %v2981_v27 = vmax.f32 %v2235_v25, 0.0  ;;  %v10293_v59 = vld [vmem:[%s9356_s9 + $0x390] sm:$0xff]  }
 0x191   : > { %v2237_v31 = vpop.f32.mrf.mxu0  ;;  %8194 = vmatmul.mubr.msk.bf16.gmra.mxu1 %vm3296_vm2, %v3190_v5  ;;  %8919 = vperm.xlu1 %8382, %v8918_v24   ;;  %v765_v5 = vunpack.c.l.bf16 %v10274_v21  ;;  %v767_v54 = vunpack.c.l.bf16 %v10293_v59 }
 0x192   : > { %v2984_v6 = vmax.f32 %v2246_v37, 0.0  ;;  %v2238_v18 = vadd.f32 %v10002_v38, %v2237_v31  ;;  %v10290_v31 = vpop.permute.xlu1 %8449  ;;  %v8928_v10 = vpack.i.bf16 %v762_v45, %v761_v22  ;;  %v10299_v44 = vpop.permute.xlu0 %8454  ;;  %v10306_v22 = vld [vmem:[%s9356_s9 + $0x3a0] sm:$0xff]  }
 0x193   : > { %v7943_v39 = vpop.f32.mrf.mxu0  ;;  %8038 = vmatmul.mubr.msk.bf16.gmra.mxu0 %vm1443_vm1, %v10122_v19  ;;  %v764_v19 = vunpack.c.h.bf16 %v10271_v32  ;;  %12188 = vst [vmem:[#allocation2_spill] sm:$0xff] %v10299_v44  ;;  %v8938_v42 = vpack.i.bf16 %v766_v7, %v765_v5  ;;  %v10325_v7 = vld [vmem:[%s9356_s9 + $0x3a8] sm:$0xff]  }
 0x194   : > { %v2982_v37 = vmax.f32 %v2238_v18, 0.0  ;;  %8041 = vmatprep.mubr.msk.bf16.mxu0 %vm1443_vm1, %v10129_v52  ;;  %v3192_v41 = vpack.c.bf16 %v2984_v6, %v2983_v47  ;;  %v10302_v52 = vld [vmem:[%s9356_s9 + $0x398] sm:$0xff]   ;;  %v768_v47 = vunpack.c.h.bf16 %v10293_v59  ;;  %v771_v18 = vunpack.c.l.bf16 %v10306_v22 }
 0x195   : > { %v2250_v24 = vpop.f32.mrf.mxu0  ;;  %8929 = vperm.xlu1 %8382, %v8928_v10   ;;  %v8933_v45 = vpack.i.bf16 %v764_v19, %v763_v62  ;;  %v2259_v63 = vadd.f32 %v10002_v38, %v7943_v39  ;;  %v10319_v62 = vld [vmem:[%s9356_s9 + $0x3c0] sm:$0xff]  }
 0x196   : > { %v3191_v25 = vpack.c.bf16 %v2982_v37, %v2981_v27  ;;  %v769_v27 = vunpack.c.l.bf16 %v10302_v52  ;;  %v2251_v6 = vadd.f32 %v10002_v38, %v2250_v24  ;;  %12189 = vst [vmem:[#allocation3_spill] sm:$0xff] %v10319_v62  ;;  %v10322_v24 = vpop.permute.xlu1 %8459  ;;  %v779_v61 = vunpack.c.l.bf16 %v10319_v62 }
 0x197   : > { %v7944_v30 = vpop.f32.mrf.mxu0  ;;  %12190 = vst [vmem:[#allocation4_spill] sm:$0xff] %v10322_v24  ;;  %8934 = vperm.xlu0 %8371, %v8933_v45   ;;  %v780_v5 = vunpack.c.h.bf16 %v10319_v62  ;;  %v12198_v62 = vunpack.i.l.bf16 %v10082_v28 }
 0x198   : > { %v2262_v37 = vadd.f32 %v10002_v38, %v7944_v30  ;;  %8197 = vmatprep.mubr.msk.bf16.mxu1 %vm3296_vm2, %v3191_v25  ;;  %v8943_v25 = vpack.i.bf16 %v768_v47, %v767_v54  ;;  %v772_v30 = vunpack.c.h.bf16 %v10306_v22  ;;  %v2985_v34 = vmax.f32 %v2251_v6, 0.0 }
 0x199   : > { %v2253_v10 = vpop.f32.mrf.mxu0  ;;  %8198 = vmatmul.mubr.msk.bf16.gmra.mxu1 %vm3296_vm2, %v3192_v41  ;;  %8939 = vperm.xlu1 %8382, %v8938_v42   ;;  %v8948_v41 = vpack.i.bf16 %v771_v18, %v769_v27  ;;  %v787_v47 = vunpack.c.l.bf16 %v10343_v4  ;;  %v774_v18 = vunpack.c.h.bf16 %v10325_v7 }
 0x19a   : > { %v2254_v19 = vadd.f32 %v10002_v38, %v2253_v10  ;;  %v2988_v39 = vmax.f32 %v2262_v37, 0.0  ;;  %v773_v10 = vunpack.c.l.bf16 %v10325_v7  ;;  %v10337_v37 = vpop.permute.xlu0 %8464 }
 0x19b   : > { %v7947_v11 = vpop.f32.mrf.mxu0  ;;  %8042 = vmatmul.mubr.msk.bf16.gmra.mxu0 %vm1443_vm1, %v10134_v53  ;;  %12191 = vst [vmem:[#allocation5_spill] sm:$0xff] %v10337_v37  ;;  %v2987_v53 = vmax.f32 %v2259_v63, 0.0  ;;  %8944 = vperm.xlu0 %8371, %v8943_v25   ;;  %v788_v63 = vunpack.c.h.bf16 %v10343_v4 }
 0x19c   : > { %v2986_v45 = vmax.f32 %v2254_v19, 0.0  ;;  %8045 = vmatprep.mubr.msk.bf16.mxu0 %vm1443_vm1, %v10140_v8  ;;  %v10346_v19 = vld [vmem:[%s9356_s9 + $0x3c8] sm:$0xff]   ;;  %v8953_v8 = vpack.i.bf16 %v779_v61, %v772_v30  ;;  %v8958_v42 = vpack.i.bf16 %v773_v10, %v780_v5  ;;  %v10357_v30 = vpop.permute.xlu1 %8469 }
 0x19d   : > { %v2266_v15 = vpop.f32.mrf.mxu0  ;;  %12193 = vst [vmem:[#allocation7_spill] sm:$0xff] %v10346_v19  ;;  %v3194_v54 = vpack.c.bf16 %v2988_v39, %v2987_v53  ;;  %8949 = vperm.xlu1 %8382, %v8948_v41   ;;  %v781_v27 = vunpack.c.l.bf16 %v10346_v19  ;;  %12194 = vst [vmem:[#allocation8_spill] sm:$0xff] %v10357_v30  ;;  %v10360_v39 = vld [vmem:[%s9356_s9 + $0x3b0] sm:$0xff]   ;;  %v10363_v41 = vld [vmem:[%s9356_s9 + $0x3b8] sm:$0xff]   ;;  %v8963_v9 = vpack.i.bf16 %v788_v63, %v787_v47 }
 0x19e   : > { %v3193_v6 = vpack.c.bf16 %v2986_v45, %v2985_v34  ;;  %v2275_v34 = vadd.f32 %v10002_v38, %v7947_v11  ;;  %v2267_v45 = vadd.f32 %v10002_v38, %v2266_v15  ;;  %12195 = vst [vmem:[#allocation9_spill] sm:$0xff] %v10363_v41  ;;  %v10370_v61 = vpop.permute.xlu0 %8474  ;;  %v10408_v30 = vld [vmem:[%s9356_s9 + $0x3d0] sm:$0xff]  }
 0x19f   : > { %v7948_v50 = vpop.f32.mrf.mxu0  ;;  %8954 = vperm.xlu0 %8371, %v8953_v8   ;;  %v10384_v8 = vld [vmem:[%s9356_s9 + $0x3e8] sm:$0xff]   ;;  %12197 = vst [vmem:[#allocation11_spill] sm:$0xff] %v10408_v30 }
 0x1a0   : > { %v2278_v25 = vadd.f32 %v10002_v38, %v7948_v50  ;;  %8201 = vmatprep.mubr.msk.bf16.mxu1 %vm3296_vm2, %v3193_v6  ;;  %12196 = vst [vmem:[#allocation10_spill] sm:$0xff] %v10384_v8  ;;  %v782_v50 = vunpack.c.h.bf16 %v10346_v19 }
 0x1a1   : > { %v2269_v5 = vpop.f32.mrf.mxu0  ;;  %v8107_v10 = vpop.f32.mrf.mxu1  ;;  %8202 = vmatmul.mubr.msk.bf16.gmra.mxu1 %vm3296_vm2, %v3194_v54  ;;  %8959 = vperm.xlu1 %8382, %v8958_v42   ;;  %v789_v42 = vunpack.c.l.bf16 %v10384_v8 }
 0x1a2   : > { %v2992_v53 = vmax.f32 %v2278_v25, 0.0  ;;  %v2270_v6 = vadd.f32 %v10002_v38, %v2269_v5  ;;  %v8968_v25 = vpack.i.bf16 %v774_v18, %v781_v27  ;;  %v2991_v38 = vmax.f32 %v2275_v34, 0.0 }
 0x1a3   : > { %v7951_v54 = vpop.f32.mrf.mxu0  ;;  %8046 = vmatmul.mubr.msk.bf16.gmra.mxu0 %vm1443_vm1, %v10149_v35  ;;  %v3715_v15 = vpop.f32.mrf.mxu1  ;;  %v2989_v5 = vmax.f32 %v2267_v45, 0.0  ;;  %v3724_v34 = vadd.f32 %v8107_v10, %v10375_v55  ;;  %8964 = vperm.xlu0 %8371, %v8963_v9   ;;  %v775_v10 = vunpack.c.l.bf16 %v10360_v39 }
 0x1a4   : > { %v2990_v11 = vmax.f32 %v2270_v6, 0.0  ;;  %8049 = vmatprep.mubr.msk.bf16.mxu0 %vm1443_vm1, %v10160_v3  ;;  %v3716_v63 = vadd.f32 %v10375_v55, %v3715_v15  ;;  %v3196_v18 = vpack.c.bf16 %v2992_v53, %v2991_v38  ;;  %v10392_v45 = vpop.permute.xlu1 %8479  ;;  %v10397_v15 = vld [vmem:[%s12158_s2] ss:$0 sm:$0xff]  ;;  %v10405_v3 = vpop.permute.xlu0 %8484 }
 0x1a5   : > { %v2282_v33 = vpop.f32.mrf.mxu0  ;;  %v8108_v4 = vpop.f32.mrf.mxu1  ;;  %8969 = vperm.xlu1 %8382, %v8968_v25  }
 0x1a6   : > { %v3195_v27 = vpack.c.bf16 %v2990_v11, %v2989_v5  ;;  %v2283_v6 = vadd.f32 %v10397_v15, %v2282_v33  ;;  %v3727_v47 = vadd.f32 %v8108_v4, %v10375_v55  ;;  %v8973_v11 = vpack.i.bf16 %v782_v50, %v789_v42 }
 0x1a7   : > { %v7952_v35 = vpop.f32.mrf.mxu0  ;;  %v3718_v53 = vpop.f32.mrf.mxu1  ;;  %v4738_v38 = vmax.f32 %v3716_v63, 0.0  ;;  %v790_v33 = vunpack.c.h.bf16 %v10384_v8  ;;  %v2291_v4 = vadd.f32 %v10397_v15, %v7951_v54  ;;  %v776_v63 = vunpack.c.h.bf16 %v10360_v39 }
 0x1a8   : > { %v2294_v5 = vadd.f32 %v10397_v15, %v7952_v35  ;;  %v3719_v9 = vadd.f32 %v10375_v55, %v3718_v53  ;;  %8205 = vmatprep.mubr.msk.bf16.mxu1 %vm3296_vm2, %v3195_v27  ;;  %v783_v35 = vunpack.c.l.bf16 %v10408_v30  ;;  %v4740_v42 = vmax.f32 %v3724_v34, 0.0  ;;  %8974 = vperm.xlu0 %8371, %v8973_v11  }
 0x1a9   : > { %v2285_v37 = vpop.f32.mrf.mxu0  ;;  %v8111_v25 = vpop.f32.mrf.mxu1  ;;  %8206 = vmatmul.mubr.msk.bf16.gmra.mxu1 %vm3296_vm2, %v3196_v18  ;;  %v4741_v8 = vmax.f32 %v3727_v47, 0.0  ;;  %v8978_v44 = vpack.i.bf16 %v790_v33, %v775_v10  ;;  %v6274_v41 = vmul.f32 %v12198_v62, %v4738_v38  ;;  %v2993_v30 = vmax.f32 %v2283_v6, 0.0 }
 0x1aa   : > { %v4739_v27 = vmax.f32 %v3719_v9, 0.0  ;;  %v2286_v53 = vadd.f32 %v10397_v15, %v2285_v37  ;;  %v2996_v24 = vmax.f32 %v2294_v5, 0.0  ;;  %v8983_v50 = vpack.i.bf16 %v776_v63, %v783_v35  ;;  %v10426_v47 = vpop.permute.xlu1 %8489 }
 0x1ab   : > { %v7955_v54 = vpop.f32.mrf.mxu0  ;;  %8050 = vmatmul.mubr.msk.bf16.gmra.mxu0 %vm1443_vm1, %v10169_v26  ;;  %v3731_v18 = vpop.f32.mrf.mxu1  ;;  %v12199_v34 = vunpack.i.h.bf16 %v10082_v28  ;;  %v2995_v11 = vmax.f32 %v2291_v4, 0.0  ;;  %v3740_v5 = vadd.f32 %v8111_v25, %v10375_v55  ;;  %8979 = vperm.xlu1 %8382, %v8978_v44   ;;  %v12200_v62 = vunpack.i.l.bf16 %v10103_v13 }
 0x1ac   : > { %v2994_v37 = vmax.f32 %v2286_v53, 0.0  ;;  %8053 = vmatprep.mubr.msk.bf16.mxu0 %vm1443_vm1, %v10181_v58  ;;  %v3732_v26 = vadd.f32 %v10375_v55, %v3731_v18  ;;  %v8481_v35 = vunpack.i.l.bf16 %v10392_v45  ;;  %v10434_v58 = vpop.permute.xlu0 %8494  ;;  %8984 = vperm.xlu0 %8371, %v8983_v50   ;;  %v12201_v4 = vunpack.i.h.bf16 %v10103_v13 }
 0x1ad   : > { %v6275_v9 = vmul.f32 %v12199_v34, %v4739_v27  ;;  %v2298_v10 = vpop.f32.mrf.mxu0  ;;  %v8112_v33 = vpop.f32.mrf.mxu1  ;;  %v6276_v28 = vmul.f32 %v12200_v62, %v4740_v42  ;;  %v3198_v27 = vpack.c.bf16 %v2996_v24, %v2995_v11  ;;  %v4744_v42 = vmax.f32 %v3740_v5, 0.0 }
 0x1ae   : > { %v3197_v38 = vpack.c.bf16 %v2994_v37, %v2993_v30  ;;  %v6277_v25 = vmul.f32 %v12201_v4, %v4741_v8  ;;  %v4742_v53 = vmax.f32 %v3732_v26, 0.0  ;;  %v3743_v18 = vadd.f32 %v8112_v33, %v10375_v55 }
 0x1af   : > { %v6530_v6 = vmax.f32 %v6274_v41, %v6275_v9  ;;  %v7956_v34 = vpop.f32.mrf.mxu0  ;;  %v3734_v63 = vpop.f32.mrf.mxu1  ;;  %v2299_v19 = vadd.f32 %v10397_v15, %v2298_v10  ;;  %v2307_v50 = vadd.f32 %v10397_v15, %v7955_v54  ;;  %v8487_v24 = vunpack.i.h.bf16 %v10405_v3 }
 0x1b0   : > { %v2310_v41 = vadd.f32 %v10397_v15, %v7956_v34  ;;  %v3735_v30 = vadd.f32 %v10375_v55, %v3734_v63  ;;  %8209 = vmatprep.mubr.msk.bf16.mxu1 %vm3296_vm2, %v3197_v38  ;;  %v8486_v9 = vunpack.i.l.bf16 %v10405_v3  ;;  %v12202_v37 = vunpack.i.l.bf16 %v10101_v14 }
 0x1b1   : > { %v6531_v44 = vmax.f32 %v6530_v6, %v6276_v28  ;;  %v2301_v13 = vpop.f32.mrf.mxu0  ;;  %v8115_v8 = vpop.f32.mrf.mxu1  ;;  %8210 = vmatmul.mubr.msk.bf16.gmra.mxu1 %vm3296_vm2, %v3198_v27  ;;  %v4745_v63 = vmax.f32 %v3743_v18, 0.0  ;;  %v2997_v4 = vmax.f32 %v2299_v19, 0.0  ;;  %v12203_v27 = vunpack.i.h.bf16 %v10101_v14 }
 0x1b2   : > { %v6278_v11 = vmul.f32 %v12202_v37, %v4742_v53  ;;  %v4743_v10 = vmax.f32 %v3735_v30, 0.0  ;;  %v2302_v33 = vadd.f32 %v10397_v15, %v2301_v13  ;;  %v3000_v62 = vmax.f32 %v2310_v41, 0.0 }
 0x1b3   : > { %v6532_v26 = vmax.f32 %v6531_v44, %v6277_v25  ;;  %v7959_v5 = vpop.f32.mrf.mxu0  ;;  %8054 = vmatmul.mubr.msk.bf16.gmra.mxu0 %vm1443_vm1, %v10184_v48  ;;  %v3747_v54 = vpop.f32.mrf.mxu1  ;;  %v2999_v18 = vmax.f32 %v2307_v50, 0.0  ;;  %v12204_v13 = vunpack.i.l.bf16 %v10115_v46  ;;  %v12252_v3 = vunpack.i.h.bf16 %v10426_v47 }
 0x1b4   : > { %v6279_v53 = vmul.f32 %v12203_v27, %v4743_v10  ;;  %v2998_v25 = vmax.f32 %v2302_v33, 0.0  ;;  %8057 = vmatprep.mubr.msk.bf16.mxu0 %vm1443_vm1, %v10198_v57  ;;  %v3748_v34 = vadd.f32 %v10375_v55, %v3747_v54  ;;  %v12205_v57 = vunpack.i.h.bf16 %v10115_v46 }
 0x1b5   : > { %v6533_v38 = vmax.f32 %v6532_v26, %v6278_v11  ;;  %v2314_v44 = vpop.f32.mrf.mxu0  ;;  %v8116_v41 = vpop.f32.mrf.mxu1  ;;  %v6280_v37 = vmul.f32 %v12204_v13, %v4744_v42  ;;  %v3756_v11 = vadd.f32 %v8115_v8, %v10375_v55  ;;  %v3200_v10 = vpack.c.bf16 %v3000_v62, %v2999_v18  ;;  %v10475_v8 = vld [vmem:[%s9356_s9 + $0x3d8] sm:$0xff]  }
 0x1b6   : > { %v3199_v14 = vpack.c.bf16 %v2998_v25, %v2997_v4  ;;  %v10464_v26 = vpop.permute.xlu1 %8499  ;;  %v6281_v50 = vmul.f32 %v12205_v57, %v4745_v63  ;;  %v2323_v42 = vadd.f32 %v10397_v15, %v7959_v5  ;;  %v4746_v46 = vmax.f32 %v3748_v34, 0.0 }
 0x1b7   : > { %v6534_v19 = vmax.f32 %v6533_v38, %v6279_v53  ;;  %v7960_v33 = vpop.f32.mrf.mxu0  ;;  %v3750_v54 = vpop.f32.mrf.mxu1  ;;  %v2315_v38 = vadd.f32 %v10397_v15, %v2314_v44  ;;  %v3759_v63 = vadd.f32 %v8116_v41, %v10375_v55  ;;  %v4748_v13 = vmax.f32 %v3756_v11, 0.0 }
 0x1b8   : > { %v2326_v4 = vadd.f32 %v10397_v15, %v7960_v33  ;;  %8213 = vmatprep.mubr.msk.bf16.mxu1 %vm3296_vm2, %v3199_v14  ;;  %v3751_v62 = vadd.f32 %v10375_v55, %v3750_v54  ;;  %v3003_v57 = vmax.f32 %v2323_v42, 0.0  ;;  %v10485_v54 = vpop.permute.xlu0 %8504  ;;  %v12208_v42 = vunpack.i.l.bf16 %v10136_v29 }
 0x1b9   : > { %v6535_v30 = vmax.f32 %v6534_v19, %v6280_v37  ;;  %v2317_v53 = vpop.f32.mrf.mxu0  ;;  %v8119_v25 = vpop.f32.mrf.mxu1  ;;  %8214 = vmatmul.mubr.msk.bf16.gmra.mxu1 %vm3296_vm2, %v3200_v10  ;;  %v3001_v41 = vmax.f32 %v2315_v38, 0.0  ;;  %v12207_v10 = vunpack.i.h.bf16 %v10117_v36 }
 0x1ba   : > { %v2318_v5 = vadd.f32 %v10397_v15, %v2317_v53  ;;  %v3004_v44 = vmax.f32 %v2326_v4, 0.0  ;;  %v4747_v37 = vmax.f32 %v3751_v62, 0.0  ;;  %v6284_v38 = vmul.f32 %v12208_v42, %v4748_v13  ;;  %v10501_v13 = vpop.permute.xlu1 %8509 }
 0x1bb   : > { %v6536_v18 = vmax.f32 %v6535_v30, %v6281_v50  ;;  %v7963_v19 = vpop.f32.mrf.mxu0  ;;  %8058 = vmatmul.mubr.msk.bf16.gmra.mxu0 %vm1443_vm1, %v10208_v0  ;;  %v3763_v14 = vpop.f32.mrf.mxu1  ;;  %v12206_v30 = vunpack.i.l.bf16 %v10117_v36  ;;  %v4749_v50 = vmax.f32 %v3759_v63, 0.0  ;;  %v3772_v6 = vadd.f32 %v8119_v25, %v10375_v55 }
 0x1bc   : > { %v3002_v33 = vmax.f32 %v2318_v5, 0.0  ;;  %8061 = vmatprep.mubr.msk.bf16.mxu0 %vm1443_vm1, %v10227_v51  ;;  %v6283_v4 = vmul.f32 %v12207_v10, %v4747_v37  ;;  %v3764_v62 = vadd.f32 %v10375_v55, %v3763_v14  ;;  %v3202_v48 = vpack.c.bf16 %v3004_v44, %v3003_v57 }
 0x1bd   : > { %v6537_v34 = vrot.slane %v6536_v18, 4  ;;  %v6282_v11 = vmul.f32 %v12206_v30, %v4746_v46  ;;  %v2330_v0 = vpop.f32.mrf.mxu0  ;;  %v8120_v53 = vpop.f32.mrf.mxu1  ;;  %v12209_v44 = vunpack.i.h.bf16 %v10136_v29  ;;  %v2339_v25 = vadd.f32 %v10397_v15, %v7963_v19 }
 0x1be   : > { %v3201_v5 = vpack.c.bf16 %v3002_v33, %v3001_v41  ;;  %v4750_v46 = vmax.f32 %v3764_v62, 0.0  ;;  %v2331_v36 = vadd.f32 %v10397_v15, %v2330_v0  ;;  %v3775_v37 = vadd.f32 %v8120_v53, %v10375_v55 }
 0x1bf   : > { %v6538_v27 = vmax.f32 %v6536_v18, %v6537_v34  ;;  %v6543_v28 = vmax.f32 %v6282_v11, %v6283_v4  ;;  %v7964_v63 = vpop.f32.mrf.mxu0  ;;  %v3766_v30 = vpop.f32.mrf.mxu1  ;;  %v6285_v34 = vmul.f32 %v12209_v44, %v4749_v50  ;;  %v8506_v11 = vunpack.i.l.bf16 %v10485_v54 }
 0x1c0   : > { %v2342_v14 = vadd.f32 %v10397_v15, %v7964_v63  ;;  %v3767_v18 = vadd.f32 %v10375_v55, %v3766_v30  ;;  %8217 = vmatprep.mubr.msk.bf16.mxu1 %vm3296_vm2, %v3201_v5  ;;  %v4752_v53 = vmax.f32 %v3772_v6, 0.0  ;;  %v12210_v42 = vunpack.i.l.bf16 %v10151_v40  ;;  %v10518_v6 = vpop.permute.xlu0 %8514 }
 0x1c1   : > { %v6544_v57 = vmax.f32 %v6543_v28, %v6284_v38  ;;  %v2333_v41 = vpop.f32.mrf.mxu0  ;;  %v8123_v33 = vpop.f32.mrf.mxu1  ;;  %8218 = vmatmul.mubr.msk.bf16.gmra.mxu1 %vm3296_vm2, %v3202_v48  ;;  %v6539_v10 = vrot.slane %v6538_v27, 2  ;;  %v3005_v48 = vmax.f32 %v2331_v36, 0.0  ;;  %v4753_v5 = vmax.f32 %v3775_v37, 0.0 }
 0x1c2   : > { %v4751_v4 = vmax.f32 %v3767_v18, 0.0  ;;  %v2334_v62 = vadd.f32 %v10397_v15, %v2333_v41  ;;  %v6286_v29 = vmul.f32 %v12210_v42, %v4750_v46  ;;  %v3008_v28 = vmax.f32 %v2342_v14, 0.0 }
 0x1c3   : > { %v6545_v50 = vmax.f32 %v6544_v57, %v6285_v34  ;;  %v7967_v38 = vpop.f32.mrf.mxu0  ;;  %8062 = vmatmul.mubr.msk.bf16.gmra.mxu0 %vm1443_vm1, %v10234_v56  ;;  %v3779_v19 = vpop.f32.mrf.mxu1  ;;  %v12211_v63 = vunpack.i.h.bf16 %v10151_v40  ;;  %v3007_v44 = vmax.f32 %v2339_v25, 0.0  ;;  %v6540_v41 = vmax.f32 %v6538_v27, %v6539_v10 }
 0x1c4   : > { %v3006_v18 = vmax.f32 %v2334_v62, 0.0  ;;  %8065 = vmatprep.mubr.msk.bf16.mxu0 %vm1443_vm1, %v10251_v12  ;;  %v3780_v14 = vadd.f32 %v10375_v55, %v3779_v19  ;;  %v3788_v25 = vadd.f32 %v8123_v33, %v10375_v55  ;;  %v12213_v19 = vunpack.i.h.bf16 %v10171_v23 }
 0x1c5   : > { %v6287_v30 = vmul.f32 %v12211_v63, %v4751_v4  ;;  %v6546_v46 = vmax.f32 %v6545_v50, %v6286_v29  ;;  %v2346_v34 = vpop.f32.mrf.mxu0  ;;  %v8124_v57 = vpop.f32.mrf.mxu1  ;;  %v12212_v4 = vunpack.i.l.bf16 %v10171_v23  ;;  %v3204_v12 = vpack.c.bf16 %v3008_v28, %v3007_v44 }
 0x1c6   : > { %v3203_v36 = vpack.c.bf16 %v3006_v18, %v3005_v48  ;;  %v6289_v63 = vmul.f32 %v12213_v19, %v4753_v5  ;;  %v2355_v0 = vadd.f32 %v10397_v15, %v7967_v38  ;;  %v2347_v27 = vadd.f32 %v10397_v15, %v2346_v34  ;;  %v10533_v48 = vpop.permute.xlu1 %8519 }
 0x1c7   : > { %v6288_v62 = vmul.f32 %v12212_v4, %v4752_v53  ;;  %v6547_v42 = vmax.f32 %v6546_v46, %v6287_v30  ;;  %v7968_v29 = vpop.f32.mrf.mxu0  ;;  %v3782_v50 = vpop.f32.mrf.mxu1  ;;  %v4754_v28 = vmax.f32 %v3780_v14, 0.0  ;;  %v3791_v30 = vadd.f32 %v8124_v57, %v10375_v55 }
 0x1c8   : > { %v2358_v10 = vadd.f32 %v10397_v15, %v7968_v29  ;;  %8221 = vmatprep.mubr.msk.bf16.mxu1 %vm3296_vm2, %v3203_v36  ;;  %v3783_v33 = vadd.f32 %v10375_v55, %v3782_v50  ;;  %v6541_v23 = vrot.slane %v6540_v41, 1  ;;  %v4756_v36 = vmax.f32 %v3788_v25, 0.0 }
 0x1c9   : > { %v6548_v53 = vmax.f32 %v6547_v42, %v6288_v62  ;;  %v2349_v18 = vpop.f32.mrf.mxu0  ;;  %v8127_v44 = vpop.f32.mrf.mxu1  ;;  %8222 = vmatmul.mubr.msk.bf16.gmra.mxu1 %vm3296_vm2, %v3204_v12  ;;  %v3011_v42 = vmax.f32 %v2355_v0, 0.0  ;;  %v3009_v29 = vmax.f32 %v2347_v27, 0.0  ;;  %v4757_v25 = vmax.f32 %v3791_v30, 0.0 }
 0x1ca   : > { %v2350_v38 = vadd.f32 %v10397_v15, %v2349_v18  ;;  %v3012_v4 = vmax.f32 %v2358_v10, 0.0  ;;  %v4755_v62 = vmax.f32 %v3783_v33, 0.0  ;;  %v12214_v18 = vunpack.i.l.bf16 %v10177_v20 }
 0x1cb   : > { %v6549_v34 = vmax.f32 %v6548_v53, %v6289_v63  ;;  %v7971_v14 = vpop.f32.mrf.mxu0  ;;  %8066 = vmatmul.mubr.msk.bf16.gmra.mxu0 %vm1443_vm1, %v10260_v16  ;;  %v3795_v57 = vpop.f32.mrf.mxu1  ;;  %v12215_v10 = vunpack.i.h.bf16 %v10177_v20  ;;  %v6542_v16 = vmax.f32 %v6540_v41, %v6541_v23  ;;  %v3804_v0 = vadd.f32 %v8127_v44, %v10375_v55 }
 0x1cc   : > { %v3010_v50 = vmax.f32 %v2350_v38, 0.0  ;;  %v3796_v12 = vadd.f32 %v10375_v55, %v3795_v57  ;;  %8069 = vmatprep.mubr.msk.bf16.mxu0 %vm1443_vm1, %v10271_v32  ;;  %v6290_v63 = vmul.f32 %v12214_v18, %v4754_v28  ;;  %v12216_v57 = vunpack.i.l.bf16 %v10200_v60 }
 0x1cd   : > { %v6550_v19 = vrot.slane %v6549_v34, 4  ;;  %v6291_v53 = vmul.f32 %v12215_v10, %v4755_v62  ;;  %v2362_v33 = vpop.f32.mrf.mxu0  ;;  %v8128_v5 = vpop.f32.mrf.mxu1  ;;  %v3206_v32 = vpack.c.bf16 %v3012_v4, %v3011_v42  ;;  %v2371_v28 = vadd.f32 %v10397_v15, %v7971_v14 }
 0x1ce   : > { %v3205_v46 = vpack.c.bf16 %v3010_v50, %v3009_v29  ;;  %v4758_v27 = vmax.f32 %v3796_v12, 0.0  ;;  %v6292_v37 = vmul.f32 %v12216_v57, %v4756_v36  ;;  %v2363_v20 = vadd.f32 %v10397_v15, %v2362_v33 }
 0x1cf   : > { %v6551_v38 = vmax.f32 %v6549_v34, %v6550_v19  ;;  %v6556_v40 = vmax.f32 %v6290_v63, %v6291_v53  ;;  %v7972_v56 = vpop.f32.mrf.mxu0  ;;  %v3798_v51 = vpop.f32.mrf.mxu1  ;;  %v12217_v23 = vunpack.i.h.bf16 %v10200_v60  ;;  %v3807_v36 = vadd.f32 %v8128_v5, %v10375_v55 }
 0x1d0   : > { %v2374_v30 = vadd.f32 %v10397_v15, %v7972_v56  ;;  %v3799_v41 = vadd.f32 %v10375_v55, %v3798_v51  ;;  %8225 = vmatprep.mubr.msk.bf16.mxu1 %vm3296_vm2, %v3205_v46  ;;  %v4760_v14 = vmax.f32 %v3804_v0, 0.0  ;;  %v12218_v29 = vunpack.i.l.bf16 %v10213_v43  ;;  %v10568_v46 = vld [vmem:[%s12161_s5] ss:$0 sm:$0xff] }
 0x1d1   : > { %v6552_v44 = vrot.slane %v6551_v38, 2  ;;  %v6293_v34 = vmul.f32 %v12217_v23, %v4757_v25  ;;  %v6557_v62 = vmax.f32 %v6556_v40, %v6292_v37  ;;  %v2365_v4 = vpop.f32.mrf.mxu0  ;;  %v8131_v42 = vpop.f32.mrf.mxu1  ;;  %8226 = vmatmul.mubr.msk.bf16.gmra.mxu1 %vm3296_vm2, %v3206_v32  ;;  %v3015_v18 = vmax.f32 %v2371_v28, 0.0 }
 0x1d2   : > { %v6294_v50 = vmul.f32 %v12218_v29, %v4758_v27  ;;  %v4759_v56 = vmax.f32 %v3799_v41, 0.0  ;;  %v2366_v51 = vadd.f32 %v10397_v15, %v2365_v4  ;;  %v3016_v40 = vmax.f32 %v2374_v30, 0.0  ;;  %v10585_v41 = vld [vmem:[%s12162_s6] ss:$0 sm:$0xff] }
 0x1d3   : > { %v6553_v60 = vmax.f32 %v6551_v38, %v6552_v44  ;;  %v6558_v37 = vmax.f32 %v6557_v62, %v6293_v34  ;;  %v3820_v5 = vadd.f32 %v8131_v42, %v10375_v55  ;;  %v7975_v12 = vpop.f32.mrf.mxu0  ;;  %8070 = vmatmul.mubr.msk.bf16.gmra.mxu0 %vm1443_vm1, %v10274_v21  ;;  %v3811_v19 = vpop.f32.mrf.mxu1  ;;  %v3013_v63 = vmax.f32 %v2363_v20, 0.0 }
 0x1d4   : > { %v12219_v25 = vunpack.i.h.bf16 %v10213_v43  ;;  %v3014_v53 = vmax.f32 %v2366_v51, 0.0  ;;  %8073 = vmatprep.mubr.msk.bf16.mxu0 %vm1443_vm1, %v10293_v59  ;;  %v4761_v27 = vmax.f32 %v3807_v36, 0.0  ;;  %v3812_v38 = vadd.f32 %v10375_v55, %v3811_v19 }
 0x1d5   : > { %v6554_v33 = vrot.slane %v6553_v60, 1  ;;  %v6559_v0 = vmax.f32 %v6558_v37, %v6294_v50  ;;  %v2378_v57 = vpop.f32.mrf.mxu0  ;;  %v8132_v32 = vpop.f32.mrf.mxu1  ;;  %v6953_v21 = vmul.f32 %v10568_v46, %v6542_v16  ;;  %v12220_v30 = vunpack.i.l.bf16 %v10224_v49 }
 0x1d6   : > { %v6295_v10 = vmul.f32 %v12219_v25, %v4759_v56  ;;  %v3207_v20 = vpack.c.bf16 %v3014_v53, %v3013_v63  ;;  %v3823_v43 = vadd.f32 %v8132_v32, %v10375_v55  ;;  %v3208_v44 = vpack.c.bf16 %v3016_v40, %v3015_v18 }
 0x1d7   : > { %v6296_v28 = vmul.f32 %v12220_v30, %v4760_v14  ;;  %v6555_v59 = vmax.f32 %v6553_v60, %v6554_v33  ;;  %v4764_v34 = vmax.f32 %v3820_v5, 0.0  ;;  %v7976_v62 = vpop.f32.mrf.mxu0  ;;  %v3814_v36 = vpop.f32.mrf.mxu1  ;;  %v4762_v4 = vmax.f32 %v3812_v38, 0.0 }
 0x1d8   : > { %v6560_v23 = vmax.f32 %v6559_v0, %v6295_v10  ;;  %v2379_v16 = vadd.f32 %v10397_v15, %v2378_v57  ;;  %v2390_v42 = vadd.f32 %v10397_v15, %v7976_v62  ;;  %v3815_v14 = vadd.f32 %v10375_v55, %v3814_v36  ;;  %8229 = vmatprep.mubr.msk.bf16.mxu1 %vm3296_vm2, %v3207_v20 }
 0x1d9   : > { %v6954_v29 = vmul.f32 %v10568_v46, %v6555_v59  ;;  %v12221_v50 = vunpack.i.h.bf16 %v10224_v49  ;;  %v2387_v60 = vadd.f32 %v10397_v15, %v7975_v12  ;;  %v2381_v37 = vpop.f32.mrf.mxu0  ;;  %v8135_v40 = vpop.f32.mrf.mxu1  ;;  %8230 = vmatmul.mubr.msk.bf16.gmra.mxu1 %vm3296_vm2, %v3208_v44  ;;  %v6992_v5 = vadd.f32 %v10585_v41, %v6953_v21 }
 0x1da   : > { %v6561_v51 = vmax.f32 %v6560_v23, %v6296_v28  ;;  %v4765_v19 = vmax.f32 %v3823_v43, 0.0  ;;  %v4763_v18 = vmax.f32 %v3815_v14, 0.0  ;;  %v2382_v63 = vadd.f32 %v10397_v15, %v2381_v37 }
 0x1db   : > { %v6297_v56 = vmul.f32 %v12221_v50, %v4761_v27  ;;  %v6993_v25 = vadd.f32 %v10585_v41, %v6954_v29  ;;  %v12222_v53 = vunpack.i.l.bf16 %v10257_v2  ;;  %v3020_v33 = vmax.f32 %v2390_v42, 0.0  ;;  %v7979_v0 = vpop.f32.mrf.mxu0  ;;  %8074 = vmatmul.mubr.msk.bf16.gmra.mxu0 %vm1443_vm1, %v10302_v52  ;;  %v3827_v12 = vpop.f32.mrf.mxu1 }
 0x1dc   : > { %v12223_v27 = vunpack.i.l.bf16 %v10239_v1  ;;  %v3017_v57 = vmax.f32 %v2379_v16, 0.0  ;;  %v12224_v32 = vunpack.i.h.bf16 %v10239_v1  ;;  %v3018_v30 = vmax.f32 %v2382_v63, 0.0  ;;  %8077 = vmatprep.mubr.msk.bf16.mxu0 %vm1443_vm1, %v10306_v22 }
 0x1dd   : > { %v6562_v10 = vmax.f32 %v6561_v51, %v6297_v56  ;;  %v6300_v49 = vmul.f32 %v12222_v53, %v4764_v34  ;;  %v7056_v28 = vrot.slane %v6993_v25, 7  ;;  %v3019_v43 = vmax.f32 %v2387_v60, 0.0  ;;  %v2394_v44 = vpop.f32.mrf.mxu0  ;;  %v8136_v23 = vpop.f32.mrf.mxu1 }
 0x1de   : > { %v6298_v38 = vmul.f32 %v12223_v27, %v4762_v4  ;;  %v6299_v21 = vmul.f32 %v12224_v32, %v4763_v18  ;;  %v3828_v59 = vadd.f32 %v10375_v55, %v3827_v12  ;;  %v12225_v52 = vunpack.i.h.bf16 %v10257_v2  ;;  %v10620_v60 = vpop.permute.xlu0 %8524 }
 0x1df   : > { %v6563_v20 = vrot.slane %v6562_v10, 4  ;;  %v3209_v36 = vpack.c.bf16 %v3018_v30, %v3017_v57  ;;  %v3836_v4 = vadd.f32 %v8135_v40, %v10375_v55  ;;  %v10614_v1 = vsel %vm7057_vm3, %v7056_v28, %v6992_v5  ;;  %v7980_v14 = vpop.f32.mrf.mxu0  ;;  %v3830_v29 = vpop.f32.mrf.mxu1 }
 0x1e0   : > { %v6301_v34 = vmul.f32 %v12225_v52, %v4765_v19  ;;  %v6569_v62 = vmax.f32 %v6298_v38, %v6299_v21  ;;  %v3210_v42 = vpack.c.bf16 %v3020_v33, %v3019_v43  ;;  %v4766_v22 = vmax.f32 %v3828_v59, 0.0  ;;  %v10632_v43 = vpop.permute.xlu1 %8529 }
 0x1e1   : > { %v6564_v16 = vmax.f32 %v6562_v10, %v6563_v20  ;;  %v2395_v56 = vadd.f32 %v10397_v15, %v2394_v44  ;;  %v3839_v51 = vadd.f32 %v8136_v23, %v10375_v55  ;;  %v2406_v2 = vadd.f32 %v10397_v15, %v7980_v14  ;;  %8233 = vmatprep.mubr.msk.bf16.mxu1 %vm3296_vm2, %v3209_v36  ;;  %v2397_v19 = vpop.f32.mrf.mxu0  ;;  %v8139_v18 = vpop.f32.mrf.mxu1 }
 0x1e2   : > { %v6570_v50 = vmax.f32 %v6569_v62, %v6300_v49  ;;  %v2403_v40 = vadd.f32 %v10397_v15, %v7979_v0  ;;  %v3831_v5 = vadd.f32 %v10375_v55, %v3830_v29  ;;  %8234 = vmatmul.mubr.msk.bf16.gmra.mxu1 %vm3296_vm2, %v3210_v42  ;;  %v8527_v63 = vunpack.i.h.bf16 %v10620_v60 }
 0x1e3   : > { %v6565_v37 = vrot.slane %v6564_v16, 2  ;;  %v12226_v25 = vunpack.i.l.bf16 %v10268_v17  ;;  %v2398_v49 = vadd.f32 %v10397_v15, %v2397_v19  ;;  %v8526_v33 = vunpack.i.l.bf16 %v10620_v60  ;;  %v7983_v57 = vpop.f32.mrf.mxu0  ;;  %8078 = vmatmul.mubr.msk.bf16.gmra.mxu0 %vm1443_vm1, %v10325_v7  ;;  %v3843_v32 = vpop.f32.mrf.mxu1 }
 0x1e4   : > { %v6571_v53 = vmax.f32 %v6570_v50, %v6301_v34  ;;  %v4768_v27 = vmax.f32 %v3836_v4, 0.0  ;;  %v3024_v38 = vmax.f32 %v2406_v2, 0.0  ;;  %v4767_v0 = vmax.f32 %v3831_v5, 0.0  ;;  %8081 = vmatprep.mubr.msk.bf16.mxu0 %vm1443_vm1, %v10360_v39 }
 0x1e5   : > { %v6302_v10 = vmul.f32 %v12226_v25, %v4766_v22  ;;  %v6566_v12 = vmax.f32 %v6564_v16, %v6565_v37  ;;  %v3021_v30 = vmax.f32 %v2395_v56, 0.0  ;;  %v4769_v28 = vmax.f32 %v3839_v51, 0.0  ;;  %v2410_v34 = vpop.f32.mrf.mxu0  ;;  %v8140_v62 = vpop.f32.mrf.mxu1 }
 0x1e6   : > { %v3022_v20 = vmax.f32 %v2398_v49, 0.0  ;;  %v3023_v44 = vmax.f32 %v2403_v40, 0.0  ;;  %v12227_v23 = vunpack.i.h.bf16 %v10268_v17  ;;  %v8532_v7 = vunpack.i.h.bf16 %v10632_v43 }
 0x1e7   : > { %v6572_v21 = vmax.f32 %v6571_v53, %v6302_v10  ;;  %v6567_v59 = vrot.slane %v6566_v12, 1  ;;  %v3852_v4 = vadd.f32 %v8139_v18, %v10375_v55  ;;  %v3844_v16 = vadd.f32 %v10375_v55, %v3843_v32  ;;  %v7984_v56 = vpop.f32.mrf.mxu0  ;;  %v3846_v17 = vpop.f32.mrf.mxu1 }
 0x1e8   : > { %v6303_v52 = vmul.f32 %v12227_v23, %v4767_v0  ;;  %v3211_v36 = vpack.c.bf16 %v3022_v20, %v3021_v30  ;;  %v3855_v42 = vadd.f32 %v8140_v62, %v10375_v55  ;;  %v12228_v14 = vunpack.i.l.bf16 %v10290_v31  ;;  %v12231_v20 = vld [vmem:[#allocation9_spill] sm:$0xff]  ;;  %v12232_v62 = vld [vmem:[#allocation3_spill] sm:$0xff] }
 0x1e9   : > { %v6568_v22 = vmax.f32 %v6566_v12, %v6567_v59  ;;  %v3212_v29 = vpack.c.bf16 %v3024_v38, %v3023_v44  ;;  %v12229_v51 = vunpack.i.h.bf16 %v10290_v31  ;;  %v2419_v37 = vadd.f32 %v10397_v15, %v7983_v57  ;;  %v2413_v53 = vpop.f32.mrf.mxu0  ;;  %v8143_v49 = vpop.f32.mrf.mxu1  ;;  %v12230_v38 = vld [vmem:[#allocation11_spill] sm:$0xff] }
 0x1ea   : > { %v6304_v39 = vmul.f32 %v12228_v14, %v4768_v27  ;;  %v6573_v50 = vmax.f32 %v6572_v21, %v6303_v52  ;;  %v2411_v40 = vadd.f32 %v10397_v15, %v2410_v34  ;;  %v2422_v5 = vadd.f32 %v10397_v15, %v7984_v56  ;;  %8237 = vmatprep.mubr.msk.bf16.mxu1 %vm3296_vm2, %v3211_v36  ;;  %v10666_v56 = vld [vmem:[%s9356_s9 + $0x3f0] sm:$0xff]  }
 0x1eb   : > { %v6305_v2 = vmul.f32 %v12229_v51, %v4769_v28  ;;  %v6955_v19 = vmul.f32 %v10568_v46, %v6568_v22  ;;  %v4770_v25 = vmax.f32 %v3844_v16, 0.0  ;;  %v3847_v10 = vadd.f32 %v10375_v55, %v3846_v17  ;;  %8238 = vmatmul.mubr.msk.bf16.gmra.mxu1 %vm3296_vm2, %v3212_v29  ;;  %v7987_v28 = vpop.f32.mrf.mxu0  ;;  %8082 = vmatmul.mubr.msk.bf16.gmra.mxu0 %vm1443_vm1, %v12231_v20  ;;  %v3859_v59 = vpop.f32.mrf.mxu1  ;;  %v12233_v16 = vld [vmem:[#allocation2_spill] sm:$0xff]  ;;  %v12236_v17 = vld [vmem:[#allocation4_spill] sm:$0xff] }
 0x1ec   : > { %v6574_v18 = vmax.f32 %v6573_v50, %v6304_v39  ;;  %v4772_v31 = vmax.f32 %v3852_v4, 0.0  ;;  %v4773_v12 = vmax.f32 %v3855_v42, 0.0  ;;  %v2414_v27 = vadd.f32 %v10397_v15, %v2413_v53  ;;  %8085 = vmatprep.mubr.msk.bf16.mxu0 %vm1443_vm1, %v12232_v62 }
 0x1ed   : > { %v784_v0 = vunpack.c.h.bf16 %v12230_v38  ;;  %v6994_v57 = vadd.f32 %v10585_v41, %v6955_v19  ;;  %v3028_v21 = vmax.f32 %v2422_v5, 0.0  ;;  %v4771_v30 = vmax.f32 %v3847_v10, 0.0  ;;  %v2426_v29 = vpop.f32.mrf.mxu0  ;;  %v8144_v50 = vpop.f32.mrf.mxu1 }
 0x1ee   : > { %v6575_v32 = vmax.f32 %v6574_v18, %v6305_v2  ;;  %v3027_v44 = vmax.f32 %v2419_v37, 0.0  ;;  %v3025_v23 = vmax.f32 %v2411_v40, 0.0  ;;  %v3026_v52 = vmax.f32 %v2414_v27, 0.0 }
 0x1ef   : > { %v3860_v34 = vadd.f32 %v10375_v55, %v3859_v59  ;;  %v7059_v36 = vrot.slane %v6994_v57, 6  ;;  %v12234_v42 = vunpack.i.l.bf16 %v12233_v16  ;;  %v12235_v14 = vunpack.i.h.bf16 %v12233_v16  ;;  %v7988_v27 = vpop.f32.mrf.mxu0  ;;  %v3862_v57 = vpop.f32.mrf.mxu1 }
 0x1f0   : > { %v6576_v4 = vrot.slane %v6575_v32, 4  ;;  %v12237_v51 = vunpack.i.l.bf16 %v12236_v17  ;;  %v12238_v37 = vunpack.i.h.bf16 %v12236_v17  ;;  %v3213_v5 = vpack.c.bf16 %v3026_v52, %v3025_v23 }
 0x1f1   : > { %v6306_v22 = vmul.f32 %v12234_v42, %v4770_v25  ;;  %v6307_v39 = vmul.f32 %v12235_v14, %v4771_v30  ;;  %v791_v19 = vunpack.c.l.bf16 %v10666_v56  ;;  %v10675_v18 = vsel %vm7060_vm4, %v7059_v36, %v10614_v1  ;;  %v12239_v42 = vld [vmem:[#allocation7_spill] sm:$0xff]  ;;  %v12240_v14 = vld [vmem:[#allocation5_spill] sm:$0xff] }
 0x1f2   : > { %v6308_v2 = vmul.f32 %v12237_v51, %v4772_v31  ;;  %v6309_v40 = vmul.f32 %v12238_v37, %v4773_v12  ;;  %v6577_v25 = vmax.f32 %v6575_v32, %v6576_v4  ;;  %v3214_v10 = vpack.c.bf16 %v3028_v21, %v3027_v44  ;;  %8241 = vmatprep.mubr.msk.bf16.mxu1 %vm3296_vm2, %v3213_v5  ;;  %v2429_v32 = vpop.f32.mrf.mxu0  ;;  %v8147_v21 = vpop.f32.mrf.mxu1 }
 0x1f3   : > { %v6582_v53 = vmax.f32 %v6306_v22, %v6307_v39  ;;  %v3868_v30 = vadd.f32 %v8143_v49, %v10375_v55  ;;  %v4774_v20 = vmax.f32 %v3860_v34, 0.0  ;;  %v2427_v31 = vadd.f32 %v10397_v15, %v2426_v29  ;;  %8086 = vmatmul.mubr.msk.bf16.gmra.mxu0 %vm1443_vm1, %v12239_v42 }
 0x1f4   : > { %v2438_v59 = vadd.f32 %v10397_v15, %v7988_v27  ;;  %v6578_v12 = vrot.slane %v6577_v25, 2  ;;  %v2435_v52 = vadd.f32 %v10397_v15, %v7987_v28  ;;  %v3863_v1 = vadd.f32 %v10375_v55, %v3862_v57  ;;  %8242 = vmatmul.mubr.msk.bf16.gmra.mxu1 %vm3296_vm2, %v3214_v10  ;;  %v7991_v16 = vpop.f32.mrf.mxu0  ;;  %v3875_v22 = vpop.f32.mrf.mxu1  ;;  %8089 = vmatprep.mubr.msk.bf16.mxu0 %vm1443_vm1, %v12230_v38 }
 0x1f5   : > { %v6583_v23 = vmax.f32 %v6582_v53, %v6308_v2  ;;  %v3871_v44 = vadd.f32 %v8144_v50, %v10375_v55  ;;  %v2430_v34 = vadd.f32 %v10397_v15, %v2429_v32  ;;  %v8988_v28 = vpack.i.bf16 %v784_v0, %v791_v19 }
 0x1f6   : > { %v3032_v49 = vmax.f32 %v2438_v59, 0.0  ;;  %v6579_v62 = vmax.f32 %v6577_v25, %v6578_v12  ;;  %v4775_v4 = vmax.f32 %v3863_v1, 0.0  ;;  %v12241_v39 = vunpack.i.l.bf16 %v12240_v14  ;;  %v2442_v5 = vpop.f32.mrf.mxu0  ;;  %v8148_v25 = vpop.f32.mrf.mxu1 }
 0x1f7   : > { %v6584_v36 = vmax.f32 %v6583_v23, %v6309_v40  ;;  %v3029_v17 = vmax.f32 %v2427_v31, 0.0  ;;  %v3030_v51 = vmax.f32 %v2430_v34, 0.0  ;;  %v4776_v2 = vmax.f32 %v3868_v30, 0.0  ;;  %8989 = vperm.xlu1 %8382, %v8988_v28   ;;  %v12243_v28 = vld [vmem:[#allocation8_spill] sm:$0xff] }
 0x1f8   : > { %v6310_v29 = vmul.f32 %v12241_v39, %v4774_v20  ;;  %v6580_v50 = vrot.slane %v6579_v62, 1  ;;  %v3031_v37 = vmax.f32 %v2435_v52, 0.0  ;;  %v3884_v40 = vadd.f32 %v8147_v21, %v10375_v55  ;;  %v7992_v59 = vpop.f32.mrf.mxu0  ;;  %v3878_v30 = vpop.f32.mrf.mxu1 }
 0x1f9   : > { %v12242_v0 = vunpack.i.h.bf16 %v12240_v14  ;;  %v3215_v53 = vpack.c.bf16 %v3030_v51, %v3029_v17  ;;  %v3876_v27 = vadd.f32 %v10375_v55, %v3875_v22  ;;  %v4777_v20 = vmax.f32 %v3871_v44, 0.0 }
 0x1fa   : > { %v6585_v10 = vmax.f32 %v6584_v36, %v6310_v29  ;;  %v6581_v57 = vmax.f32 %v6579_v62, %v6580_v50  ;;  %v3216_v31 = vpack.c.bf16 %v3032_v49, %v3031_v37  ;;  %v3887_v38 = vadd.f32 %v8148_v25, %v10375_v55  ;;  %v2445_v44 = vpop.f32.mrf.mxu0  ;;  %v8151_v49 = vpop.f32.mrf.mxu1 }
 0x1fb   : > { %v6311_v19 = vmul.f32 %v12242_v0, %v4775_v4  ;;  %v4778_v12 = vmax.f32 %v3876_v27, 0.0  ;;  %v2443_v23 = vadd.f32 %v10397_v15, %v2442_v5  ;;  %v2454_v52 = vadd.f32 %v10397_v15, %v7992_v59  ;;  %8245 = vmatprep.mubr.msk.bf16.mxu1 %vm3296_vm2, %v3215_v53  ;;  %8090 = vmatmul.mubr.msk.bf16.gmra.mxu0 %vm1443_vm1, %v10475_v8  ;;  %v10723_v8 = vld [vmem:[%s12160_s4] ss:$0 sm:$0xff] }
 0x1fc   : > { %v3879_v1 = vadd.f32 %v10375_v55, %v3878_v30  ;;  %v6956_v32 = vmul.f32 %v10568_v46, %v6581_v57  ;;  %v4780_v21 = vmax.f32 %v3884_v40, 0.0  ;;  %v2451_v34 = vadd.f32 %v10397_v15, %v7991_v16  ;;  %8246 = vmatmul.mubr.msk.bf16.gmra.mxu1 %vm3296_vm2, %v3216_v31  ;;  %v7995_v51 = vpop.f32.mrf.mxu0  ;;  %v3891_v16 = vpop.f32.mrf.mxu1 }
 0x1fd   : > { %v6586_v62 = vmax.f32 %v6585_v10, %v6311_v19  ;;  %v4781_v36 = vmax.f32 %v3887_v38, 0.0  ;;  %v2446_v42 = vadd.f32 %v10397_v15, %v2445_v44  ;;  %v12244_v55 = vunpack.i.l.bf16 %v12243_v28  ;;  %v12248_v10 = vld [vmem:[#allocation6_spill] sm:$0xff] }
 0x1fe   : > { %v4779_v4 = vmax.f32 %v3879_v1, 0.0  ;;  %v6995_v22 = vadd.f32 %v10585_v41, %v6956_v32  ;;  %v12245_v39 = vunpack.i.h.bf16 %v12243_v28  ;;  %v3036_v17 = vmax.f32 %v2454_v52, 0.0  ;;  %8093 = vmatprep.mubr.msk.bf16.mxu0 %vm1443_vm1, %v12248_v10  ;;  %v2458_v27 = vpop.f32.mrf.mxu0  ;;  %v8152_v57 = vpop.f32.mrf.mxu1 }
 0x1ff   : > { %v6312_v14 = vmul.f32 %v12244_v55, %v4776_v2  ;;  %v12246_v50 = vunpack.i.l.bf16 %v10370_v61  ;;  %v3033_v40 = vmax.f32 %v2443_v23, 0.0  ;;  %v12247_v15 = vunpack.i.h.bf16 %v10370_v61  ;;  %v10733_v32 = vpop.permute.xlu0 %8534 }
 0x200   : > { %v6313_v29 = vmul.f32 %v12245_v39, %v4777_v20  ;;  %v3034_v25 = vmax.f32 %v2446_v42, 0.0  ;;  %v7062_v2 = vrot.slane %v6995_v22, 5  ;;  %v6316_v0 = vmul.f32 %v8481_v35, %v4780_v21  ;;  %v7996_v52 = vpop.f32.mrf.mxu0  ;;  %v3894_v1 = vpop.f32.mrf.mxu1 }
 0x201   : > { %v6314_v37 = vmul.f32 %v12246_v50, %v4778_v12  ;;  %v6315_v5 = vmul.f32 %v12247_v15, %v4779_v4  ;;  %v3035_v19 = vmax.f32 %v2451_v34, 0.0  ;;  %v3892_v53 = vadd.f32 %v10723_v8, %v3891_v16 }
 0x202   : > { %v6587_v61 = vmax.f32 %v6586_v62, %v6312_v14  ;;  %v12249_v20 = vunpack.i.h.bf16 %v10392_v45  ;;  %v3217_v59 = vpack.c.bf16 %v3034_v25, %v3033_v40  ;;  %v10730_v30 = vsel %vm7063_vm5, %v7062_v2, %v10675_v18  ;;  %v10738_v45 = vld [vmem:[%s12158_s2] ss:$0 sm:$0xff]  ;;  %v2461_v42 = vpop.f32.mrf.mxu0  ;;  %v8155_v22 = vpop.f32.mrf.mxu1 }
 0x203   : > { %v6595_v38 = vmax.f32 %v6314_v37, %v6315_v5  ;;  %v3218_v35 = vpack.c.bf16 %v3036_v17, %v3035_v19  ;;  %v3900_v12 = vadd.f32 %v10723_v8, %v8151_v49  ;;  %v4782_v23 = vmax.f32 %v3892_v53, 0.0  ;;  %v12250_v40 = vld [vmem:[#allocation10_spill] sm:$0xff]  ;;  %v10756_v5 = vld [vmem:[%s9356_s9 + $0x3f8] sm:$0xff]   ;;  %v10758_v25 = vpop.permute.xlu1 %8539 }
 0x204   : > { %v6317_v31 = vmul.f32 %v12249_v20, %v4781_v36  ;;  %v2459_v34 = vadd.f32 %v10738_v45, %v2458_v27  ;;  %v3903_v44 = vadd.f32 %v10723_v8, %v8152_v57  ;;  %v2470_v18 = vadd.f32 %v10738_v45, %v7996_v52  ;;  %8249 = vmatprep.mubr.msk.bf16.mxu1 %vm3296_vm2, %v3217_v59  ;;  %v3907_v15 = vpop.f32.mrf.mxu1 }
 0x205   : > { %v6596_v21 = vmax.f32 %v6595_v38, %v6316_v0  ;;  %v8531_v49 = vunpack.i.l.bf16 %v10632_v43  ;;  %v8537_v62 = vunpack.i.h.bf16 %v10733_v32  ;;  %v2467_v36 = vadd.f32 %v10738_v45, %v7995_v51  ;;  %8250 = vmatmul.mubr.msk.bf16.gmra.mxu1 %vm3296_vm2, %v3218_v35  ;;  %v7999_v51 = vpop.f32.mrf.mxu0  ;;  %8094 = vmatmul.mubr.msk.bf16.gmra.mxu0 %vm1443_vm1, %v12250_v40 }
 0x206   : > { %v3895_v4 = vadd.f32 %v10723_v8, %v3894_v1  ;;  %v6588_v28 = vmax.f32 %v6587_v61, %v6313_v29  ;;  %v6318_v55 = vmul.f32 %v8486_v9, %v4782_v23  ;;  %v2462_v39 = vadd.f32 %v10738_v45, %v2461_v42  ;;  %8097 = vmatprep.mubr.msk.bf16.mxu0 %vm1443_vm1, %v10666_v56  ;;  %v8156_v61 = vpop.f32.mrf.mxu1 }
 0x207   : > { %v6597_v14 = vmax.f32 %v6596_v21, %v6317_v31  ;;  %v8536_v17 = vunpack.i.l.bf16 %v10733_v32  ;;  %v4784_v16 = vmax.f32 %v3900_v12, 0.0  ;;  %v3040_v50 = vmax.f32 %v2470_v18, 0.0  ;;  %v2474_v57 = vpop.f32.mrf.mxu0 }
 0x208   : > { %v4783_v37 = vmax.f32 %v3895_v4, 0.0  ;;  %v3037_v10 = vmax.f32 %v2459_v34, 0.0  ;;  %v4785_v9 = vmax.f32 %v3903_v44, 0.0  ;;  %v3038_v2 = vmax.f32 %v2462_v39, 0.0  ;;  %v3910_v21 = vpop.f32.mrf.mxu1  ;;  %v10770_v34 = vpop.permute.xlu0 %8544 }
 0x209   : > { %v6598_v29 = vmax.f32 %v6597_v14, %v6318_v55  ;;  %v8542_v0 = vunpack.i.h.bf16 %v10758_v25  ;;  %v8541_v19 = vunpack.i.l.bf16 %v10758_v25  ;;  %v3039_v53 = vmax.f32 %v2467_v36, 0.0  ;;  %v8000_v1 = vpop.f32.mrf.mxu0 }
 0x20a   : > { %v6319_v27 = vmul.f32 %v8487_v24, %v4783_v37  ;;  %v6589_v20 = vrot.slane %v6588_v28, 4  ;;  %v3219_v31 = vpack.c.bf16 %v3038_v2, %v3037_v10  ;;  %v3908_v38 = vadd.f32 %v10723_v8, %v3907_v15  ;;  %v8159_v39 = vpop.f32.mrf.mxu1 }
 0x20b   : > { %v12251_v59 = vunpack.i.l.bf16 %v10426_v47  ;;  %v3220_v12 = vpack.c.bf16 %v3040_v50, %v3039_v53  ;;  %v3916_v52 = vadd.f32 %v10723_v8, %v8155_v22  ;;  %v6321_v24 = vmul.f32 %v12252_v3, %v4785_v9  ;;  %v2477_v14 = vpop.f32.mrf.mxu0 }
 0x20c   : > { %v6599_v23 = vmax.f32 %v6598_v29, %v6319_v27  ;;  %v2483_v44 = vadd.f32 %v10738_v45, %v7999_v51  ;;  %v2475_v18 = vadd.f32 %v10738_v45, %v2474_v57  ;;  %v2486_v36 = vadd.f32 %v10738_v45, %v8000_v1  ;;  %8253 = vmatprep.mubr.msk.bf16.mxu1 %vm3296_vm2, %v3219_v31  ;;  %v3923_v9 = vpop.f32.mrf.mxu1 }
 0x20d   : > { %v6320_v35 = vmul.f32 %v12251_v59, %v4784_v16  ;;  %v4786_v42 = vmax.f32 %v3908_v38, 0.0  ;;  %v3919_v55 = vadd.f32 %v10723_v8, %v8156_v61  ;;  %v3911_v22 = vadd.f32 %v10723_v8, %v3910_v21  ;;  %8254 = vmatmul.mubr.msk.bf16.gmra.mxu1 %vm3296_vm2, %v3220_v12  ;;  %v8003_v10 = vpop.f32.mrf.mxu0  ;;  %8098 = vmatmul.mubr.msk.bf16.gmra.mxu0 %vm1443_vm1, %v10756_v5 }
 0x20e   : > { %v6590_v47 = vmax.f32 %v6588_v28, %v6589_v20  ;;  %v8547_v16 = vunpack.i.h.bf16 %v10770_v34  ;;  %v8546_v50 = vunpack.i.l.bf16 %v10770_v34  ;;  %v2478_v37 = vadd.f32 %v10738_v45, %v2477_v14  ;;  %v8160_v12 = vpop.f32.mrf.mxu1 }
 0x20f   : > { %v6600_v4 = vmax.f32 %v6599_v23, %v6320_v35  ;;  %v4788_v40 = vmax.f32 %v3916_v52, 0.0  ;;  %v3044_v15 = vmax.f32 %v2486_v36, 0.0  ;;  %v4787_v29 = vmax.f32 %v3911_v22, 0.0  ;;  %v2490_v35 = vpop.f32.mrf.mxu0  ;;  %v10791_v52 = vpop.permute.xlu1 %8549 }
 0x210   : > { %v3043_v2 = vmax.f32 %v2483_v44, 0.0  ;;  %v3041_v53 = vmax.f32 %v2475_v18, 0.0  ;;  %v3042_v27 = vmax.f32 %v2478_v37, 0.0  ;;  %v3924_v28 = vadd.f32 %v10723_v8, %v3923_v9 }
 0x211   : > { %v6601_v51 = vmax.f32 %v6600_v4, %v6321_v24  ;;  %v12253_v61 = vunpack.i.l.bf16 %v10434_v58  ;;  %v4789_v31 = vmax.f32 %v3919_v55, 0.0  ;;  %v12254_v38 = vunpack.i.h.bf16 %v10434_v58  ;;  %v3926_v55 = vpop.f32.mrf.mxu1 }
 0x212   : > { %v6591_v23 = vrot.slane %v6590_v47, 2  ;;  %v3221_v1 = vpack.c.bf16 %v3042_v27, %v3041_v53  ;;  %v3932_v21 = vadd.f32 %v10723_v8, %v8159_v39  ;;  %v4790_v3 = vmax.f32 %v3924_v28, 0.0 }
 0x213   : > { %v6602_v57 = vrot.slane %v6601_v51, 4  ;;  %v6322_v20 = vmul.f32 %v12253_v61, %v4786_v42  ;;  %v6323_v59 = vmul.f32 %v12254_v38, %v4787_v29  ;;  %v12255_v44 = vunpack.i.l.bf16 %v10464_v26  ;;  %v8004_v42 = vpop.f32.mrf.mxu0 }
 0x214   : > { %v3222_v36 = vpack.c.bf16 %v3044_v15, %v3043_v2  ;;  %v8552_v58 = vunpack.i.h.bf16 %v10791_v52  ;;  %v2499_v22 = vadd.f32 %v10738_v45, %v8003_v10  ;;  %v2491_v14 = vadd.f32 %v10738_v45, %v2490_v35  ;;  %8257 = vmatprep.mubr.msk.bf16.mxu1 %vm3296_vm2, %v3221_v1  ;;  %v8163_v2 = vpop.f32.mrf.mxu1  ;;  %v10812_v1 = vld [vmem:[%s9356_s9 + $0x3b8] sm:$0xff]  }
 0x215   : > { %v6603_v24 = vmax.f32 %v6601_v51, %v6602_v57  ;;  %v6324_v18 = vmul.f32 %v12255_v44, %v4788_v40  ;;  %v6608_v4 = vmax.f32 %v6322_v20, %v6323_v59  ;;  %v2502_v37 = vadd.f32 %v10738_v45, %v8004_v42  ;;  %v2493_v9 = vpop.f32.mrf.mxu0 }
 0x216   : > { %v12256_v39 = vunpack.i.h.bf16 %v10464_v26  ;;  %v3935_v40 = vadd.f32 %v10723_v8, %v8160_v12  ;;  %v3927_v15 = vadd.f32 %v10723_v8, %v3926_v55  ;;  %8258 = vmatmul.mubr.msk.bf16.gmra.mxu1 %vm3296_vm2, %v3222_v36  ;;  %v10806_v10 = vmax.f32 %v6590_v47, %v6591_v23  ;;  %v3939_v38 = vpop.f32.mrf.mxu1 }
 0x217   : > { %v6609_v29 = vmax.f32 %v6608_v4, %v6324_v18  ;;  %v4792_v53 = vmax.f32 %v3932_v21, 0.0  ;;  %v6326_v27 = vmul.f32 %v8506_v11, %v4790_v3  ;;  %v2494_v28 = vadd.f32 %v10738_v45, %v2493_v9 }
 0x218   : > { %v6325_v51 = vmul.f32 %v12256_v39, %v4789_v31  ;;  %v6604_v26 = vrot.slane %v6603_v24, 2  ;;  %v3048_v61 = vmax.f32 %v2502_v37, 0.0  ;;  %v4791_v20 = vmax.f32 %v3927_v15, 0.0  ;;  %v8007_v31 = vpop.f32.mrf.mxu0  ;;  %v8164_v18 = vpop.f32.mrf.mxu1 }
 0x219   : > { %v3047_v59 = vmax.f32 %v2499_v22, 0.0  ;;  %v3045_v35 = vmax.f32 %v2491_v14, 0.0  ;;  %v3046_v12 = vmax.f32 %v2494_v28, 0.0  ;;  %v777_v47 = vunpack.c.l.bf16 %v10812_v1 }
 0x21a   : > { %v6610_v57 = vmax.f32 %v6609_v29, %v6325_v51  ;;  %v4793_v21 = vmax.f32 %v3935_v40, 0.0  ;;  %v12257_v44 = vunpack.i.h.bf16 %v10485_v54  ;;  %v2506_v3 = vpop.f32.mrf.mxu0  ;;  %v792_v36 = vunpack.c.h.bf16 %v10666_v56  ;;  %v3942_v40 = vpop.f32.mrf.mxu1 }
 0x21b   : > { %v12258_v4 = vunpack.i.l.bf16 %v10501_v13  ;;  %v3223_v55 = vpack.c.bf16 %v3046_v12, %v3045_v35  ;;  %v3948_v22 = vadd.f32 %v10723_v8, %v8163_v2  ;;  %v3940_v14 = vadd.f32 %v10723_v8, %v3939_v38 }
 0x21c   : > { %v6611_v23 = vmax.f32 %v6610_v57, %v6326_v27  ;;  %v6327_v11 = vmul.f32 %v12257_v44, %v4791_v20  ;;  %v10822_v37 = vmax.f32 %v6603_v24, %v6604_v26  ;;  %v3224_v39 = vpack.c.bf16 %v3048_v61, %v3047_v59  ;;  %v8008_v54 = vpop.f32.mrf.mxu0  ;;  %v8167_v57 = vpop.f32.mrf.mxu1 }
 0x21d   : > { %v6328_v42 = vmul.f32 %v12258_v4, %v4792_v53  ;;  %v3951_v29 = vadd.f32 %v10723_v8, %v8164_v18  ;;  %v4794_v15 = vmax.f32 %v3940_v14, 0.0  ;;  %v2507_v9 = vadd.f32 %v10738_v45, %v2506_v3  ;;  %8261 = vmatprep.mubr.msk.bf16.mxu1 %vm3296_vm2, %v3223_v55 }
 0x21e   : > { %v6612_v51 = vmax.f32 %v6611_v23, %v6327_v11  ;;  %v2518_v56 = vadd.f32 %v10738_v45, %v8008_v54  ;;  %v3943_v53 = vadd.f32 %v10723_v8, %v3942_v40  ;;  %v12259_v2 = vunpack.i.h.bf16 %v10501_v13  ;;  %v2509_v26 = vpop.f32.mrf.mxu0  ;;  %8262 = vmatmul.mubr.msk.bf16.gmra.mxu1 %vm3296_vm2, %v3224_v39  ;;  %v3955_v11 = vpop.f32.mrf.mxu1 }
 0x21f   : > { %v2515_v28 = vadd.f32 %v10738_v45, %v8007_v31  ;;  %v8993_v61 = vpack.i.bf16 %v792_v36, %v777_v47  ;;  %v4796_v20 = vmax.f32 %v3948_v22, 0.0  ;;  %v4797_v38 = vmax.f32 %v3951_v29, 0.0 }
 0x220   : > { %v6329_v27 = vmul.f32 %v12259_v2, %v4793_v21  ;;  %v6613_v24 = vmax.f32 %v6612_v51, %v6328_v42  ;;  %v4795_v59 = vmax.f32 %v3943_v53, 0.0  ;;  %v2510_v35 = vadd.f32 %v10738_v45, %v2509_v26  ;;  %v8011_v21 = vpop.f32.mrf.mxu0  ;;  %v8168_v51 = vpop.f32.mrf.mxu1 }
 0x221   : > { %v6593_v12 = vrot.slane %v10806_v10, 1  ;;  %v8551_v23 = vunpack.i.l.bf16 %v10791_v52  ;;  %v3052_v13 = vmax.f32 %v2518_v56, 0.0  ;;  %8994 = vperm.xlu0 %8371, %v8993_v61   ;;  %v12260_v31 = vunpack.i.l.bf16 %v10518_v6 }
 0x222   : > { %v6614_v44 = vmax.f32 %v6613_v24, %v6329_v27  ;;  %v3049_v18 = vmax.f32 %v2507_v9, 0.0  ;;  %v12261_v47 = vunpack.i.h.bf16 %v10518_v6  ;;  %v3050_v4 = vmax.f32 %v2510_v35, 0.0  ;;  %v2522_v39 = vpop.f32.mrf.mxu0  ;;  %v3958_v26 = vpop.f32.mrf.mxu1 }
 0x223   : > { %v6330_v3 = vmul.f32 %v12260_v31, %v4794_v15  ;;  %v6606_v42 = vrot.slane %v10822_v37, 1  ;;  %v3051_v22 = vmax.f32 %v2515_v28, 0.0  ;;  %v3956_v14 = vadd.f32 %v10723_v8, %v3955_v11  ;;  %v10847_v28 = vpop.permute.xlu0 %8554 }
 0x224   : > { %v6331_v36 = vmul.f32 %v12261_v47, %v4795_v59  ;;  %v6615_v55 = vrot.slane %v6614_v44, 4  ;;  %v12262_v29 = vunpack.i.l.bf16 %v10533_v48  ;;  %v12263_v40 = vunpack.i.h.bf16 %v10533_v48  ;;  %v8012_v24 = vpop.f32.mrf.mxu0  ;;  %v8171_v11 = vpop.f32.mrf.mxu1 }
 0x225   : > { %v3225_v9 = vpack.c.bf16 %v3050_v4, %v3049_v18  ;;  %v3226_v6 = vpack.c.bf16 %v3052_v13, %v3051_v22  ;;  %v3964_v2 = vadd.f32 %v10723_v8, %v8167_v57  ;;  %v4798_v27 = vmax.f32 %v3956_v14, 0.0 }
 0x226   : > { %v6332_v54 = vmul.f32 %v12262_v29, %v4796_v20  ;;  %v6333_v56 = vmul.f32 %v12263_v40, %v4797_v38  ;;  %v6621_v15 = vmax.f32 %v6330_v3, %v6331_v36  ;;  %v6616_v53 = vmax.f32 %v6614_v44, %v6615_v55  ;;  %v2525_v13 = vpop.f32.mrf.mxu0  ;;  %v3971_v55 = vpop.f32.mrf.mxu1 }
 0x227   : > { %v2523_v59 = vadd.f32 %v10738_v45, %v2522_v39  ;;  %v3967_v35 = vadd.f32 %v10723_v8, %v8168_v51  ;;  %v2534_v20 = vadd.f32 %v10738_v45, %v8012_v24  ;;  %8265 = vmatprep.mubr.msk.bf16.mxu1 %vm3296_vm2, %v3225_v9  ;;  %v6594_v48 = vmax.f32 %v10806_v10, %v6593_v12  ;;  %v10866_v9 = vld [vmem:[%s9356_s9 + $0x3d8] sm:$0xff]  }
 0x228   : > { %v6622_v61 = vmax.f32 %v6621_v15, %v6332_v54  ;;  %v8557_v38 = vunpack.i.h.bf16 %v10847_v28  ;;  %v2531_v57 = vadd.f32 %v10738_v45, %v8011_v21  ;;  %v3959_v44 = vadd.f32 %v10723_v8, %v3958_v26  ;;  %8266 = vmatmul.mubr.msk.bf16.gmra.mxu1 %vm3296_vm2, %v3226_v6  ;;  %v8015_v21 = vpop.f32.mrf.mxu0  ;;  %v8172_v40 = vpop.f32.mrf.mxu1 }
 0x229   : > { %v6617_v31 = vrot.slane %v6616_v53, 2  ;;  %v6334_v3 = vmul.f32 %v8526_v33, %v4798_v27  ;;  %v2526_v47 = vadd.f32 %v10738_v45, %v2525_v13  ;;  %v4800_v36 = vmax.f32 %v3964_v2, 0.0 }
 0x22a   : > { %v6623_v18 = vmax.f32 %v6622_v61, %v6333_v56  ;;  %v4801_v10 = vmax.f32 %v3967_v35, 0.0  ;;  %v3056_v12 = vmax.f32 %v2534_v20, 0.0  ;;  %v4799_v4 = vmax.f32 %v3959_v44, 0.0  ;;  %v2538_v54 = vpop.f32.mrf.mxu0  ;;  %v9276_v56 = vld [vmem:[%s9356_s9 + $0x398] sm:$0xff]   ;;  %s10897_s9 = sshll.u32 %s7183_s25, 2 }
 0x22b   : > { %v6607_v22 = vmax.f32 %v10822_v37, %v6606_v42  ;;  %v3053_v39 = vmax.f32 %v2523_v59, 0.0  ;;  %v3054_v51 = vmax.f32 %v2526_v47, 0.0  ;;  %v3055_v29 = vmax.f32 %v2531_v57, 0.0  ;;  %v3974_v59 = vpop.f32.mrf.mxu1  ;;  %p277_p4 = scmp.lt.s32.totalorder %s10897_s9, 7 }
 0x22c   : > { %v6624_v14 = vmax.f32 %v6623_v18, %v6334_v3  ;;  %v6335_v33 = vmul.f32 %v8527_v63, %v4799_v4  ;;  %v770_v15 = vunpack.c.h.bf16 %v9276_v56  ;;  %v785_v6 = vunpack.c.l.bf16 %v10866_v9  ;;  %v8016_v61 = vpop.f32.mrf.mxu0 }
 0x22d   : > { %v6618_v2 = vmax.f32 %v6616_v53, %v6617_v31  ;;  %v3227_v27 = vpack.c.bf16 %v3054_v51, %v3053_v39  ;;  %v3980_v24 = vadd.f32 %v10723_v8, %v8171_v11  ;;  %v3972_v37 = vadd.f32 %v10723_v8, %v3971_v55  ;;  %v8175_v11 = vpop.f32.mrf.mxu1  ;;  %s12316_s9 = smov (!%p277_p4, %s10897_s9), 7 }
 0x22e   : > { %v6336_v42 = vmul.f32 %v8531_v49, %v4800_v36  ;;  %v6337_v60 = vmul.f32 %v8532_v7, %v4801_v10  ;;  %v3228_v63 = vpack.c.bf16 %v3056_v12, %v3055_v29  ;;  %v6625_v26 = vmax.f32 %v6624_v14, %v6335_v33  ;;  %v2541_v7 = vpop.f32.mrf.mxu0  ;;  %s7191_s13 = sshll.u32 %s12316_s9, 3 }
 0x22f   : > { %v2547_v35 = vadd.f32 %v10738_v45, %v8015_v21  ;;  %v2539_v20 = vadd.f32 %v10738_v45, %v2538_v54  ;;  %v3983_v53 = vadd.f32 %v10723_v8, %v8172_v40  ;;  %v2550_v57 = vadd.f32 %v10738_v45, %v8016_v61  ;;  %8269 = vmatprep.mubr.msk.bf16.mxu1 %vm3296_vm2, %v3227_v27  ;;  %v3987_v55 = vpop.f32.mrf.mxu1  ;;  %s10961_s16 = scalar_lea.vmem %s12163_s7, %s7191_s13 }
 0x230   : > { %v6626_v44 = vmax.f32 %v6625_v26, %v6336_v42  ;;  %v4802_v13 = vmax.f32 %v3972_v37, 0.0  ;;  %v3975_v49 = vadd.f32 %v10723_v8, %v3974_v59  ;;  %v8998_v43 = vpack.i.bf16 %v785_v6, %v770_v15  ;;  %8270 = vmatmul.mubr.msk.bf16.gmra.mxu1 %vm3296_vm2, %v3228_v63  ;;  %v10885_v21 = vpop.f32.mrf.mxu0 }
 0x231   : > { %v6957_v31 = vmul.f32 %v10568_v46, %v6594_v48  ;;  %v6619_v3 = vrot.slane %v6618_v2, 1  ;;  %v4804_v18 = vmax.f32 %v3980_v24, 0.0  ;;  %v2542_v47 = vadd.f32 %v10738_v45, %v2541_v7  ;;  %v8176_v40 = vpop.f32.mrf.mxu1 }
 0x232   : > { %v6958_v36 = vmul.f32 %v10568_v46, %v6607_v22  ;;  %v6627_v10 = vmax.f32 %v6626_v44, %v6337_v60  ;;  %v3060_v12 = vmax.f32 %v2550_v57, 0.0  ;;  %v4803_v4 = vmax.f32 %v3975_v49, 0.0  ;;  %8999 = vperm.xlu1 %8382, %v8998_v43   ;;  %v2554_v22 = vpop.f32.mrf.mxu0 }
 0x233   : > { %v3057_v14 = vmax.f32 %v2539_v20, 0.0  ;;  %v4805_v39 = vmax.f32 %v3983_v53, 0.0  ;;  %v3058_v51 = vmax.f32 %v2542_v47, 0.0  ;;  %v3988_v29 = vadd.f32 %v10723_v8, %v3987_v55  ;;  %v3990_v32 = vpop.f32.mrf.mxu1 }
 0x234   : > { %v6628_v48 = vrot.slane %v6627_v10, 4  ;;  %v3059_v33 = vmax.f32 %v2547_v35, 0.0  ;;  %v6338_v54 = vmul.f32 %v8536_v17, %v4802_v13  ;;  %v6339_v46 = vmul.f32 %v8537_v62, %v4803_v4  ;;  %v8020_v60 = vpop.f32.mrf.mxu0 }
 0x235   : > { %v8556_v56 = vunpack.i.l.bf16 %v10847_v28  ;;  %v6620_v15 = vmax.f32 %v6618_v2, %v6619_v3  ;;  %v6340_v6 = vmul.f32 %v8541_v19, %v4804_v18  ;;  %v3229_v27 = vpack.c.bf16 %v3058_v51, %v3057_v14  ;;  %v8179_v20 = vpop.f32.mrf.mxu1 }
 0x236   : > { %v6629_v24 = vmax.f32 %v6627_v10, %v6628_v48  ;;  %v3230_v37 = vpack.c.bf16 %v3060_v12, %v3059_v33  ;;  %v6634_v42 = vmax.f32 %v6338_v54, %v6339_v46  ;;  %v4806_v17 = vmax.f32 %v3988_v29, 0.0  ;;  %v2557_v35 = vpop.f32.mrf.mxu0  ;;  %v10930_v12 = vld [vmem:[%s12162_s6] ss:$0 sm:$0xff] }
 0x237   : > { %v6996_v62 = vadd.f32 %v10585_v41, %v6957_v31  ;;  %v10901_v63 = vadd.f32 %v10585_v41, %v6958_v36  ;;  %v6341_v19 = vmul.f32 %v8542_v0, %v4805_v39  ;;  %8273 = vmatprep.mubr.msk.bf16.mxu1 %vm3296_vm2, %v3229_v27  ;;  %v778_v61 = vunpack.c.h.bf16 %v10812_v1  ;;  %v10912_v41 = vld [vmem:[%s12161_s5] ss:$0 sm:$0xff]  ;;  %v4003_v7 = vpop.f32.mrf.mxu1 }
 0x238   : > { %v6630_v2 = vrot.slane %v6629_v24, 2  ;;  %v6635_v26 = vmax.f32 %v6634_v42, %v6340_v6  ;;  %v793_v59 = vunpack.c.l.bf16 %v10756_v5  ;;  %8274 = vmatmul.mubr.msk.bf16.gmra.mxu1 %vm3296_vm2, %v3230_v37  ;;  %v6959_v25 = vmul.f32 %v10912_v41, %v6620_v15  ;;  %v10921_v43 = vpop.f32.mrf.mxu0 }
 0x239   : > { %v3996_v0 = vadd.f32 %v10723_v8, %v8175_v11  ;;  %v786_v53 = vunpack.c.h.bf16 %v10866_v9  ;;  %v794_v1 = vunpack.c.h.bf16 %v10756_v5  ;;  %v6342_v44 = vmul.f32 %v8546_v50, %v4806_v17  ;;  %v8180_v10 = vpop.f32.mrf.mxu1 }
 0x23a   : > { %v6631_v57 = vmax.f32 %v6629_v24, %v6630_v2  ;;  %v6636_v13 = vmax.f32 %v6635_v26, %v6341_v19  ;;  %v9003_v49 = vpack.i.bf16 %v793_v59, %v778_v61  ;;  %v3999_v3 = vadd.f32 %v10723_v8, %v8176_v40  ;;  %v2570_v36 = vpop.f32.mrf.mxu0  ;;  %v8560_v26 = vpop.permute.xlu1 %8559 }
 0x23b   : > { %v9008_v31 = vpack.i.bf16 %v794_v1, %v786_v53  ;;  %v2566_v11 = vadd.f32 %v10738_v45, %v8020_v60  ;;  %v3991_v9 = vadd.f32 %v10723_v8, %v3990_v32  ;;  %v7065_v5 = vrot.slane %v6996_v62, 4  ;;  %v4006_v54 = vpop.f32.mrf.mxu1 }
 0x23c   : > { %v6632_v18 = vrot.slane %v6631_v57, 1  ;;  %v6637_v47 = vmax.f32 %v6636_v13, %v6342_v44  ;;  %9004 = vperm.xlu0 %8371, %v9003_v49   ;;  %v2555_v50 = vadd.f32 %v10738_v45, %v2554_v22  ;;  %v6998_v4 = vadd.f32 %v10930_v12, %v6959_v25  ;;  %v8024_v33 = vpop.f32.mrf.mxu0 }
 0x23d   : > { %v4808_v55 = vmax.f32 %v3996_v0, 0.0  ;;  %v2563_v14 = vadd.f32 %v10738_v45, %v10885_v21  ;;  %9009 = vperm.xlu1 %8382, %v9008_v31   ;;  %v4807_v39 = vmax.f32 %v3991_v9, 0.0  ;;  %v7068_v51 = vrot.slane %v10901_v63, 3  ;;  %v8183_v42 = vpop.f32.mrf.mxu1 }
 0x23e   : > { %v6633_v29 = vmax.f32 %v6631_v57, %v6632_v18  ;;  %v2558_v48 = vadd.f32 %v10738_v45, %v2557_v35  ;;  %v4809_v46 = vmax.f32 %v3999_v3, 0.0  ;;  %v3064_v22 = vmax.f32 %v2566_v11, 0.0  ;;  %v2573_v37 = vpop.f32.mrf.mxu0  ;;  %v10967_v57 = vpop.permute.xlu0 %8564 }
 0x23f   : > { %v6343_v40 = vmul.f32 %v8547_v16, %v4807_v39  ;;  %v4004_v15 = vadd.f32 %v10723_v8, %v4003_v7  ;;  %v7067_v21 = vsel %vm7066_vm6, %v7065_v5, %v10730_v30  ;;  %v3061_v27 = vmax.f32 %v2555_v50, 0.0  ;;  %v4019_v2 = vpop.f32.mrf.mxu1 }
 0x240   : > { %v6960_v6 = vmul.f32 %v10912_v41, %v6633_v29  ;;  %v3062_v24 = vmax.f32 %v2558_v48, 0.0  ;;  %v7071_v17 = vrot.slane %v6998_v4, 2  ;;  %v6344_v60 = vmul.f32 %v8551_v23, %v4808_v55  ;;  %v10954_v19 = vpop.f32.mrf.mxu0 }
 0x241   : > { %v3063_v32 = vmax.f32 %v2563_v14, 0.0  ;;  %v6638_v62 = vmax.f32 %v6637_v47, %v6343_v40  ;;  %v7070_v34 = vsel %vm7069_vm7, %v7068_v51, %v7067_v21  ;;  %v4012_v30 = vadd.f32 %v10723_v8, %v8179_v20  ;;  %v8184_v52 = vpop.f32.mrf.mxu1 }
 0x242   : > { %v6999_v16 = vadd.f32 %v10930_v12, %v6960_v6  ;;  %v3231_v63 = vpack.c.bf16 %v3062_v24, %v3061_v27  ;;  %v6345_v61 = vmul.f32 %v8552_v58, %v4809_v46  ;;  %v4810_v25 = vmax.f32 %v4004_v15, 0.0  ;;  %v2586_v1 = vpop.f32.mrf.mxu0 }
 0x243   : > { %v3232_v59 = vpack.c.bf16 %v3064_v22, %v3063_v32  ;;  %v6639_v35 = vmax.f32 %v6638_v62, %v6344_v60  ;;  %v4015_v0 = vadd.f32 %v10723_v8, %v8180_v10  ;;  %v2582_v20 = vadd.f32 %v10738_v45, %v8024_v33  ;;  %v4022_v5 = vpop.f32.mrf.mxu1 }
 0x244   : > { %v7074_v23 = vrot.slane %v6999_v16, 1  ;;  %v4007_v53 = vadd.f32 %v10723_v8, %v4006_v54  ;;  %8277 = vmatprep.mubr.msk.bf16.mxu1 %vm3296_vm2, %v3231_v63  ;;  %v8561_v58 = vunpack.i.l.bf16 %v8560_v26  ;;  %v7073_v44 = vsel %vm7072_vm8, %v7071_v17, %v7070_v34  ;;  %v8028_v9 = vpop.f32.mrf.mxu0  ;;  %v8570_v17 = vpop.permute.xlu1 %8569 }
 0x245   : > { %v6640_v13 = vmax.f32 %v6639_v35, %v6345_v61  ;;  %v2571_v49 = vadd.f32 %v10738_v45, %v2570_v36  ;;  %8278 = vmatmul.mubr.msk.bf16.gmra.mxu1 %vm3296_vm2, %v3232_v59  ;;  %v4812_v31 = vmax.f32 %v4012_v30, 0.0  ;;  %v2579_v3 = vadd.f32 %v10738_v45, %v10921_v43  ;;  %v8187_v39 = vpop.f32.mrf.mxu1 }
 0x246   : > { %v7076_v7 = vsel %vm7075_vm9, %v7074_v23, %v7073_v44  ;;  %v4811_v11 = vmax.f32 %v4007_v53, 0.0  ;;  %v8562_v18 = vunpack.i.h.bf16 %v8560_v26  ;;  %v8566_v47 = vunpack.i.l.bf16 %v10967_v57  ;;  %v2589_v14 = vpop.f32.mrf.mxu0 }
 0x247   : > { %7123 = vst [vmem:[%s10961_s16] sm:$0xff] %v7076_v7  ;;  %v2574_v50 = vadd.f32 %v10738_v45, %v2573_v37  ;;  %v6346_v36 = vmul.f32 %v8556_v56, %v4810_v25  ;;  %v4813_v10 = vmax.f32 %v4015_v0, 0.0  ;;  %v3068_v4 = vmax.f32 %v2582_v20, 0.0  ;;  %v4035_v40 = vpop.f32.mrf.mxu1 }
 0x248   : > { %v6347_v55 = vmul.f32 %v8557_v38, %v4811_v11  ;;  %v6641_v43 = vrot.slane %v6640_v13, 4  ;;  %v3065_v51 = vmax.f32 %v2571_v49, 0.0  ;;  %v4020_v48 = vadd.f32 %v10723_v8, %v4019_v2  ;;  %v10983_v22 = vpop.f32.mrf.mxu0 }
 0x249   : > { %v3066_v29 = vmax.f32 %v2574_v50, 0.0  ;;  %v6348_v33 = vmul.f32 %v8561_v58, %v4812_v31  ;;  %v3067_v54 = vmax.f32 %v2579_v3, 0.0  ;;  %v6349_v21 = vmul.f32 %v8562_v18, %v4813_v10  ;;  %v8188_v24 = vpop.f32.mrf.mxu1 }
 0x24a   : > { %v6647_v46 = vmax.f32 %v6346_v36, %v6347_v55  ;;  %v4814_v56 = vmax.f32 %v4020_v48, 0.0  ;;  %v4028_v28 = vadd.f32 %v10723_v8, %v8183_v42  ;;  %v2602_v38 = vpop.f32.mrf.mxu0  ;;  %v8567_v37 = vunpack.i.h.bf16 %v10967_v57  ;;  %v8580_v48 = vpop.permute.xlu1 %8579 }
 0x24b   : > { %v3233_v15 = vpack.c.bf16 %v3066_v29, %v3065_v51  ;;  %v3234_v6 = vpack.c.bf16 %v3068_v4, %v3067_v54  ;;  %v6642_v60 = vmax.f32 %v6640_v13, %v6641_v43  ;;  %v4031_v34 = vadd.f32 %v10723_v8, %v8184_v52  ;;  %v4038_v42 = vpop.f32.mrf.mxu1 }
 0x24c   : > { %v6648_v27 = vmax.f32 %v6647_v46, %v6348_v33  ;;  %v6350_v32 = vmul.f32 %v8566_v47, %v4814_v56  ;;  %v2598_v16 = vadd.f32 %v10738_v45, %v8028_v9  ;;  %v4023_v63 = vadd.f32 %v10723_v8, %v4022_v5  ;;  %v8032_v30 = vpop.f32.mrf.mxu0 }
 0x24d   : > { %8281 = vmatprep.mubr.msk.bf16.mxu1 %vm3296_vm2, %v3233_v15  ;;  %v8571_v2 = vunpack.i.l.bf16 %v8570_v17  ;;  %v2587_v26 = vadd.f32 %v10738_v45, %v2586_v1  ;;  %v4816_v61 = vmax.f32 %v4028_v28, 0.0  ;;  %v2595_v59 = vadd.f32 %v10738_v45, %v10954_v19  ;;  %v10995_v0 = vpop.f32.mrf.mxu1  ;;  %v8575_v1 = vpop.permute.xlu0 %8574 }
 0x24e   : > { %v6649_v62 = vmax.f32 %v6648_v27, %v6349_v21  ;;  %8282 = vmatmul.mubr.msk.bf16.gmra.mxu1 %vm3296_vm2, %v3234_v6  ;;  %v4815_v25 = vmax.f32 %v4023_v63, 0.0  ;;  %v2605_v23 = vpop.f32.mrf.mxu0  ;;  %v8572_v20 = vunpack.i.h.bf16 %v8570_v17  ;;  %v2590_v53 = vadd.f32 %v10738_v45, %v2589_v14 }
 0x24f   : > { %v6643_v52 = vrot.slane %v6642_v60, 2  ;;  %v4817_v58 = vmax.f32 %v4031_v34, 0.0  ;;  %v3072_v57 = vmax.f32 %v2598_v16, 0.0  ;;  %v4051_v49 = vpop.f32.mrf.mxu1  ;;  %v3069_v7 = vmax.f32 %v2587_v26, 0.0 }
 0x250   : > { %v6650_v35 = vmax.f32 %v6649_v62, %v6350_v32  ;;  %v6351_v44 = vmul.f32 %v8567_v37, %v4815_v25  ;;  %v10998_v13 = vpop.f32.mrf.mxu0  ;;  %v3070_v31 = vmax.f32 %v2590_v53, 0.0  ;;  %v4036_v19 = vadd.f32 %v10723_v8, %v4035_v40 }
 0x251   : > { %v6352_v3 = vmul.f32 %v8571_v2, %v4816_v61  ;;  %v3071_v11 = vmax.f32 %v2595_v59, 0.0  ;;  %v11003_v18 = vpop.f32.mrf.mxu1  ;;  %v8577_v47 = vunpack.i.h.bf16 %v8575_v1  ;;  %v8576_v50 = vunpack.i.l.bf16 %v8575_v1  ;;  %v11014_v28 = vpop.permute.xlu0 %8584 }
 0x252   : > { %v6651_v9 = vmax.f32 %v6650_v35, %v6351_v44  ;;  %v11001_v5 = vpop.f32.mrf.mxu0  ;;  %v3235_v36 = vpack.c.bf16 %v3070_v31, %v3069_v7  ;;  %v4044_v10 = vadd.f32 %v10723_v8, %v8187_v39  ;;  %v6644_v4 = vmax.f32 %v6642_v60, %v6643_v52 }
 0x253   : > { %v6353_v55 = vmul.f32 %v8572_v20, %v4817_v58  ;;  %v3236_v14 = vpack.c.bf16 %v3072_v57, %v3071_v11  ;;  %v4054_v29 = vpop.f32.mrf.mxu1  ;;  %v4818_v33 = vmax.f32 %v4036_v19, 0.0  ;;  %v4047_v54 = vadd.f32 %v10723_v8, %v8188_v24 }
 0x254   : > { %v6652_v43 = vmax.f32 %v6651_v9, %v6352_v3  ;;  %v8036_v51 = vpop.f32.mrf.mxu0  ;;  %v2614_v46 = vadd.f32 %v10738_v45, %v8032_v30  ;;  %v4039_v40 = vadd.f32 %v10723_v8, %v4038_v42  ;;  %8285 = vmatprep.mubr.msk.bf16.mxu1 %vm3296_vm2, %v3235_v36  ;;  %v8582_v15 = vunpack.i.h.bf16 %v8580_v48 }
 0x255   : > { %v2603_v39 = vadd.f32 %v10738_v45, %v2602_v38  ;;  %v11012_v6 = vpop.f32.mrf.mxu1  ;;  %v8581_v27 = vunpack.i.l.bf16 %v8580_v48  ;;  %v4820_v37 = vmax.f32 %v4044_v10, 0.0  ;;  %v2611_v24 = vadd.f32 %v10738_v45, %v10983_v22  ;;  %v8590_v10 = vpop.permute.xlu1 %8589 }
 0x256   : > { %v6653_v56 = vmax.f32 %v6652_v43, %v6353_v55  ;;  %8286 = vmatmul.mubr.msk.bf16.gmra.mxu1 %vm3296_vm2, %v3236_v14  ;;  %v2621_v21 = vpop.f32.mrf.mxu0  ;;  %v4819_v17 = vmax.f32 %v4039_v40, 0.0  ;;  %v8586_v60 = vunpack.i.l.bf16 %v11014_v28  ;;  %v6645_v32 = vrot.slane %v6644_v4, 1 }
 0x257   : > { %v2606_v34 = vadd.f32 %v10738_v45, %v2605_v23  ;;  %v4067_v16 = vpop.f32.mrf.mxu1  ;;  %v6354_v63 = vmul.f32 %v8576_v50, %v4818_v33  ;;  %v4821_v30 = vmax.f32 %v4047_v54, 0.0  ;;  %v3076_v42 = vmax.f32 %v2614_v46, 0.0 }
 0x258   : > { %v6654_v62 = vrot.slane %v6653_v56, 4  ;;  %v11020_v38 = vpop.f32.mrf.mxu0  ;;  %v6355_v2 = vmul.f32 %v8577_v47, %v4819_v17  ;;  %v3073_v61 = vmax.f32 %v2603_v39, 0.0  ;;  %v4052_v35 = vadd.f32 %v10723_v8, %v4051_v49 }
 0x259   : > { %v3074_v59 = vmax.f32 %v2606_v34, 0.0  ;;  %v11025_v25 = vpop.f32.mrf.mxu1  ;;  %v6356_v20 = vmul.f32 %v8581_v27, %v4820_v37  ;;  %v3075_v53 = vmax.f32 %v2611_v24, 0.0  ;;  %v6357_v7 = vmul.f32 %v8582_v15, %v4821_v30 }
 0x25a   : > { %v6655_v26 = vmax.f32 %v6653_v56, %v6654_v62  ;;  %v11023_v22 = vpop.f32.mrf.mxu0  ;;  %v6660_v52 = vmax.f32 %v6354_v63, %v6355_v2  ;;  %v4822_v57 = vmax.f32 %v4052_v35, 0.0  ;;  %v4060_v49 = vadd.f32 %v10723_v8, %v10995_v0 }
 0x25b   : > { %v3237_v58 = vpack.c.bf16 %v3074_v59, %v3073_v61  ;;  %v11029_v1 = vpop.f32.mrf.mxu1  ;;  %v3238_v31 = vpack.c.bf16 %v3076_v42, %v3075_v53  ;;  %v8587_v3 = vunpack.i.h.bf16 %v11014_v28  ;;  %v6646_v11 = vmax.f32 %v6644_v4, %v6645_v32 }
 0x25c   : > { %v6656_v23 = vrot.slane %v6655_v26, 2  ;;  %v11027_v44 = vpop.f32.mrf.mxu0  ;;  %v6661_v19 = vmax.f32 %v6660_v52, %v6356_v20  ;;  %v6358_v47 = vmul.f32 %v8586_v60, %v4822_v57  ;;  %v4063_v14 = vadd.f32 %v10723_v8, %v11003_v18  ;;  %v8600_v52 = vpop.permute.xlu1 %8599 }
 0x25d   : > { %8289 = vmatprep.mubr.msk.bf16.mxu1 %vm3296_vm2, %v3237_v58  ;;  %v11037_v36 = vpop.f32.mrf.mxu1  ;;  %v2630_v43 = vadd.f32 %v10738_v45, %v8036_v51  ;;  %v4055_v0 = vadd.f32 %v10723_v8, %v4054_v29  ;;  %v8591_v4 = vunpack.i.l.bf16 %v8590_v10  ;;  %v2619_v33 = vadd.f32 %v10738_v45, %v11001_v5  ;;  %v8595_v5 = vpop.permute.xlu0 %8594 }
 0x25e   : > { %v6657_v9 = vmax.f32 %v6655_v26, %v6656_v23  ;;  %v11035_v50 = vpop.f32.mrf.mxu0  ;;  %v6662_v55 = vmax.f32 %v6661_v19, %v6357_v7  ;;  %8290 = vmatmul.mubr.msk.bf16.gmra.mxu1 %vm3296_vm2, %v3238_v31  ;;  %v4824_v40 = vmax.f32 %v4060_v49, 0.0  ;;  %v2627_v15 = vadd.f32 %v10738_v45, %v10998_v13  ;;  %v11061_v13 = vld [vmem:[%s12160_s4] ss:$0 sm:$0xff] }
 0x25f   : > { %v11048_v46 = vpop.f32.mrf.mxu1  ;;  %v4823_v56 = vmax.f32 %v4055_v0, 0.0  ;;  %v8592_v51 = vunpack.i.h.bf16 %v8590_v10  ;;  %v6961_v8 = vmul.f32 %v10912_v41, %v6646_v11  ;;  %v2622_v39 = vadd.f32 %v10738_v45, %v2621_v21  ;;  %v11082_v49 = vld [vmem:[%s12158_s2] ss:$0 sm:$0xff] }
 0x260   : > { %v6658_v48 = vrot.slane %v6657_v9, 1  ;;  %v11046_v54 = vpop.f32.mrf.mxu0  ;;  %v6663_v18 = vmax.f32 %v6662_v55, %v6358_v47  ;;  %v4825_v37 = vmax.f32 %v4063_v14, 0.0  ;;  %v3080_v24 = vmax.f32 %v2630_v43, 0.0 }
 0x261   : > { %v11056_v28 = vpop.f32.mrf.mxu1  ;;  %v6359_v17 = vmul.f32 %v8587_v3, %v4823_v56  ;;  %v4068_v60 = vadd.f32 %v11061_v13, %v4067_v16  ;;  %v8597_v32 = vunpack.i.h.bf16 %v8595_v5  ;;  %v3077_v34 = vmax.f32 %v2619_v33, 0.0  ;;  %v11093_v10 = vpop.permute.xlu0 %8604 }
 0x262   : > { %v6659_v29 = vmax.f32 %v6657_v9, %v6658_v48  ;;  %v11054_v27 = vpop.f32.mrf.mxu0  ;;  %v3078_v45 = vmax.f32 %v2622_v39, 0.0  ;;  %v8596_v30 = vunpack.i.l.bf16 %v8595_v5  ;;  %v6360_v42 = vmul.f32 %v8591_v4, %v4824_v40 }
 0x263   : > { %v11067_v63 = vpop.f32.mrf.mxu1  ;;  %v3079_v2 = vmax.f32 %v2627_v15, 0.0  ;;  %v6664_v26 = vmax.f32 %v6663_v18, %v6359_v17  ;;  %v7000_v61 = vadd.f32 %v10930_v12, %v6961_v8  ;;  %v4076_v16 = vadd.f32 %v11061_v13, %v11012_v6 }
 0x264   : > { %v6962_v62 = vmul.f32 %v10912_v41, %v6659_v29  ;;  %v11065_v21 = vpop.f32.mrf.mxu0  ;;  %v3239_v35 = vpack.c.bf16 %v3078_v45, %v3077_v34  ;;  %v6361_v23 = vmul.f32 %v8592_v51, %v4825_v37  ;;  %v4826_v7 = vmax.f32 %v4068_v60, 0.0 }
 0x265   : > { %v11075_v53 = vpop.f32.mrf.mxu1  ;;  %v3240_v58 = vpack.c.bf16 %v3080_v24, %v3079_v2  ;;  %v6665_v57 = vmax.f32 %v6664_v26, %v6360_v42  ;;  %v4079_v19 = vadd.f32 %v11061_v13, %v11025_v25  ;;  %v2646_v6 = vadd.f32 %v11082_v49, %v11027_v44 }
 0x266   : > { %v7001_v59 = vadd.f32 %v10930_v12, %v6962_v62  ;;  %v11073_v20 = vpop.f32.mrf.mxu0  ;;  %v4071_v3 = vadd.f32 %v11061_v13, %v11029_v1  ;;  %8293 = vmatprep.mubr.msk.bf16.mxu1 %vm3296_vm2, %v3239_v35  ;;  %v8601_v47 = vunpack.i.l.bf16 %v8600_v52  ;;  %v2635_v55 = vadd.f32 %v11082_v49, %v11023_v22  ;;  %v8610_v35 = vpop.permute.xlu1 %8609 }
 0x267   : > { %v11091_v9 = vpop.f32.mrf.mxu1  ;;  %v6666_v25 = vmax.f32 %v6665_v57, %v6361_v23  ;;  %8294 = vmatmul.mubr.msk.bf16.gmra.mxu1 %vm3296_vm2, %v3240_v58  ;;  %v4828_v14 = vmax.f32 %v4076_v16, 0.0  ;;  %v2643_v1 = vadd.f32 %v11082_v49, %v11020_v38  ;;  %v8602_v48 = vunpack.i.h.bf16 %v8600_v52 }
 0x268   : > { %v7077_v31 = vrot.slane %v7001_v59, 7  ;;  %v11089_v11 = vpop.f32.mrf.mxu0  ;;  %v4827_v43 = vmax.f32 %v4071_v3, 0.0  ;;  %v8606_v33 = vunpack.i.l.bf16 %v11093_v10  ;;  %v2638_v22 = vadd.f32 %v11082_v49, %v11035_v50 }
 0x269   : > { %v11105_v4 = vpop.f32.mrf.mxu1  ;;  %v6667_v40 = vrot.slane %v6666_v25, 4  ;;  %v6362_v15 = vmul.f32 %v8596_v30, %v4826_v7  ;;  %v4829_v18 = vmax.f32 %v4079_v19, 0.0  ;;  %v3084_v56 = vmax.f32 %v2646_v6, 0.0 }
 0x26a   : > { %v11099_v44 = vsel %vm7057_vm3, %v7077_v31, %v7000_v61  ;;  %v11103_v0 = vpop.f32.mrf.mxu0  ;;  %v6363_v51 = vmul.f32 %v8597_v32, %v4827_v43  ;;  %v3081_v39 = vmax.f32 %v2635_v55, 0.0  ;;  %v3082_v5 = vmax.f32 %v2638_v22, 0.0  ;;  %v8615_v55 = vpop.permute.xlu0 %8614 }
 0x26b   : > { %v11112_v29 = vpop.f32.mrf.mxu1  ;;  %v6668_v38 = vmax.f32 %v6666_v25, %v6667_v40  ;;  %v4084_v37 = vadd.f32 %v11061_v13, %v11048_v46  ;;  %v6364_v24 = vmul.f32 %v8601_v47, %v4828_v14  ;;  %v3083_v17 = vmax.f32 %v2643_v1, 0.0 }
 0x26c   : > { %v11110_v8 = vpop.f32.mrf.mxu0  ;;  %v6673_v60 = vmax.f32 %v6362_v15, %v6363_v51  ;;  %v3241_v45 = vpack.c.bf16 %v3082_v5, %v3081_v39  ;;  %v6365_v30 = vmul.f32 %v8602_v48, %v4829_v18  ;;  %v4092_v26 = vadd.f32 %v11061_v13, %v11037_v36 }
 0x26d   : > { %v11118_v50 = vpop.f32.mrf.mxu1  ;;  %v6669_v34 = vrot.slane %v6668_v38, 2  ;;  %v4830_v32 = vmax.f32 %v4084_v37, 0.0  ;;  %v3242_v42 = vpack.c.bf16 %v3084_v56, %v3083_v17  ;;  %v8607_v46 = vunpack.i.h.bf16 %v11093_v10  ;;  %v8620_v37 = vpop.permute.xlu1 %8619 }
 0x26e   : > { %v11116_v62 = vpop.f32.mrf.mxu0  ;;  %v6674_v2 = vmax.f32 %v6673_v60, %v6364_v24  ;;  %8297 = vmatprep.mubr.msk.bf16.mxu1 %vm3296_vm2, %v3241_v45  ;;  %v4095_v58 = vadd.f32 %v11061_v13, %v11056_v28  ;;  %v2662_v57 = vadd.f32 %v11082_v49, %v11065_v21  ;;  %v4087_v36 = vadd.f32 %v11061_v13, %v11067_v63 }
 0x26f   : > { %v11124_v59 = vpop.f32.mrf.mxu1  ;;  %v6670_v16 = vmax.f32 %v6668_v38, %v6669_v34  ;;  %v6366_v52 = vmul.f32 %v8606_v33, %v4830_v32  ;;  %8298 = vmatmul.mubr.msk.bf16.gmra.mxu1 %vm3296_vm2, %v3242_v42  ;;  %v8611_v19 = vunpack.i.l.bf16 %v8610_v35  ;;  %v2651_v3 = vadd.f32 %v11082_v49, %v11054_v27 }
 0x270   : > { %v11122_v61 = vpop.f32.mrf.mxu0  ;;  %v6675_v23 = vmax.f32 %v6674_v2, %v6365_v30  ;;  %v4832_v47 = vmax.f32 %v4092_v26, 0.0  ;;  %v2659_v28 = vadd.f32 %v11082_v49, %v11046_v54  ;;  %v4831_v21 = vmax.f32 %v4087_v36, 0.0  ;;  %v11167_v2 = vpop.permute.xlu0 %8624 }
 0x271   : > { %v11137_v31 = vpop.f32.mrf.mxu1  ;;  %v6671_v6 = vrot.slane %v6670_v16, 1  ;;  %v2654_v1 = vadd.f32 %v11082_v49, %v11073_v20  ;;  %v8612_v43 = vunpack.i.h.bf16 %v8610_v35  ;;  %v4833_v48 = vmax.f32 %v4095_v58, 0.0 }
 0x272   : > { %v11135_v7 = vpop.f32.mrf.mxu0  ;;  %v6676_v10 = vmax.f32 %v6675_v23, %v6366_v52  ;;  %v3088_v33 = vmax.f32 %v2662_v57, 0.0  ;;  %v6367_v40 = vmul.f32 %v8607_v46, %v4831_v21  ;;  %v3085_v15 = vmax.f32 %v2651_v3, 0.0  ;;  %v11193_v21 = vpop.permute.xlu1 %8629 }
 0x273   : > { %v11145_v63 = vpop.f32.mrf.mxu1  ;;  %v6672_v14 = vmax.f32 %v6670_v16, %v6671_v6  ;;  %v3086_v18 = vmax.f32 %v2654_v1, 0.0  ;;  %v4100_v56 = vadd.f32 %v11061_v13, %v11091_v9  ;;  %v6368_v51 = vmul.f32 %v8611_v19, %v4832_v47 }
 0x274   : > { %v11143_v25 = vpop.f32.mrf.mxu0  ;;  %v3087_v38 = vmax.f32 %v2659_v28, 0.0  ;;  %v6677_v39 = vmax.f32 %v6676_v10, %v6367_v40  ;;  %v6369_v60 = vmul.f32 %v8612_v43, %v4833_v48  ;;  %v4108_v32 = vadd.f32 %v11061_v13, %v11075_v53 }
 0x275   : > { %v11151_v22 = vpop.f32.mrf.mxu1  ;;  %v6963_v54 = vmul.f32 %v10912_v41, %v6672_v14  ;;  %v3243_v17 = vpack.c.bf16 %v3086_v18, %v3085_v15  ;;  %v8616_v42 = vunpack.i.l.bf16 %v8615_v55  ;;  %v4834_v46 = vmax.f32 %v4100_v56, 0.0 }
 0x276   : > { %v11149_v27 = vpop.f32.mrf.mxu0  ;;  %v3244_v34 = vpack.c.bf16 %v3088_v33, %v3087_v38  ;;  %v6678_v45 = vmax.f32 %v6677_v39, %v6368_v51  ;;  %v4111_v35 = vadd.f32 %v11061_v13, %v11105_v4  ;;  %v8617_v16 = vunpack.i.h.bf16 %v8615_v55 }
 0x277   : > { %v11158_v20 = vpop.f32.mrf.mxu1  ;;  %v7002_v24 = vadd.f32 %v10930_v12, %v6963_v54  ;;  %8301 = vmatprep.mubr.msk.bf16.mxu1 %vm3296_vm2, %v3243_v17  ;;  %v2678_v23 = vadd.f32 %v11082_v49, %v11110_v8  ;;  %v4103_v53 = vadd.f32 %v11061_v13, %v11112_v29  ;;  %v2675_v4 = vadd.f32 %v11082_v49, %v11089_v11  ;;  %v11204_v54 = vpop.permute.xlu0 %8634 }
 0x278   : > { %v11156_v5 = vpop.f32.mrf.mxu0  ;;  %v6679_v52 = vmax.f32 %v6678_v45, %v6369_v60  ;;  %8302 = vmatmul.mubr.msk.bf16.gmra.mxu1 %vm3296_vm2, %v3244_v34  ;;  %v2667_v19 = vadd.f32 %v11082_v49, %v11103_v0  ;;  %v8621_v8 = vunpack.i.l.bf16 %v8620_v37  ;;  %v4836_v3 = vmax.f32 %v4108_v32, 0.0 }
 0x279   : > { %v11165_v9 = vpop.f32.mrf.mxu1  ;;  %v7079_v26 = vrot.slane %v7002_v24, 6  ;;  %v4835_v29 = vmax.f32 %v4103_v53, 0.0  ;;  %v8622_v10 = vunpack.i.h.bf16 %v8620_v37  ;;  %v6370_v55 = vmul.f32 %v8616_v42, %v4834_v46 }
 0x27a   : > { %v11163_v30 = vpop.f32.mrf.mxu0  ;;  %v6680_v6 = vrot.slane %v6679_v52, 4  ;;  %v2670_v14 = vadd.f32 %v11082_v49, %v11116_v62  ;;  %v3092_v1 = vmax.f32 %v2678_v23, 0.0  ;;  %v4116_v0 = vadd.f32 %v11061_v13, %v11124_v59 }
 0x27b   : > { %v11179_v57 = vpop.f32.mrf.mxu1  ;;  %v11183_v36 = vsel %vm7060_vm4, %v7079_v26, %v11099_v44  ;;  %v4837_v44 = vmax.f32 %v4111_v35, 0.0  ;;  %v6371_v43 = vmul.f32 %v8617_v16, %v4835_v29  ;;  %v8626_v40 = vunpack.i.l.bf16 %v11167_v2  ;;  %v11217_v35 = vpop.permute.xlu1 %8639 }
 0x27c   : > { %v11177_v58 = vpop.f32.mrf.mxu0  ;;  %v6681_v11 = vmax.f32 %v6679_v52, %v6680_v6  ;;  %v3091_v15 = vmax.f32 %v2675_v4, 0.0  ;;  %v3089_v18 = vmax.f32 %v2667_v19, 0.0  ;;  %v3090_v56 = vmax.f32 %v2670_v14, 0.0 }
 0x27d   : > { %v11191_v28 = vpop.f32.mrf.mxu1  ;;  %v6372_v38 = vmul.f32 %v8621_v8, %v4836_v3  ;;  %v6686_v62 = vmax.f32 %v6370_v55, %v6371_v43  ;;  %v4838_v39 = vmax.f32 %v4116_v0, 0.0  ;;  %v4124_v17 = vadd.f32 %v11061_v13, %v11118_v50 }
 0x27e   : > { %v11189_v47 = vpop.f32.mrf.mxu0  ;;  %v6682_v51 = vrot.slane %v6681_v11, 2  ;;  %v3245_v59 = vpack.c.bf16 %v3090_v56, %v3089_v18  ;;  %v6373_v34 = vmul.f32 %v8622_v10, %v4837_v44  ;;  %v3246_v45 = vpack.c.bf16 %v3092_v1, %v3091_v15 }
 0x27f   : > { %v11201_v33 = vpop.f32.mrf.mxu1  ;;  %v6687_v32 = vmax.f32 %v6686_v62, %v6372_v38  ;;  %v8627_v46 = vunpack.i.h.bf16 %v11167_v2  ;;  %v4127_v16 = vadd.f32 %v11061_v13, %v11137_v31  ;;  %v2694_v52 = vadd.f32 %v11082_v49, %v11143_v25  ;;  %v11234_v25 = vpop.permute.xlu0 %8644 }
 0x280   : > { %v11199_v48 = vpop.f32.mrf.mxu0  ;;  %v6683_v60 = vmax.f32 %v6681_v11, %v6682_v51  ;;  %v4119_v50 = vadd.f32 %v11061_v13, %v11145_v63  ;;  %8305 = vmatprep.mubr.msk.bf16.mxu1 %vm3296_vm2, %v3245_v59  ;;  %v6374_v53 = vmul.f32 %v8626_v40, %v4838_v39  ;;  %v2683_v19 = vadd.f32 %v11082_v49, %v11135_v7 }
 0x281   : > { %v11208_v24 = vpop.f32.mrf.mxu1  ;;  %v6688_v4 = vmax.f32 %v6687_v32, %v6373_v34  ;;  %8306 = vmatmul.mubr.msk.bf16.gmra.mxu1 %vm3296_vm2, %v3246_v45  ;;  %v8631_v31 = vunpack.i.l.bf16 %v11193_v21  ;;  %v4840_v6 = vmax.f32 %v4124_v17, 0.0  ;;  %v2691_v63 = vadd.f32 %v11082_v49, %v11122_v61 }
 0x282   : > { %v11206_v37 = vpop.f32.mrf.mxu0  ;;  %v6684_v23 = vrot.slane %v6683_v60, 1  ;;  %v4839_v3 = vmax.f32 %v4119_v50, 0.0  ;;  %v2686_v7 = vadd.f32 %v11082_v49, %v11149_v27  ;;  %v8632_v14 = vunpack.i.h.bf16 %v11193_v21  ;;  %v11252_v27 = vpop.permute.xlu1 %8649 }
 0x283   : > { %v11214_v26 = vpop.f32.mrf.mxu1  ;;  %v6689_v10 = vmax.f32 %v6688_v4, %v6374_v53  ;;  %v4841_v11 = vmax.f32 %v4127_v16, 0.0  ;;  %v3096_v1 = vmax.f32 %v2694_v52, 0.0  ;;  %v3093_v40 = vmax.f32 %v2683_v19, 0.0  ;;  %v11259_v17 = vpop.permute.xlu0 %8654 }
 0x284   : > { %v11212_v42 = vpop.f32.mrf.mxu0  ;;  %v6685_v29 = vmax.f32 %v6683_v60, %v6684_v23  ;;  %v6375_v43 = vmul.f32 %v8627_v46, %v4839_v3  ;;  %v3094_v15 = vmax.f32 %v2686_v7, 0.0  ;;  %v4132_v61 = vadd.f32 %v11061_v13, %v11158_v20 }
 0x285   : > { %v11231_v8 = vpop.f32.mrf.mxu1  ;;  %v6376_v51 = vmul.f32 %v8631_v31, %v4840_v6  ;;  %v3095_v38 = vmax.f32 %v2691_v63, 0.0  ;;  %v6377_v60 = vmul.f32 %v8632_v14, %v4841_v11  ;;  %v4140_v45 = vadd.f32 %v11061_v13, %v11151_v22 }
 0x286   : > { %v11229_v2 = vpop.f32.mrf.mxu0  ;;  %v6964_v0 = vmul.f32 %v10912_v41, %v6685_v29  ;;  %v6690_v62 = vmax.f32 %v6689_v10, %v6375_v43  ;;  %v3247_v39 = vpack.c.bf16 %v3094_v15, %v3093_v40  ;;  %v8637_v32 = vunpack.i.h.bf16 %v11204_v54  ;;  %v11288_v63 = vpop.permute.xlu1 %8659 }
 0x287   : > { %v11242_v44 = vpop.f32.mrf.mxu1  ;;  %v3248_v20 = vpack.c.bf16 %v3096_v1, %v3095_v38  ;;  %v8636_v46 = vunpack.i.l.bf16 %v11204_v54  ;;  %v4842_v52 = vmax.f32 %v4132_v61, 0.0  ;;  %v4143_v53 = vadd.f32 %v11061_v13, %v11165_v9  ;;  %v11299_v11 = vpop.permute.xlu0 %8664 }
 0x288   : > { %v11240_v55 = vpop.f32.mrf.mxu0  ;;  %v7003_v21 = vadd.f32 %v10930_v12, %v6964_v0  ;;  %v6691_v34 = vmax.f32 %v6690_v62, %v6376_v51  ;;  %8309 = vmatprep.mubr.msk.bf16.mxu1 %vm3296_vm2, %v3247_v39  ;;  %v2710_v4 = vadd.f32 %v11082_v49, %v11177_v58  ;;  %v4135_v22 = vadd.f32 %v11061_v13, %v11179_v57 }
 0x289   : > { %v11250_v56 = vpop.f32.mrf.mxu1  ;;  %8310 = vmatmul.mubr.msk.bf16.gmra.mxu1 %vm3296_vm2, %v3248_v20  ;;  %v8641_v54 = vunpack.i.l.bf16 %v11217_v35  ;;  %v2699_v31 = vadd.f32 %v11082_v49, %v11163_v30  ;;  %v4844_v3 = vmax.f32 %v4140_v45, 0.0  ;;  %v2707_v57 = vadd.f32 %v11082_v49, %v11156_v5 }
 0x28a   : > { %v11248_v18 = vpop.f32.mrf.mxu0  ;;  %v7081_v16 = vrot.slane %v7003_v21, 5  ;;  %v6692_v23 = vmax.f32 %v6691_v34, %v6377_v60  ;;  %v4843_v29 = vmax.f32 %v4135_v22, 0.0  ;;  %v8642_v10 = vunpack.i.h.bf16 %v11217_v35 }
 0x28b   : > { %v11257_v41 = vpop.f32.mrf.mxu1  ;;  %v6378_v7 = vmul.f32 %v8636_v46, %v4842_v52  ;;  %v4845_v43 = vmax.f32 %v4143_v53, 0.0  ;;  %v3100_v0 = vmax.f32 %v2710_v4, 0.0  ;;  %v8646_v15 = vunpack.i.l.bf16 %v11234_v25  ;;  %v11314_v46 = vpop.permute.xlu1 %8669 }
 0x28c   : > { %v11255_v59 = vpop.f32.mrf.mxu0  ;;  %v11280_v19 = vsel %vm7063_vm5, %v7081_v16, %v11183_v36  ;;  %v6693_v58 = vrot.slane %v6692_v23, 4  ;;  %v2702_v36 = vadd.f32 %v11082_v49, %v11189_v47  ;;  %v6379_v40 = vmul.f32 %v8637_v32, %v4843_v29 }
 0x28d   : > { %v11268_v50 = vpop.f32.mrf.mxu1  ;;  %v3097_v5 = vmax.f32 %v2699_v31, 0.0  ;;  %v4148_v35 = vadd.f32 %v11061_v13, %v11201_v33  ;;  %v6380_v62 = vmul.f32 %v8641_v54, %v4844_v3  ;;  %v3099_v21 = vmax.f32 %v2707_v57, 0.0  ;;  %v11326_v31 = vpop.permute.xlu0 %8674 }
 0x28e   : > { %v11266_v12 = vpop.f32.mrf.mxu0  ;;  %v6694_v1 = vmax.f32 %v6692_v23, %v6693_v58  ;;  %v3098_v61 = vmax.f32 %v2702_v36, 0.0  ;;  %v6699_v39 = vmax.f32 %v6378_v7, %v6379_v40  ;;  %v4156_v20 = vadd.f32 %v11061_v13, %v11191_v28 }
 0x28f   : > { %v11286_v9 = vpop.f32.mrf.mxu1  ;;  %v4846_v34 = vmax.f32 %v4148_v35, 0.0  ;;  %v6381_v16 = vmul.f32 %v8642_v10, %v4845_v43  ;;  %v3250_v52 = vpack.c.bf16 %v3100_v0, %v3099_v21  ;;  %v8647_v53 = vunpack.i.h.bf16 %v11234_v25 }
 0x290   : > { %v11284_v6 = vpop.f32.mrf.mxu0  ;;  %v6695_v38 = vrot.slane %v6694_v1, 2  ;;  %v3249_v60 = vpack.c.bf16 %v3098_v61, %v3097_v5  ;;  %v6700_v23 = vmax.f32 %v6699_v39, %v6380_v62  ;;  %v4159_v4 = vadd.f32 %v11061_v13, %v11208_v24  ;;  %v11349_v62 = vpop.permute.xlu1 %8679 }
 0x291   : > { %v11297_v30 = vpop.f32.mrf.mxu1  ;;  %v4151_v22 = vadd.f32 %v11061_v13, %v11214_v26  ;;  %v6382_v3 = vmul.f32 %v8646_v15, %v4846_v34  ;;  %v2726_v25 = vadd.f32 %v11082_v49, %v11212_v42  ;;  %v8651_v24 = vunpack.i.l.bf16 %v11252_v27 }
 0x292   : > { %v11295_v14 = vpop.f32.mrf.mxu0  ;;  %v6696_v33 = vmax.f32 %v6694_v1, %v6695_v38  ;;  %8313 = vmatprep.mubr.msk.bf16.mxu1 %vm3296_vm2, %v3249_v60  ;;  %v6701_v57 = vmax.f32 %v6700_v23, %v6381_v16  ;;  %v4848_v29 = vmax.f32 %v4156_v20, 0.0  ;;  %v2715_v26 = vadd.f32 %v11082_v49, %v11206_v37  ;;  %v11365_v23 = vpop.permute.xlu0 %8684 }
 0x293   : > { %v11306_v47 = vpop.f32.mrf.mxu1  ;;  %8314 = vmatmul.mubr.msk.bf16.gmra.mxu1 %vm3296_vm2, %v3250_v52  ;;  %v4847_v10 = vmax.f32 %v4151_v22, 0.0  ;;  %v8652_v1 = vunpack.i.h.bf16 %v11252_v27  ;;  %v2723_v0 = vadd.f32 %v11082_v49, %v11199_v48  ;;  %v8657_v40 = vunpack.i.h.bf16 %v11259_v17  ;;  %v11354_v48 = vld [vmem:[%s12161_s5] ss:$0 sm:$0xff] }
 0x294   : > { %v11304_v51 = vpop.f32.mrf.mxu0  ;;  %v6697_v58 = vrot.slane %v6696_v33, 1  ;;  %v6702_v42 = vmax.f32 %v6701_v57, %v6382_v3  ;;  %v4849_v15 = vmax.f32 %v4159_v4, 0.0  ;;  %v2718_v61 = vadd.f32 %v11082_v49, %v11229_v2 }
 0x295   : > { %v11312_v32 = vpop.f32.mrf.mxu1  ;;  %v6383_v5 = vmul.f32 %v8647_v53, %v4847_v10  ;;  %v8656_v38 = vunpack.i.l.bf16 %v11259_v17  ;;  %v3104_v21 = vmax.f32 %v2726_v25, 0.0  ;;  %v4164_v39 = vadd.f32 %v11061_v13, %v11242_v44  ;;  %v11370_v53 = vld [vmem:[%s12162_s6] ss:$0 sm:$0xff] }
 0x296   : > { %v11310_v45 = vpop.f32.mrf.mxu0  ;;  %v6698_v43 = vmax.f32 %v6696_v33, %v6697_v58  ;;  %v6384_v2 = vmul.f32 %v8651_v24, %v4848_v29  ;;  %v3101_v60 = vmax.f32 %v2715_v26, 0.0  ;;  %v3102_v34 = vmax.f32 %v2718_v61, 0.0 }
 0x297   : > { %v11324_v54 = vpop.f32.mrf.mxu1  ;;  %v6703_v20 = vmax.f32 %v6702_v42, %v6383_v5  ;;  %v8662_v16 = vunpack.i.h.bf16 %v11288_v63  ;;  %v8661_v52 = vunpack.i.l.bf16 %v11288_v63  ;;  %v3103_v4 = vmax.f32 %v2723_v0, 0.0 }
 0x298   : > { %v11322_v28 = vpop.f32.mrf.mxu0  ;;  %v6965_v27 = vmul.f32 %v11354_v48, %v6698_v43  ;;  %v6385_v22 = vmul.f32 %v8652_v1, %v4849_v15  ;;  %v3251_v3 = vpack.c.bf16 %v3102_v34, %v3101_v60  ;;  %v4172_v57 = vadd.f32 %v11061_v13, %v11231_v8 }
 0x299   : > { %v11336_v36 = vpop.f32.mrf.mxu1  ;;  %v6704_v58 = vmax.f32 %v6703_v20, %v6384_v2  ;;  %v3252_v26 = vpack.c.bf16 %v3104_v21, %v3103_v4  ;;  %v4850_v10 = vmax.f32 %v4164_v39, 0.0  ;;  %v4175_v42 = vadd.f32 %v11061_v13, %v11250_v56  ;;  %v11411_v4 = vpop.permute.xlu0 %8694 }
 0x29a   : > { %v11334_v7 = vpop.f32.mrf.mxu0  ;;  %v7004_v44 = vadd.f32 %v11370_v53, %v6965_v27  ;;  %v2742_v1 = vadd.f32 %v11082_v49, %v11255_v59  ;;  %v4167_v0 = vadd.f32 %v11061_v13, %v11257_v41  ;;  %8317 = vmatprep.mubr.msk.bf16.mxu1 %vm3296_vm2, %v3251_v3  ;;  %v8666_v5 = vunpack.i.l.bf16 %v11299_v11  ;;  %v11393_v27 = vpop.permute.xlu1 %8689 }
 0x29b   : > { %v11346_v35 = vpop.f32.mrf.mxu1  ;;  %v6705_v43 = vmax.f32 %v6704_v58, %v6385_v22  ;;  %v2731_v59 = vadd.f32 %v11082_v49, %v11248_v18  ;;  %8318 = vmatmul.mubr.msk.bf16.gmra.mxu1 %vm3296_vm2, %v3252_v26  ;;  %v4852_v21 = vmax.f32 %v4172_v57, 0.0  ;;  %v2739_v39 = vadd.f32 %v11082_v49, %v11240_v55 }
 0x29c   : > { %v11344_v37 = vpop.f32.mrf.mxu0  ;;  %v7083_v29 = vrot.slane %v7004_v44, 4  ;;  %v4851_v2 = vmax.f32 %v4167_v0, 0.0  ;;  %v2734_v18 = vadd.f32 %v11082_v49, %v11266_v12  ;;  %v6386_v22 = vmul.f32 %v8656_v38, %v4850_v10 }
 0x29d   : > { %v11361_v17 = vpop.f32.mrf.mxu1  ;;  %v6706_v41 = vrot.slane %v6705_v43, 4  ;;  %v4853_v58 = vmax.f32 %v4175_v42, 0.0  ;;  %v3108_v3 = vmax.f32 %v2742_v1, 0.0  ;;  %v3105_v0 = vmax.f32 %v2731_v59, 0.0 }
 0x29e   : > { %v11359_v33 = vpop.f32.mrf.mxu0  ;;  %v11397_v56 = vsel %vm7066_vm6, %v7083_v29, %v11280_v19  ;;  %v6387_v55 = vmul.f32 %v8657_v40, %v4851_v2  ;;  %v3106_v61 = vmax.f32 %v2734_v18, 0.0  ;;  %v4180_v19 = vadd.f32 %v11061_v13, %v11286_v9  ;;  %v11428_v42 = vpop.permute.xlu1 %8699 }
 0x29f   : > { %v11377_v24 = vpop.f32.mrf.mxu1  ;;  %12264 = vst [vmem:[#allocation11_spill] sm:$0xff] %v11397_v56  ;;  %v6707_v26 = vmax.f32 %v6705_v43, %v6706_v41  ;;  %v6388_v34 = vmul.f32 %v8661_v52, %v4852_v21  ;;  %v3107_v63 = vmax.f32 %v2739_v39, 0.0  ;;  %v6389_v59 = vmul.f32 %v8662_v16, %v4853_v58 }
 0x2a0   : > { %v11375_v25 = vpop.f32.mrf.mxu0  ;;  %v6712_v56 = vmax.f32 %v6386_v22, %v6387_v55  ;;  %v3253_v43 = vpack.c.bf16 %v3106_v61, %v3105_v0  ;;  %v4854_v1 = vmax.f32 %v4180_v19, 0.0  ;;  %v4188_v52 = vadd.f32 %v11061_v13, %v11268_v50  ;;  %v11438_v22 = vpop.permute.xlu0 %8704 }
 0x2a1   : > { %v11389_v15 = vpop.f32.mrf.mxu1  ;;  %v3254_v41 = vpack.c.bf16 %v3108_v3, %v3107_v63  ;;  %v6708_v55 = vrot.slane %v6707_v26, 2  ;;  %v4191_v63 = vadd.f32 %v11061_v13, %v11297_v30  ;;  %v2758_v50 = vadd.f32 %v11082_v49, %v11304_v51 }
 0x2a2   : > { %v11387_v8 = vpop.f32.mrf.mxu0  ;;  %v6713_v9 = vmax.f32 %v6712_v56, %v6388_v34  ;;  %v6390_v10 = vmul.f32 %v8666_v5, %v4854_v1  ;;  %8321 = vmatprep.mubr.msk.bf16.mxu1 %vm3296_vm2, %v3253_v43  ;;  %v4183_v61 = vadd.f32 %v11061_v13, %v11306_v47  ;;  %v2747_v30 = vadd.f32 %v11082_v49, %v11295_v14  ;;  %v11466_v19 = vpop.permute.xlu1 %8709 }
 0x2a3   : > { %v11406_v20 = vpop.f32.mrf.mxu1  ;;  %8322 = vmatmul.mubr.msk.bf16.gmra.mxu1 %vm3296_vm2, %v3254_v41  ;;  %v4856_v3 = vmax.f32 %v4188_v52, 0.0  ;;  %v2755_v51 = vadd.f32 %v11082_v49, %v11284_v6  ;;  %v2750_v14 = vadd.f32 %v11082_v49, %v11310_v45  ;;  %v6709_v52 = vmax.f32 %v6707_v26, %v6708_v55 }
 0x2a4   : > { %v11404_v60 = vpop.f32.mrf.mxu0  ;;  %v6714_v16 = vmax.f32 %v6713_v9, %v6389_v59  ;;  %v4855_v0 = vmax.f32 %v4183_v61, 0.0  ;;  %v4857_v58 = vmax.f32 %v4191_v63, 0.0  ;;  %v3112_v6 = vmax.f32 %v2758_v50, 0.0  ;;  %v11477_v41 = vpop.permute.xlu0 %8714 }
 0x2a5   : > { %v11417_v29 = vpop.f32.mrf.mxu1  ;;  %12266 = vst [vmem:[#allocation9_spill] sm:$0xff] %v11477_v41  ;;  %v3109_v9 = vmax.f32 %v2747_v30, 0.0  ;;  %v3110_v5 = vmax.f32 %v2750_v14, 0.0  ;;  %v4196_v2 = vadd.f32 %v11061_v13, %v11324_v54  ;;  %v12267_v26 = vunpack.i.l.bf16 %v11314_v46 }
 0x2a6   : > { %v11415_v57 = vpop.f32.mrf.mxu0  ;;  %v6715_v47 = vmax.f32 %v6714_v16, %v6390_v10  ;;  %v12265_v10 = vunpack.i.h.bf16 %v11299_v11  ;;  %v3111_v11 = vmax.f32 %v2755_v51, 0.0  ;;  %v4204_v14 = vadd.f32 %v11061_v13, %v11312_v32 }
 0x2a7   : > { %v11424_v38 = vpop.f32.mrf.mxu1  ;;  %v6392_v55 = vmul.f32 %v12267_v26, %v4856_v3  ;;  %v3255_v30 = vpack.c.bf16 %v3110_v5, %v3109_v9  ;;  %v6710_v54 = vrot.slane %v6709_v52, 1  ;;  %v12268_v45 = vunpack.i.h.bf16 %v11314_v46 }
 0x2a8   : > { %v11422_v12 = vpop.f32.mrf.mxu0  ;;  %v6391_v16 = vmul.f32 %v12265_v10, %v4855_v0  ;;  %v3256_v40 = vpack.c.bf16 %v3112_v6, %v3111_v11  ;;  %v4858_v26 = vmax.f32 %v4196_v2, 0.0  ;;  %v4207_v59 = vadd.f32 %v11061_v13, %v11336_v36 }
 0x2a9   : > { %v11434_v39 = vpop.f32.mrf.mxu1  ;;  %v6393_v44 = vmul.f32 %v12268_v45, %v4857_v58  ;;  %v2774_v5 = vadd.f32 %v11082_v49, %v11344_v37  ;;  %v4199_v32 = vadd.f32 %v11061_v13, %v11346_v35  ;;  %8325 = vmatprep.mubr.msk.bf16.mxu1 %vm3296_vm2, %v3255_v30  ;;  %v2763_v6 = vadd.f32 %v11082_v49, %v11334_v7  ;;  %v11515_v37 = vpop.permute.xlu0 %8724 }
 0x2aa   : > { %v11432_v21 = vpop.f32.mrf.mxu0  ;;  %v6716_v63 = vmax.f32 %v6715_v47, %v6391_v16  ;;  %v11498_v16 = vpop.permute.xlu1 %8719  ;;  %12270 = vst [vmem:[#allocation2_spill] sm:$0xff] %v11515_v37  ;;  %v4860_v45 = vmax.f32 %v4204_v14, 0.0  ;;  %v2771_v35 = vadd.f32 %v11082_v49, %v11322_v28  ;;  %v2766_v7 = vadd.f32 %v11082_v49, %v11359_v33 }
 0x2ab   : > { %v11450_v34 = vpop.f32.mrf.mxu1  ;;  %12269 = vst [vmem:[#allocation3_spill] sm:$0xff] %v11498_v16  ;;  %8326 = vmatmul.mubr.msk.bf16.gmra.mxu1 %vm3296_vm2, %v3256_v40  ;;  %v4861_v36 = vmax.f32 %v4207_v59, 0.0  ;;  %v3116_v14 = vmax.f32 %v2774_v5, 0.0  ;;  %v12272_v46 = vunpack.i.h.bf16 %v11326_v31  ;;  %v3113_v16 = vmax.f32 %v2763_v6, 0.0 }
 0x2ac   : > { %v11448_v56 = vpop.f32.mrf.mxu0  ;;  %v6717_v3 = vmax.f32 %v6716_v63, %v6392_v55  ;;  %v4859_v55 = vmax.f32 %v4199_v32, 0.0  ;;  %v6711_v63 = vmax.f32 %v6709_v52, %v6710_v54  ;;  %v4212_v52 = vadd.f32 %v11061_v13, %v11377_v24 }
 0x2ad   : > { %v11461_v1 = vpop.f32.mrf.mxu1  ;;  %v12274_v59 = vunpack.i.l.bf16 %v11349_v62  ;;  %v3115_v5 = vmax.f32 %v2771_v35, 0.0  ;;  %v11546_v24 = vpop.permute.xlu0 %8734 }
 0x2ae   : > { %v11459_v43 = vpop.f32.mrf.mxu0  ;;  %v6718_v9 = vmax.f32 %v6717_v3, %v6393_v44  ;;  %v12271_v3 = vunpack.i.l.bf16 %v11326_v31  ;;  %v6395_v28 = vmul.f32 %v12272_v46, %v4859_v55  ;;  %v3114_v44 = vmax.f32 %v2766_v7, 0.0  ;;  %v11537_v41 = vpop.permute.xlu1 %8729  ;;  %12275 = vst [vmem:[#allocation7_spill] sm:$0xff] %v11546_v24 }
 0x2af   : > { %v11474_v18 = vpop.f32.mrf.mxu1  ;;  %v3258_v37 = vpack.c.bf16 %v3116_v14, %v3115_v5  ;;  %v2779_v5 = vadd.f32 %v11082_v49, %v11387_v8  ;;  %v12281_v8 = vunpack.i.h.bf16 %v11393_v27 }
 0x2b0   : > { %v11472_v61 = vpop.f32.mrf.mxu0  ;;  %v6719_v30 = vrot.slane %v6718_v9, 4  ;;  %v6394_v58 = vmul.f32 %v12271_v3, %v4858_v26  ;;  %v6396_v26 = vmul.f32 %v12274_v59, %v4860_v45  ;;  %v3257_v55 = vpack.c.bf16 %v3114_v44, %v3113_v16 }
 0x2b1   : > { %v11486_v0 = vpop.f32.mrf.mxu1  ;;  %v12276_v3 = vunpack.i.h.bf16 %v11349_v62  ;;  %v4220_v45 = vadd.f32 %v11061_v13, %v11361_v17  ;;  %v4223_v44 = vadd.f32 %v11061_v13, %v11389_v15  ;;  %v12277_v62 = vunpack.i.l.bf16 %v11365_v23  ;;  %v11586_v15 = vpop.permute.xlu0 %8744 }
 0x2b2   : > { %v11484_v50 = vpop.f32.mrf.mxu0  ;;  %v6720_v10 = vmax.f32 %v6718_v9, %v6719_v30  ;;  %v6725_v31 = vmax.f32 %v6394_v58, %v6395_v28  ;;  %v4862_v30 = vmax.f32 %v4212_v52, 0.0  ;;  %v6966_v28 = vmul.f32 %v11354_v48, %v6711_v63  ;;  %8329 = vmatprep.mubr.msk.bf16.mxu1 %vm3296_vm2, %v3257_v55 }
 0x2b3   : > { %v11496_v47 = vpop.f32.mrf.mxu1  ;;  %v6397_v33 = vmul.f32 %v12276_v3, %v4861_v36  ;;  %v2790_v17 = vadd.f32 %v11082_v49, %v11404_v60  ;;  %v4215_v59 = vadd.f32 %v11061_v13, %v11406_v20  ;;  %8330 = vmatmul.mubr.msk.bf16.gmra.mxu1 %vm3296_vm2, %v3258_v37  ;;  %v2787_v60 = vadd.f32 %v11082_v49, %v11375_v25  ;;  %v11580_v37 = vpop.permute.xlu1 %8739 }
 0x2b4   : > { %v11494_v51 = vpop.f32.mrf.mxu0  ;;  %v6721_v6 = vrot.slane %v6720_v10, 2  ;;  %v6398_v36 = vmul.f32 %v12277_v62, %v4862_v30  ;;  %12278 = vst [vmem:[#allocation5_spill] sm:$0xff] %v11580_v37  ;;  %v7005_v55 = vadd.f32 %v11370_v53, %v6966_v28  ;;  %v4865_v3 = vmax.f32 %v4223_v44, 0.0 }
 0x2b5   : > { %v11519_v11 = vpop.f32.mrf.mxu1  ;;  %v4863_v20 = vmax.f32 %v4215_v59, 0.0  ;;  %v2782_v62 = vadd.f32 %v11082_v49, %v11415_v57  ;;  %v12279_v25 = vunpack.i.h.bf16 %v11365_v23  ;;  %v11598_v57 = vld [vmem:[%s12160_s4] ss:$0 sm:$0xff]  ;;  %v2803_v23 = vadd.f32 %v11082_v49, %v11422_v12 }
 0x2b6   : > { %v11512_v2 = vpop.f32.mrf.mxu0  ;;  %v6722_v16 = vmax.f32 %v6720_v10, %v6721_v6  ;;  %v6401_v63 = vmul.f32 %v12281_v8, %v4865_v3  ;;  %v11626_v8 = vpop.permute.xlu0 %8754  ;;  %v11631_v12 = vld [vmem:[%s12158_s2] ss:$0 sm:$0xff] }
 0x2b7   : > { %v11530_v32 = vpop.f32.mrf.mxu1  ;;  %v3118_v44 = vmax.f32 %v2782_v62, 0.0  ;;  %v7085_v62 = vrot.slane %v7005_v55, 3 }
 0x2b8   : > { %v11524_v40 = vpop.f32.mrf.mxu0 }
 0x2b9   : > { %v11541_v46 = vpop.f32.mrf.mxu1 }
 0x2ba   : > { %v11534_v54 = vpop.f32.mrf.mxu0 }
 0x2bb   : > { %12273 = vst [vmem:[#allocation4_spill] sm:$0xff] %v11534_v54  ;;  %v6726_v54 = vmax.f32 %v6725_v31, %v6396_v26  ;;  %v11552_v58 = vpop.f32.mrf.mxu1  ;;  %v6723_v26 = vrot.slane %v6722_v16, 1 }
 0x2bc   : > { %v11544_v7 = vpop.f32.mrf.mxu0 }
 0x2bd   : > { %v6727_v14 = vmax.f32 %v6726_v54, %v6397_v33  ;;  %v11568_v10 = vpop.f32.mrf.mxu1  ;;  %v4864_v54 = vmax.f32 %v4220_v45, 0.0  ;;  %v6724_v30 = vmax.f32 %v6722_v16, %v6723_v26  ;;  %v3120_v45 = vmax.f32 %v2790_v17, 0.0 }
 0x2be   : > { %v11559_v52 = vpop.f32.mrf.mxu0  ;;  %v3117_v16 = vmax.f32 %v2779_v5, 0.0  ;;  %v4228_v17 = vadd.f32 %v11598_v57, %v11424_v38 }
 0x2bf   : > { %v6728_v33 = vmax.f32 %v6727_v14, %v6398_v36  ;;  %v11578_v6 = vpop.f32.mrf.mxu1  ;;  %v6399_v36 = vmul.f32 %v12279_v25, %v4863_v20  ;;  %v4236_v14 = vadd.f32 %v11061_v13, %v11417_v29  ;;  %v6967_v28 = vmul.f32 %v11354_v48, %v6724_v30 }
 0x2c0   : > { %v11574_v31 = vpop.f32.mrf.mxu0  ;;  %v12280_v13 = vunpack.i.l.bf16 %v11393_v27  ;;  %v3119_v20 = vmax.f32 %v2787_v60, 0.0  ;;  %v3259_v9 = vpack.c.bf16 %v3118_v44, %v3117_v16  ;;  %v11617_v60 = vpop.permute.xlu1 %8749  ;;  %v4239_v27 = vadd.f32 %v11598_v57, %v11434_v39 }
 0x2c1   : > { %v11592_v59 = vpop.f32.mrf.mxu1  ;;  %v6729_v25 = vmax.f32 %v6728_v33, %v6399_v36  ;;  %v4868_v24 = vmax.f32 %v4236_v14, 0.0  ;;  %v7006_v33 = vadd.f32 %v11370_v53, %v6967_v28  ;;  %v4866_v36 = vmax.f32 %v4228_v17, 0.0 }
 0x2c2   : > { %v11602_v26 = vpop.f32.mrf.mxu0  ;;  %v6400_v29 = vmul.f32 %v12280_v13, %v4864_v54  ;;  %v3260_v35 = vpack.c.bf16 %v3120_v45, %v3119_v20  ;;  %v8746_v54 = vunpack.i.l.bf16 %v11586_v15  ;;  %8333 = vmatprep.mubr.msk.bf16.mxu1 %vm3296_vm2, %v3259_v9  ;;  %v2806_v45 = vadd.f32 %v11631_v12, %v11448_v56 }
 0x2c3   : > { %v11607_v30 = vpop.f32.mrf.mxu1  ;;  %v4231_v39 = vadd.f32 %v11598_v57, %v11450_v34  ;;  %v2795_v44 = vadd.f32 %v11631_v12, %v11432_v21  ;;  %v12283_v56 = vunpack.i.l.bf16 %v11428_v42  ;;  %v4869_v3 = vmax.f32 %v4239_v27, 0.0 }
 0x2c4   : > { %v6730_v38 = vmax.f32 %v6729_v25, %v6400_v29  ;;  %v11623_v55 = vpop.f32.mrf.mxu0  ;;  %8334 = vmatmul.mubr.msk.bf16.gmra.mxu1 %vm3296_vm2, %v3260_v35  ;;  %v3123_v29 = vmax.f32 %v2803_v23, 0.0  ;;  %v7087_v35 = vrot.slane %v7006_v33, 2  ;;  %v12284_v25 = vunpack.i.l.bf16 %v11411_v4 }
 0x2c5   : > { %v11614_v37 = vpop.f32.mrf.mxu1  ;;  %v6404_v13 = vmul.f32 %v12283_v56, %v4868_v24  ;;  %v4867_v34 = vmax.f32 %v4231_v39, 0.0  ;;  %v2798_v28 = vadd.f32 %v11631_v12, %v11459_v43  ;;  %v3124_v21 = vmax.f32 %v2806_v45, 0.0 }
 0x2c6   : > { %v6731_v49 = vmax.f32 %v6730_v38, %v6401_v63  ;;  %v12282_v63 = vld [vmem:[#allocation11_spill] sm:$0xff]  ;;  %v6402_v38 = vmul.f32 %v12284_v25, %v4866_v36  ;;  %v12285_v14 = vunpack.i.h.bf16 %v11411_v4  ;;  %v4244_v24 = vadd.f32 %v11598_v57, %v11474_v18 }
 0x2c7   : > { %v11638_v9 = vpop.f32.mrf.mxu1  ;;  %v7086_v16 = vsel %vm7069_vm7, %v7085_v62, %v12282_v63  ;;  %v11654_v62 = vpop.f32.mrf.mxu0  ;;  %v3121_v33 = vmax.f32 %v2795_v44, 0.0  ;;  %v3122_v39 = vmax.f32 %v2798_v28, 0.0  ;;  %v4252_v36 = vadd.f32 %v11598_v57, %v11461_v1 }
 0x2c8   : > { %v6732_v17 = vrot.slane %v6731_v49, 4  ;;  %v6403_v5 = vmul.f32 %v12285_v14, %v4867_v34  ;;  %v2819_v43 = vadd.f32 %v11631_v12, %v11472_v61  ;;  %v2811_v4 = vadd.f32 %v11631_v12, %v11484_v50 }
 0x2c9   : > { %v11648_v20 = vpop.f32.mrf.mxu1  ;;  %v11671_v18 = vsel %vm7072_vm8, %v7087_v35, %v7086_v16  ;;  %v12286_v14 = vunpack.i.h.bf16 %v11428_v42  ;;  %v3261_v44 = vpack.c.bf16 %v3122_v39, %v3121_v33  ;;  %v4255_v1 = vadd.f32 %v11598_v57, %v11486_v0 }
 0x2ca   : > { %v6733_v63 = vmax.f32 %v6731_v49, %v6732_v17  ;;  %v6738_v56 = vmax.f32 %v6402_v38, %v6403_v5  ;;  %v4870_v49 = vmax.f32 %v4244_v24, 0.0  ;;  %v11677_v17 = vpop.f32.mrf.mxu0  ;;  %v3262_v5 = vpack.c.bf16 %v3124_v21, %v3123_v29 }
 0x2cb   : > { %v11660_v23 = vpop.f32.mrf.mxu1  ;;  %v6405_v28 = vmul.f32 %v12286_v14, %v4869_v3  ;;  %v2822_v50 = vadd.f32 %v11631_v12, %v11494_v51  ;;  %v4872_v38 = vmax.f32 %v4252_v36, 0.0  ;;  %v3127_v16 = vmax.f32 %v2819_v43, 0.0  ;;  %8337 = vmatprep.mubr.msk.bf16.mxu1 %vm3296_vm2, %v3261_v44 }
 0x2cc   : > { %v6734_v27 = vrot.slane %v6733_v63, 2  ;;  %v6739_v34 = vmax.f32 %v6738_v56, %v6404_v13  ;;  %v4247_v42 = vadd.f32 %v11598_v57, %v11496_v47  ;;  %v2814_v0 = vadd.f32 %v11631_v12, %v11512_v2  ;;  %8338 = vmatmul.mubr.msk.bf16.gmra.mxu1 %vm3296_vm2, %v3262_v5  ;;  %v11695_v39 = vpop.f32.mrf.mxu0  ;;  %v12290_v5 = vld [vmem:[#allocation4_spill] sm:$0xff] }
 0x2cd   : > { %v11668_v45 = vpop.f32.mrf.mxu1  ;;  %v12287_v35 = vunpack.i.l.bf16 %v11438_v22  ;;  %v4873_v21 = vmax.f32 %v4255_v1, 0.0  ;;  %v4260_v47 = vadd.f32 %v11598_v57, %v11530_v32  ;;  %v3128_v43 = vmax.f32 %v2822_v50, 0.0 }
 0x2ce   : > { %v6735_v61 = vmax.f32 %v6733_v63, %v6734_v27  ;;  %v6740_v13 = vmax.f32 %v6739_v34, %v6405_v28  ;;  %v3125_v63 = vmax.f32 %v2811_v4, 0.0  ;;  %v4871_v24 = vmax.f32 %v4247_v42, 0.0 }
 0x2cf   : > { %v11681_v25 = vpop.f32.mrf.mxu1  ;;  %v6406_v29 = vmul.f32 %v12287_v35, %v4870_v49  ;;  %v3126_v33 = vmax.f32 %v2814_v0, 0.0  ;;  %v4268_v27 = vadd.f32 %v11598_v57, %v11519_v11  ;;  %v12288_v49 = vunpack.i.l.bf16 %v11466_v19  ;;  %v11721_v0 = vpop.f32.mrf.mxu0 }
 0x2d0   : > { %v6736_v3 = vrot.slane %v6735_v61, 1  ;;  %v12289_v14 = vunpack.i.h.bf16 %v11438_v22  ;;  %v2835_v32 = vadd.f32 %v11631_v12, %v11524_v40  ;;  %v2827_v34 = vadd.f32 %v11631_v12, %v12290_v5 }
 0x2d1   : > { %v11691_v51 = vpop.f32.mrf.mxu1  ;;  %v6741_v2 = vmax.f32 %v6740_v13, %v6406_v29  ;;  %v6408_v4 = vmul.f32 %v12288_v49, %v4872_v38  ;;  %v3263_v44 = vpack.c.bf16 %v3126_v33, %v3125_v63  ;;  %v4271_v11 = vadd.f32 %v11598_v57, %v11541_v46 }
 0x2d2   : > { %v6737_v36 = vmax.f32 %v6735_v61, %v6736_v3  ;;  %v6407_v28 = vmul.f32 %v12289_v14, %v4871_v24  ;;  %v4874_v61 = vmax.f32 %v4260_v47, 0.0  ;;  %v2838_v22 = vadd.f32 %v11631_v12, %v11544_v7 }
 0x2d3   : > { %v11699_v56 = vpop.f32.mrf.mxu1  ;;  %v4263_v38 = vadd.f32 %v11598_v57, %v11552_v58  ;;  %8341 = vmatprep.mubr.msk.bf16.mxu1 %vm3296_vm2, %v3263_v44  ;;  %v2830_v40 = vadd.f32 %v11631_v12, %v11559_v52  ;;  %v12291_v46 = vunpack.i.h.bf16 %v11466_v19  ;;  %v3264_v29 = vpack.c.bf16 %v3128_v43, %v3127_v16 }
 0x2d4   : > { %v6968_v1 = vmul.f32 %v11354_v48, %v6737_v36  ;;  %v6742_v42 = vmax.f32 %v6741_v2, %v6407_v28  ;;  %v4876_v13 = vmax.f32 %v4268_v27, 0.0  ;;  %v3129_v24 = vmax.f32 %v2827_v34, 0.0  ;;  %v12292_v2 = vld [vmem:[#allocation9_spill] sm:$0xff] }
 0x2d5   : > { %v6409_v35 = vmul.f32 %v12291_v46, %v4873_v21  ;;  %v4875_v33 = vmax.f32 %v4263_v38, 0.0  ;;  %v3130_v58 = vmax.f32 %v2830_v40, 0.0  ;;  %v3131_v36 = vmax.f32 %v2835_v32, 0.0  ;;  %8342 = vmatmul.mubr.msk.bf16.gmra.mxu1 %vm3296_vm2, %v3264_v29 }
 0x2d6   : > { %v11712_v50 = vpop.f32.mrf.mxu1  ;;  %v7007_v3 = vadd.f32 %v11370_v53, %v6968_v1  ;;  %v6743_v7 = vmax.f32 %v6742_v42, %v6408_v4  ;;  %v12293_v52 = vunpack.i.l.bf16 %v12292_v2  ;;  %v4877_v14 = vmax.f32 %v4271_v11, 0.0  ;;  %v2861_v4 = vpop.f32.mrf.mxu0  ;;  %v12295_v11 = vld [vmem:[#allocation3_spill] sm:$0xff] }
 0x2d7   : > { %v3132_v16 = vmax.f32 %v2838_v22, 0.0  ;;  %v12294_v21 = vunpack.i.h.bf16 %v12292_v2  ;;  %v3265_v27 = vpack.c.bf16 %v3130_v58, %v3129_v24  ;;  %v4284_v32 = vadd.f32 %v11598_v57, %v11568_v10  ;;  %v12298_v2 = vld [vmem:[#allocation2_spill] sm:$0xff] }
 0x2d8   : > { %v11726_v63 = vpop.f32.mrf.mxu1  ;;  %v7089_v47 = vrot.slane %v7007_v3, 1  ;;  %v6410_v49 = vmul.f32 %v12293_v52, %v4874_v61  ;;  %v6744_v19 = vmax.f32 %v6743_v7, %v6409_v35  ;;  %v4276_v1 = vadd.f32 %v11598_v57, %v11578_v6  ;;  %v11761_v7 = vpop.f32.mrf.mxu0 }
 0x2d9   : > { %v6411_v43 = vmul.f32 %v12294_v21, %v4875_v33  ;;  %v2843_v61 = vadd.f32 %v11631_v12, %v11602_v26  ;;  %v12296_v42 = vunpack.i.l.bf16 %v12295_v11  ;;  %8345 = vmatprep.mubr.msk.bf16.mxu1 %vm3296_vm2, %v3265_v27  ;;  %v12297_v10 = vunpack.i.h.bf16 %v12295_v11  ;;  %v11777_v27 = vpop.permute.xlu1 %8759 }
 0x2da   : > { %v11731_v28 = vpop.f32.mrf.mxu1  ;;  %v7090_v44 = vsel %vm7075_vm9, %v7089_v47, %v11671_v18  ;;  %v6745_v34 = vrot.slane %v6744_v19, 4  ;;  %v4287_v18 = vadd.f32 %v11598_v57, %v11592_v59  ;;  %v4878_v6 = vmax.f32 %v4276_v1, 0.0 }
 0x2db   : > { %7124 = vst [vmem:[%s10961_s16 + $0x8] sm:$0xff] %v7090_v44  ;;  %v6412_v22 = vmul.f32 %v12296_v42, %v4876_v13  ;;  %v6751_v38 = vmax.f32 %v6410_v49, %v6411_v43  ;;  %v6413_v40 = vmul.f32 %v12297_v10, %v4877_v14  ;;  %v2854_v26 = vadd.f32 %v11631_v12, %v11623_v55 }
 0x2dc   : > { %v11743_v5 = vpop.f32.mrf.mxu1  ;;  %v4279_v3 = vadd.f32 %v11598_v57, %v11607_v30  ;;  %v6746_v35 = vmax.f32 %v6744_v19, %v6745_v34  ;;  %v3266_v29 = vpack.c.bf16 %v3132_v16, %v3131_v36  ;;  %v2846_v59 = vadd.f32 %v11631_v12, %v11654_v62  ;;  %v2874_v34 = vpop.f32.mrf.mxu0 }
 0x2dd   : > { %v6752_v13 = vmax.f32 %v6751_v38, %v6412_v22  ;;  %v4880_v24 = vmax.f32 %v4284_v32, 0.0  ;;  %v2851_v33 = vadd.f32 %v11631_v12, %v11574_v31  ;;  %v3133_v58 = vmax.f32 %v2843_v61, 0.0 }
 0x2de   : > { %v11757_v46 = vpop.f32.mrf.mxu1  ;;  %v4879_v47 = vmax.f32 %v4279_v3, 0.0  ;;  %v12299_v30 = vunpack.i.l.bf16 %v12298_v2  ;;  %v4881_v14 = vmax.f32 %v4287_v18, 0.0  ;;  %v3134_v36 = vmax.f32 %v2846_v59, 0.0  ;;  %8346 = vmatmul.mubr.msk.bf16.gmra.mxu1 %vm3296_vm2, %v3266_v29 }
 0x2df   : > { %v6753_v49 = vmax.f32 %v6752_v13, %v6413_v40  ;;  %v8756_v19 = vunpack.i.l.bf16 %v11626_v8  ;;  %v3136_v16 = vmax.f32 %v2854_v26, 0.0  ;;  %v12300_v62 = vunpack.i.h.bf16 %v12298_v2 }
 0x2e0   : > { %v11765_v55 = vpop.f32.mrf.mxu1  ;;  %v6414_v52 = vmul.f32 %v12299_v30, %v4878_v6  ;;  %v4300_v43 = vadd.f32 %v11598_v57, %v11614_v37  ;;  %v6747_v44 = vrot.slane %v6746_v35, 2  ;;  %v3267_v1 = vpack.c.bf16 %v3134_v36, %v3133_v58  ;;  %v8100_v58 = vpop.f32.mrf.mxu0 }
 0x2e1   : > { %v6415_v21 = vmul.f32 %v12300_v62, %v4879_v47  ;;  %v4292_v61 = vadd.f32 %v11598_v57, %v11638_v9  ;;  %v8762_v11 = vunpack.i.h.bf16 %v11777_v27  ;;  %v3135_v42 = vmax.f32 %v2851_v33, 0.0 }
 0x2e2   : > { %v11775_v31 = vpop.f32.mrf.mxu1  ;;  %v6754_v32 = vmax.f32 %v6753_v49, %v6414_v52  ;;  %v2859_v22 = vadd.f32 %v11631_v12, %v11695_v39  ;;  %v4303_v37 = vadd.f32 %v11598_v57, %v11648_v20  ;;  %v12301_v18 = vunpack.i.l.bf16 %v11537_v41  ;;  %8349 = vmatprep.mubr.msk.bf16.mxu1 %vm3296_vm2, %v3267_v1  ;;  %v12306_v1 = vld [vmem:[#allocation5_spill] sm:$0xff] }
 0x2e3   : > { %v12302_v40 = vunpack.i.h.bf16 %v11537_v41  ;;  %v2870_v9 = vadd.f32 %v11631_v12, %v11721_v0  ;;  %v3268_v3 = vpack.c.bf16 %v3136_v16, %v3135_v42  ;;  %v4882_v29 = vmax.f32 %v4292_v61, 0.0 }
 0x2e4   : > { %v11786_v38 = vpop.f32.mrf.mxu1  ;;  %v6416_v10 = vmul.f32 %v12301_v18, %v4880_v24  ;;  %v6755_v26 = vmax.f32 %v6754_v32, %v6415_v21  ;;  %v4295_v39 = vadd.f32 %v11598_v57, %v11660_v23  ;;  %v2862_v20 = vadd.f32 %v11631_v12, %v2861_v4 }
 0x2e5   : > { %v6417_v6 = vmul.f32 %v12302_v40, %v4881_v14  ;;  %v6748_v59 = vmax.f32 %v6746_v35, %v6747_v44  ;;  %v4884_v33 = vmax.f32 %v4300_v43, 0.0  ;;  %v2867_v41 = vadd.f32 %v11631_v12, %v11677_v17  ;;  %v12303_v35 = vld [vmem:[#allocation7_spill] sm:$0xff] }
 0x2e6   : > { %v6756_v24 = vmax.f32 %v6755_v26, %v6416_v10  ;;  %v3137_v47 = vmax.f32 %v2859_v22, 0.0  ;;  %v4885_v0 = vmax.f32 %v4303_v37, 0.0  ;;  %v4883_v2 = vmax.f32 %v4295_v39, 0.0  ;;  %8350 = vmatmul.mubr.msk.bf16.gmra.mxu1 %vm3296_vm2, %v3268_v3  ;;  %v2877_v37 = vpop.f32.mrf.mxu0 }
 0x2e7   : > { %v3138_v30 = vmax.f32 %v2862_v20, 0.0  ;;  %v8761_v49 = vunpack.i.l.bf16 %v11777_v27  ;;  %v3140_v14 = vmax.f32 %v2870_v9, 0.0  ;;  %v4316_v4 = vadd.f32 %v11598_v57, %v11668_v45 }
 0x2e8   : > { %v11798_v13 = vpop.f32.mrf.mxu1  ;;  %v6757_v23 = vmax.f32 %v6756_v24, %v6417_v6  ;;  %v12304_v36 = vunpack.i.l.bf16 %v12303_v35  ;;  %v12305_v62 = vunpack.i.h.bf16 %v12303_v35  ;;  %v4308_v43 = vadd.f32 %v11598_v57, %v11681_v25 }
 0x2e9   : > { %v3269_v21 = vpack.c.bf16 %v3138_v30, %v3137_v47  ;;  %v12307_v61 = vunpack.i.l.bf16 %v12306_v1  ;;  %v3139_v22 = vmax.f32 %v2867_v41, 0.0  ;;  %v2875_v45 = vadd.f32 %v11631_v12, %v2874_v34 }
 0x2ea   : > { %v11802_v52 = vpop.f32.mrf.mxu1  ;;  %v6418_v16 = vmul.f32 %v12304_v36, %v4882_v29  ;;  %v6419_v17 = vmul.f32 %v12305_v62, %v4883_v2  ;;  %v6758_v32 = vrot.slane %v6757_v23, 4  ;;  %v6749_v18 = vrot.slane %v6748_v59, 1 }
 0x2eb   : > { %v6420_v42 = vmul.f32 %v12307_v61, %v4884_v33  ;;  %v12308_v10 = vunpack.i.h.bf16 %v12306_v1  ;;  %v4886_v26 = vmax.f32 %v4308_v43, 0.0  ;;  %8353 = vmatprep.mubr.msk.bf16.mxu1 %vm3296_vm2, %v3269_v21  ;;  %v3270_v3 = vpack.c.bf16 %v3140_v14, %v3139_v22 }
 0x2ec   : > { %v11814_v44 = vpop.f32.mrf.mxu1  ;;  %v6764_v6 = vmax.f32 %v6418_v16, %v6419_v17  ;;  %v6759_v25 = vmax.f32 %v6757_v23, %v6758_v32  ;;  %v4888_v29 = vmax.f32 %v4316_v4, 0.0  ;;  %v4311_v39 = vadd.f32 %v11598_v57, %v11699_v56  ;;  %v11834_v23 = vpop.permute.xlu0 %8764 }
 0x2ed   : > { %v6421_v40 = vmul.f32 %v12308_v10, %v4885_v0  ;;  %v3141_v24 = vmax.f32 %v2875_v45, 0.0  ;;  %v4319_v34 = vadd.f32 %v11598_v57, %v11691_v51  ;;  %v2878_v33 = vadd.f32 %v11631_v12, %v2877_v37 }
 0x2ee   : > { %v11822_v9 = vpop.f32.mrf.mxu1  ;;  %v6765_v20 = vmax.f32 %v6764_v6, %v6420_v42  ;;  %v6760_v47 = vrot.slane %v6759_v25, 2  ;;  %v6422_v0 = vmul.f32 %v8746_v54, %v4886_v26  ;;  %v2886_v2 = vadd.f32 %v11631_v12, %v8100_v58  ;;  %8354 = vmatmul.mubr.msk.bf16.gmra.mxu1 %vm3296_vm2, %v3270_v3 }
 0x2ef   : > { %v4887_v30 = vmax.f32 %v4311_v39, 0.0  ;;  %v3142_v56 = vmax.f32 %v2878_v33, 0.0  ;;  %v4332_v4 = vadd.f32 %v11598_v57, %v11712_v50  ;;  %v4324_v51 = vadd.f32 %v11598_v57, %v11726_v63  ;;  %v11850_v63 = vpop.permute.xlu1 %8769 }
 0x2f0   : > { %v11829_v41 = vpop.f32.mrf.mxu1  ;;  %v6766_v14 = vmax.f32 %v6765_v20, %v6421_v40  ;;  %v8767_v36 = vunpack.i.h.bf16 %v11834_v23  ;;  %v6750_v16 = vmax.f32 %v6748_v59, %v6749_v18  ;;  %v6761_v62 = vmax.f32 %v6759_v25, %v6760_v47  ;;  %v11868_v39 = vpop.permute.xlu0 %8774 }
 0x2f1   : > { %v12309_v54 = vunpack.i.h.bf16 %v11586_v15  ;;  %v2883_v17 = vadd.f32 %v11631_v12, %v11761_v7  ;;  %v4889_v43 = vmax.f32 %v4319_v34, 0.0  ;;  %v3271_v32 = vpack.c.bf16 %v3142_v56, %v3141_v24 }
 0x2f2   : > { %v11840_v35 = vpop.f32.mrf.mxu1  ;;  %v6767_v21 = vmax.f32 %v6766_v14, %v6422_v0  ;;  %v6762_v1 = vrot.slane %v6761_v62, 1  ;;  %v4890_v61 = vmax.f32 %v4324_v51, 0.0  ;;  %v4335_v59 = vadd.f32 %v11598_v57, %v11731_v28 }
 0x2f3   : > { %v6423_v58 = vmul.f32 %v12309_v54, %v4887_v30  ;;  %v4327_v15 = vadd.f32 %v11598_v57, %v11743_v5  ;;  %v12310_v42 = vunpack.i.l.bf16 %v11617_v60  ;;  %v3144_v7 = vmax.f32 %v2886_v2, 0.0  ;;  %8357 = vmatprep.mubr.msk.bf16.mxu1 %vm3296_vm2, %v3271_v32  ;;  %v11879_v30 = vpop.permute.xlu1 %8779 }
 0x2f4   : > { %v11848_v50 = vpop.f32.mrf.mxu1  ;;  %v4892_v45 = vmax.f32 %v4332_v4, 0.0  ;;  %v6969_v18 = vmul.f32 %v11354_v48, %v6750_v16  ;;  %v6763_v10 = vmax.f32 %v6761_v62, %v6762_v1  ;;  %v4340_v28 = vadd.f32 %v11598_v57, %v11765_v55  ;;  %v11894_v32 = vpop.permute.xlu0 %8784 }
 0x2f5   : > { %v6424_v12 = vmul.f32 %v12310_v42, %v4888_v29  ;;  %v6768_v22 = vmax.f32 %v6767_v21, %v6423_v58  ;;  %v4891_v40 = vmax.f32 %v4327_v15, 0.0  ;;  %v3143_v6 = vmax.f32 %v2883_v17, 0.0 }
 0x2f6   : > { %v11859_v37 = vpop.f32.mrf.mxu1  ;;  %v12311_v5 = vunpack.i.h.bf16 %v11617_v60  ;;  %v4343_v3 = vadd.f32 %v11598_v57, %v11786_v38  ;;  %v6970_v20 = vmul.f32 %v11354_v48, %v6763_v10  ;;  %v6426_v24 = vmul.f32 %v8756_v19, %v4890_v61 }
 0x2f7   : > { %v6769_v25 = vmax.f32 %v6768_v22, %v6424_v12  ;;  %v4893_v34 = vmax.f32 %v4335_v59, 0.0  ;;  %v12312_v33 = vunpack.i.h.bf16 %v11626_v8  ;;  %v3272_v47 = vpack.c.bf16 %v3144_v7, %v3143_v6 }
 0x2f8   : > { %v6425_v26 = vmul.f32 %v12311_v5, %v4889_v43  ;;  %v8275_v29 = vpop.f32.mrf.mxu1  ;;  %v6428_v60 = vmul.f32 %v8761_v49, %v4892_v45  ;;  %v4348_v38 = vadd.f32 %v11598_v57, %v11757_v46  ;;  %v7009_v48 = vadd.f32 %v11370_v53, %v6970_v20 }
 0x2f9   : > { %v6427_v55 = vmul.f32 %v12312_v33, %v4891_v40  ;;  %v4894_v56 = vmax.f32 %v4340_v28, 0.0  ;;  %v4895_v19 = vmax.f32 %v4343_v3, 0.0  ;;  %v8766_v4 = vunpack.i.l.bf16 %v11834_v23  ;;  %8358 = vmatmul.mubr.msk.bf16.gmra.mxu1 %vm3296_vm2, %v3272_v47 }
 0x2fa   : > { %v6770_v0 = vmax.f32 %v6769_v25, %v6425_v26  ;;  %v4387_v2 = vpop.f32.mrf.mxu1  ;;  %v7008_v8 = vadd.f32 %v11370_v53, %v6969_v18  ;;  %v4351_v49 = vadd.f32 %v11598_v57, %v11775_v31  ;;  %v7091_v46 = vrot.slane %v7009_v48, 7 }
 0x2fb   : > { %v6777_v14 = vmax.f32 %v6426_v24, %v6427_v55  ;;  %v6429_v62 = vmul.f32 %v8762_v11, %v4893_v34  ;;  %v4359_v58 = vadd.f32 %v11598_v57, %v11822_v9  ;;  %v8772_v17 = vunpack.i.h.bf16 %v11850_v63 }
 0x2fc   : > { %v6771_v51 = vrot.slane %v6770_v0, 4  ;;  %v8276_v16 = vpop.f32.mrf.mxu1  ;;  %v4896_v43 = vmax.f32 %v4348_v38, 0.0  ;;  %v4356_v53 = vadd.f32 %v11598_v57, %v11802_v52  ;;  %v11897_v31 = vsel %vm7057_vm3, %v7091_v46, %v7008_v8  ;;  %v11904_v52 = vpop.permute.xlu1 %8789 }
 0x2fd   : > { %v6778_v54 = vmax.f32 %v6777_v14, %v6428_v60  ;;  %v6430_v1 = vmul.f32 %v8766_v4, %v4894_v56  ;;  %v6431_v27 = vmul.f32 %v8767_v36, %v4895_v19  ;;  %v8771_v11 = vunpack.i.l.bf16 %v11850_v63 }
 0x2fe   : > { %v6772_v21 = vmax.f32 %v6770_v0, %v6771_v51  ;;  %v8777_v9 = vunpack.i.h.bf16 %v11868_v39  ;;  %v4899_v15 = vmax.f32 %v4359_v58, 0.0  ;;  %v4390_v42 = vpop.f32.mrf.mxu1  ;;  %v8776_v12 = vunpack.i.l.bf16 %v11868_v39 }
 0x2ff   : > { %v6779_v61 = vmax.f32 %v6778_v54, %v6429_v62  ;;  %v4897_v22 = vmax.f32 %v4351_v49, 0.0  ;;  %v4364_v45 = vadd.f32 %v11598_v57, %v11798_v13  ;;  %v8782_v18 = vunpack.i.h.bf16 %v11879_v30  ;;  %v8795_v13 = vpop.permute.xlu0 %8794 }
 0x300   : > { %v6773_v59 = vrot.slane %v6772_v21, 2  ;;  %v8781_v23 = vunpack.i.l.bf16 %v11879_v30  ;;  %v4898_v63 = vmax.f32 %v4356_v53, 0.0  ;;  %v8787_v10 = vunpack.i.h.bf16 %v11894_v32  ;;  %v8800_v48 = vpop.permute.xlu1 %8799 }
 0x301   : > { %v6780_v7 = vmax.f32 %v6779_v61, %v6430_v1  ;;  %v8786_v40 = vunpack.i.l.bf16 %v11894_v32  ;;  %v6432_v28 = vmul.f32 %v8771_v11, %v4896_v43  ;;  %v8791_v5 = vunpack.i.l.bf16 %v11904_v52 }
 0x302   : > { %v6774_v36 = vmax.f32 %v6772_v21, %v6773_v59  ;;  %v6435_v25 = vmul.f32 %v8777_v9, %v4899_v15  ;;  %v4388_v3 = vadd.f32 %v11598_v57, %v4387_v2  ;;  %v6433_v20 = vmul.f32 %v8772_v17, %v4897_v22 }
 0x303   : > { %v6781_v6 = vmax.f32 %v6780_v7, %v6431_v27  ;;  %v4900_v34 = vmax.f32 %v4364_v45, 0.0  ;;  %v4396_v33 = vadd.f32 %v11598_v57, %v8275_v29  ;;  %v6434_v47 = vmul.f32 %v8776_v12, %v4898_v63  ;;  %v11924_v29 = vld [vmem:[%s12161_s5] ss:$0 sm:$0xff]  ;;  %v8805_v1 = vpop.permute.xlu0 %8804 }
 0x304   : > { %v6775_v26 = vrot.slane %v6774_v36, 1  ;;  %v4367_v0 = vadd.f32 %v11598_v57, %v11814_v44  ;;  %v4906_v60 = vmax.f32 %v4388_v3, 0.0  ;;  %v8797_v30 = vunpack.i.h.bf16 %v8795_v13 }
 0x305   : > { %v11914_v39 = vpop.f32.mrf.mxu1  ;;  %v6782_v24 = vmax.f32 %v6781_v6, %v6432_v28  ;;  %v4399_v2 = vadd.f32 %v11598_v57, %v8276_v16  ;;  %v4391_v56 = vadd.f32 %v11598_v57, %v4390_v42  ;;  %v8796_v19 = vunpack.i.l.bf16 %v8795_v13  ;;  %v11932_v16 = vld [vmem:[%s12162_s6] ss:$0 sm:$0xff] }
 0x306   : > { %v6776_v55 = vmax.f32 %v6774_v36, %v6775_v26  ;;  %v8801_v4 = vunpack.i.l.bf16 %v8800_v48  ;;  %v6790_v51 = vmax.f32 %v6434_v47, %v6435_v25  ;;  %v6436_v46 = vmul.f32 %v8781_v23, %v4900_v34  ;;  %v11943_v26 = vpop.permute.xlu1 %8809 }
 0x307   : > { %v4403_v38 = vpop.f32.mrf.mxu1  ;;  %v6783_v14 = vmax.f32 %v6782_v24, %v6433_v20  ;;  %v4908_v62 = vmax.f32 %v4396_v33, 0.0  ;;  %v4907_v54 = vmax.f32 %v4391_v56, 0.0  ;;  %v4901_v17 = vmax.f32 %v4367_v0, 0.0  ;;  %v8815_v47 = vpop.permute.xlu0 %8814 }
 0x308   : > { %v6971_v8 = vmul.f32 %v11924_v29, %v6776_v55  ;;  %v4372_v21 = vadd.f32 %v11598_v57, %v11840_v35  ;;  %v6442_v43 = vmul.f32 %v8796_v19, %v4906_v60  ;;  %v4909_v27 = vmax.f32 %v4399_v2, 0.0 }
 0x309   : > { %v11927_v44 = vpop.f32.mrf.mxu1  ;;  %v6784_v49 = vrot.slane %v6783_v14, 4  ;;  %v6443_v11 = vmul.f32 %v8797_v30, %v4907_v54  ;;  %v4404_v9 = vadd.f32 %v11598_v57, %v4403_v38  ;;  %v8802_v59 = vunpack.i.h.bf16 %v8800_v48 }
 0x30a   : > { %v7010_v58 = vadd.f32 %v11932_v16, %v6971_v8  ;;  %v6791_v42 = vmax.f32 %v6790_v51, %v6436_v46  ;;  %v4375_v12 = vadd.f32 %v11598_v57, %v11859_v37  ;;  %v6444_v22 = vmul.f32 %v8801_v4, %v4908_v62 }
 0x30b   : > { %v4406_v53 = vpop.f32.mrf.mxu1  ;;  %v6785_v61 = vmax.f32 %v6783_v14, %v6784_v49  ;;  %v6803_v45 = vmax.f32 %v6442_v43, %v6443_v11  ;;  %v8807_v36 = vunpack.i.h.bf16 %v8805_v1  ;;  %v6437_v28 = vmul.f32 %v8782_v18, %v4901_v17 }
 0x30c   : > { %v7093_v15 = vrot.slane %v7010_v58, 6  ;;  %v4407_v23 = vadd.f32 %v11598_v57, %v4406_v53  ;;  %v4902_v6 = vmax.f32 %v4372_v21, 0.0  ;;  %v6445_v3 = vmul.f32 %v8802_v59, %v4909_v27  ;;  %v8825_v59 = vpop.permute.xlu0 %8824 }
 0x30d   : > { %v6786_v7 = vrot.slane %v6785_v61, 2  ;;  %v6804_v13 = vmax.f32 %v6803_v45, %v6444_v22  ;;  %v4910_v20 = vmax.f32 %v4404_v9, 0.0  ;;  %v8806_v37 = vunpack.i.l.bf16 %v8805_v1 }
 0x30e   : > { %v8283_v35 = vpop.f32.mrf.mxu1  ;;  %v7094_v63 = vsel %vm7060_vm4, %v7093_v15, %v11897_v31  ;;  %v8811_v34 = vunpack.i.l.bf16 %v11943_v26  ;;  %v4903_v33 = vmax.f32 %v4375_v12, 0.0  ;;  %v6792_v60 = vmax.f32 %v6791_v42, %v6437_v28 }
 0x30f   : > { %v6787_v25 = vmax.f32 %v6785_v61, %v6786_v7  ;;  %v6805_v38 = vmax.f32 %v6804_v13, %v6445_v3  ;;  %v4911_v31 = vmax.f32 %v4407_v23, 0.0  ;;  %v8817_v30 = vunpack.i.h.bf16 %v8815_v47 }
 0x310   : > { %v4419_v24 = vpop.f32.mrf.mxu1  ;;  %v8816_v48 = vunpack.i.l.bf16 %v8815_v47  ;;  %v4380_v14 = vadd.f32 %v11598_v57, %v11829_v41  ;;  %v4428_v2 = vadd.f32 %v11598_v57, %v8283_v35  ;;  %v6438_v19 = vmul.f32 %v8786_v40, %v4902_v6  ;;  %v8820_v41 = vpop.permute.xlu1 %8819 }
 0x311   : > { %v4420_v55 = vadd.f32 %v11598_v57, %v4419_v24  ;;  %v6788_v0 = vrot.slane %v6787_v25, 1  ;;  %v4412_v4 = vadd.f32 %v11598_v57, %v11914_v39  ;;  %v6446_v8 = vmul.f32 %v8806_v37, %v4910_v20 }
 0x312   : > { %v8284_v18 = vpop.f32.mrf.mxu1  ;;  %v6439_v49 = vmul.f32 %v8787_v10, %v4903_v33  ;;  %v6793_v17 = vmax.f32 %v6792_v60, %v6438_v19  ;;  %v6447_v43 = vmul.f32 %v8807_v36, %v4911_v31  ;;  %v8822_v40 = vunpack.i.h.bf16 %v8820_v41 }
 0x313   : > { %v6789_v56 = vmax.f32 %v6787_v25, %v6788_v0  ;;  %v4914_v46 = vmax.f32 %v4420_v55, 0.0  ;;  %v4431_v62 = vadd.f32 %v11598_v57, %v8284_v18  ;;  %v6806_v21 = vmax.f32 %v6805_v38, %v6446_v8 }
 0x314   : > { %v4422_v51 = vpop.f32.mrf.mxu1  ;;  %v4904_v53 = vmax.f32 %v4380_v14, 0.0  ;;  %v4916_v1 = vmax.f32 %v4428_v2, 0.0  ;;  %v4383_v32 = vadd.f32 %v11598_v57, %v11848_v50  ;;  %v4912_v10 = vmax.f32 %v4412_v4, 0.0  ;;  %v8830_v14 = vpop.permute.xlu1 %8829 }
 0x315   : > { %v4423_v54 = vadd.f32 %v11598_v57, %v4422_v51  ;;  %v6972_v58 = vmul.f32 %v11924_v29, %v6789_v56  ;;  %v4415_v27 = vadd.f32 %v11598_v57, %v11927_v44  ;;  %v8821_v9 = vunpack.i.l.bf16 %v8820_v41 }
 0x316   : > { %v8287_v11 = vpop.f32.mrf.mxu1  ;;  %v6450_v15 = vmul.f32 %v8816_v48, %v4914_v46  ;;  %v4917_v42 = vmax.f32 %v4431_v62, 0.0  ;;  %v8826_v7 = vunpack.i.l.bf16 %v8825_v59  ;;  %v6794_v45 = vmax.f32 %v6793_v17, %v6439_v49 }
 0x317   : > { %v4915_v39 = vmax.f32 %v4423_v54, 0.0  ;;  %v7011_v61 = vadd.f32 %v11932_v16, %v6972_v58  ;;  %v6807_v23 = vmax.f32 %v6806_v21, %v6447_v43  ;;  %v6440_v36 = vmul.f32 %v8791_v5, %v4904_v53 }
 0x318   : > { %v4435_v35 = vpop.f32.mrf.mxu1  ;;  %v6452_v28 = vmul.f32 %v8821_v9, %v4916_v1  ;;  %v4905_v25 = vmax.f32 %v4383_v32, 0.0  ;;  %v6448_v3 = vmul.f32 %v8811_v34, %v4912_v10  ;;  %v4913_v13 = vmax.f32 %v4415_v27, 0.0  ;;  %v8835_v32 = vpop.permute.xlu0 %8834 }
 0x319   : > { %v6451_v12 = vmul.f32 %v8817_v30, %v4915_v39  ;;  %v7095_v22 = vrot.slane %v7011_v61, 5  ;;  %v4436_v6 = vadd.f32 %v11598_v57, %v4435_v35  ;;  %v6453_v24 = vmul.f32 %v8822_v40, %v4917_v42 }
 0x31a   : > { %v8288_v20 = vpop.f32.mrf.mxu1  ;;  %v4444_v33 = vadd.f32 %v11598_v57, %v8287_v11  ;;  %v8792_v47 = vunpack.i.h.bf16 %v11904_v52  ;;  %v8812_v5 = vunpack.i.h.bf16 %v11943_v26  ;;  %v6795_v0 = vmax.f32 %v6794_v45, %v6440_v36 }
 0x31b   : > { %v6816_v50 = vmax.f32 %v6450_v15, %v6451_v12  ;;  %v11968_v44 = vsel %vm7063_vm5, %v7095_v22, %v7094_v63  ;;  %v4918_v55 = vmax.f32 %v4436_v6, 0.0  ;;  %v6808_v60 = vmax.f32 %v6807_v23, %v6448_v3 }
 0x31c   : > { %v4438_v38 = vpop.f32.mrf.mxu1  ;;  %v4447_v63 = vadd.f32 %v11598_v57, %v8288_v20  ;;  %v8827_v30 = vunpack.i.h.bf16 %v8825_v59  ;;  %v6441_v48 = vmul.f32 %v8792_v47, %v4905_v25  ;;  %v6449_v2 = vmul.f32 %v8812_v5, %v4913_v13  ;;  %v8845_v20 = vpop.permute.xlu0 %8844 }
 0x31d   : > { %v6817_v37 = vmax.f32 %v6816_v50, %v6452_v28  ;;  %v6454_v31 = vmul.f32 %v8826_v7, %v4918_v55  ;;  %v4439_v34 = vadd.f32 %v11598_v57, %v4438_v38  ;;  %v4920_v56 = vmax.f32 %v4444_v33, 0.0  ;;  %v8840_v7 = vpop.permute.xlu1 %8839 }
 0x31e   : > { %v8291_v8 = vpop.f32.mrf.mxu1  ;;  %v8831_v52 = vunpack.i.l.bf16 %v8830_v14  ;;  %v6796_v51 = vmax.f32 %v6795_v0, %v6441_v48  ;;  %v6809_v26 = vmax.f32 %v6808_v60, %v6449_v2  ;;  %v4921_v49 = vmax.f32 %v4447_v63, 0.0 }
 0x31f   : > { %v6818_v18 = vmax.f32 %v6817_v37, %v6453_v24  ;;  %v4919_v4 = vmax.f32 %v4439_v34, 0.0  ;;  %v8832_v41 = vunpack.i.h.bf16 %v8830_v14  ;;  %v4460_v43 = vadd.f32 %v11598_v57, %v8291_v8 }
 0x320   : > { %v4451_v62 = vpop.f32.mrf.mxu1  ;;  %v6456_v58 = vmul.f32 %v8831_v52, %v4920_v56  ;;  %v6797_v40 = vrot.slane %v6796_v51, 4  ;;  %v6810_v53 = vrot.slane %v6809_v26, 4  ;;  %v8837_v59 = vunpack.i.h.bf16 %v8835_v32 }
 0x321   : > { %v6819_v19 = vmax.f32 %v6818_v18, %v6454_v31  ;;  %v6455_v46 = vmul.f32 %v8827_v30, %v4919_v4  ;;  %v4452_v54 = vadd.f32 %v11598_v57, %v4451_v62  ;;  %v6457_v1 = vmul.f32 %v8832_v41, %v4921_v49  ;;  %v8850_v49 = vpop.permute.xlu1 %8849 }
 0x322   : > { %v8292_v21 = vpop.f32.mrf.mxu1  ;;  %v8836_v15 = vunpack.i.l.bf16 %v8835_v32  ;;  %v4924_v42 = vmax.f32 %v4460_v43, 0.0  ;;  %v6798_v22 = vmax.f32 %v6796_v51, %v6797_v40  ;;  %v6811_v45 = vmax.f32 %v6809_v26, %v6810_v53 }
 0x323   : > { %v6820_v17 = vmax.f32 %v6819_v19, %v6455_v46  ;;  %v4922_v10 = vmax.f32 %v4452_v54, 0.0  ;;  %v4463_v27 = vadd.f32 %v11598_v57, %v8292_v21  ;;  %v8841_v36 = vunpack.i.l.bf16 %v8840_v7  ;;  %v11986_v21 = vld [vmem:[%s12160_s4] ss:$0 sm:$0xff] }
 0x324   : > { %v4454_v61 = vpop.f32.mrf.mxu1  ;;  %v8842_v13 = vunpack.i.h.bf16 %v8840_v7  ;;  %v8846_v55 = vunpack.i.l.bf16 %v8845_v20  ;;  %v6799_v47 = vrot.slane %v6798_v22, 2  ;;  %v6812_v5 = vrot.slane %v6811_v45, 2 }
 0x325   : > { %v6821_v39 = vmax.f32 %v6820_v17, %v6456_v58  ;;  %v4455_v11 = vadd.f32 %v11598_v57, %v4454_v61  ;;  %v6458_v28 = vmul.f32 %v8836_v15, %v4922_v10  ;;  %v4925_v50 = vmax.f32 %v4463_v27, 0.0 }
 0x326   : > { %v6460_v24 = vmul.f32 %v8841_v36, %v4924_v42  ;;  %v8847_v56 = vunpack.i.h.bf16 %v8845_v20  ;;  %v6800_v19 = vmax.f32 %v6798_v22, %v6799_v47  ;;  %v6813_v4 = vmax.f32 %v6811_v45, %v6812_v5 }
 0x327   : > { %v6822_v9 = vmax.f32 %v6821_v39, %v6457_v1  ;;  %v4923_v12 = vmax.f32 %v4455_v11, 0.0  ;;  %v8295_v35 = vpop.f32.mrf.mxu1  ;;  %v6461_v60 = vmul.f32 %v8842_v13, %v4925_v50  ;;  %v8851_v46 = vunpack.i.l.bf16 %v8850_v49 }
 0x328   : > { %v4476_v31 = vadd.f32 %v11598_v57, %v8295_v35  ;;  %v8852_v17 = vunpack.i.h.bf16 %v8850_v49  ;;  %v6801_v43 = vrot.slane %v6800_v19, 1  ;;  %v6814_v40 = vrot.slane %v6813_v4, 1 }
 0x329   : > { %v6823_v23 = vrot.slane %v6822_v9, 4  ;;  %v6459_v6 = vmul.f32 %v8837_v59, %v4923_v12  ;;  %v4467_v3 = vpop.f32.mrf.mxu1 }
 0x32a   : > { %v4468_v33 = vadd.f32 %v11598_v57, %v4467_v3  ;;  %v4928_v8 = vmax.f32 %v4476_v31, 0.0  ;;  %v6802_v12 = vmax.f32 %v6800_v19, %v6801_v43  ;;  %v6815_v7 = vmax.f32 %v6813_v4, %v6814_v40 }
 0x32b   : > { %v6824_v25 = vmax.f32 %v6822_v9, %v6823_v23  ;;  %v6829_v37 = vmax.f32 %v6458_v28, %v6459_v6  ;;  %v8296_v0 = vpop.f32.mrf.mxu1  ;;  %v8855_v9 = vpop.permute.xlu0 %8854 }
 0x32c   : > { %v4926_v18 = vmax.f32 %v4468_v33, 0.0  ;;  %v4479_v14 = vadd.f32 %v11598_v57, %v8296_v0  ;;  %v6464_v53 = vmul.f32 %v8851_v46, %v4928_v8  ;;  %v8857_v45 = vunpack.i.h.bf16 %v8855_v9  ;;  %v8860_v28 = vpop.permute.xlu1 %8859 }
 0x32d   : > { %v6830_v38 = vmax.f32 %v6829_v37, %v6460_v24  ;;  %v6825_v63 = vrot.slane %v6824_v25, 2  ;;  %v4470_v34 = vpop.f32.mrf.mxu1  ;;  %v8856_v23 = vunpack.i.l.bf16 %v8855_v9  ;;  %v8861_v3 = vunpack.i.l.bf16 %v8860_v28 }
 0x32e   : > { %v6462_v30 = vmul.f32 %v8846_v55, %v4926_v18  ;;  %v4471_v2 = vadd.f32 %v11598_v57, %v4470_v34  ;;  %v4929_v54 = vmax.f32 %v4479_v14, 0.0  ;;  %v6973_v37 = vmul.f32 %v11924_v29, %v6802_v12 }
 0x32f   : > { %v6831_v48 = vmax.f32 %v6830_v38, %v6461_v60  ;;  %v8299_v26 = vpop.f32.mrf.mxu1  ;;  %v6826_v62 = vmax.f32 %v6824_v25, %v6825_v63  ;;  %v6974_v33 = vmul.f32 %v11924_v29, %v6815_v7  ;;  %v8862_v5 = vunpack.i.h.bf16 %v8860_v28  ;;  %v8865_v0 = vpop.permute.xlu0 %8864 }
 0x330   : > { %v4927_v51 = vmax.f32 %v4471_v2, 0.0  ;;  %v4492_v61 = vadd.f32 %v11986_v21, %v8299_v26  ;;  %v6465_v10 = vmul.f32 %v8852_v17, %v4929_v54  ;;  %v8866_v18 = vunpack.i.l.bf16 %v8865_v0  ;;  %v8870_v43 = vpop.permute.xlu1 %8869 }
 0x331   : > { %v6832_v52 = vmax.f32 %v6831_v48, %v6462_v30  ;;  %v4483_v58 = vpop.f32.mrf.mxu1  ;;  %v6827_v32 = vrot.slane %v6826_v62, 1  ;;  %v7012_v19 = vadd.f32 %v11932_v16, %v6973_v37  ;;  %v7013_v4 = vadd.f32 %v11932_v16, %v6974_v33 }
 0x332   : > { %v6463_v41 = vmul.f32 %v8847_v56, %v4927_v51  ;;  %v4484_v57 = vadd.f32 %v11986_v21, %v4483_v58  ;;  %v4932_v35 = vmax.f32 %v4492_v61, 0.0 }
 0x333   : > { %v8300_v39 = vpop.f32.mrf.mxu1  ;;  %v6828_v50 = vmax.f32 %v6826_v62, %v6827_v32  ;;  %v7097_v40 = vrot.slane %v7012_v19, 4  ;;  %v7099_v61 = vrot.slane %v7013_v4, 3 }
 0x334   : > { %v6833_v1 = vmax.f32 %v6832_v52, %v6463_v41  ;;  %v4930_v59 = vmax.f32 %v4484_v57, 0.0  ;;  %v4495_v15 = vadd.f32 %v11986_v21, %v8300_v39  ;;  %v6468_v60 = vmul.f32 %v8861_v3, %v4932_v35 }
 0x335   : > { %v4486_v11 = vpop.f32.mrf.mxu1  ;;  %v6975_v63 = vmul.f32 %v11924_v29, %v6828_v50  ;;  %v8867_v41 = vunpack.i.h.bf16 %v8865_v0  ;;  %v8871_v39 = vunpack.i.l.bf16 %v8870_v43  ;;  %v7098_v7 = vsel %vm7066_vm6, %v7097_v40, %v11968_v44 }
 0x336   : > { %v6834_v27 = vmax.f32 %v6833_v1, %v6464_v53  ;;  %v4487_v42 = vadd.f32 %v11986_v21, %v4486_v11  ;;  %v6466_v13 = vmul.f32 %v8856_v23, %v4930_v59  ;;  %v4933_v20 = vmax.f32 %v4495_v15, 0.0 }
 0x337   : > { %v7014_v62 = vadd.f32 %v11932_v16, %v6975_v63  ;;  %v8872_v59 = vunpack.i.h.bf16 %v8870_v43  ;;  %v7100_v23 = vsel %vm7069_vm7, %v7099_v61, %v7098_v7 }
 0x338   : > { %v6835_v22 = vmax.f32 %v6834_v27, %v6465_v10  ;;  %v4931_v36 = vmax.f32 %v4487_v42, 0.0  ;;  %v8303_v25 = vpop.f32.mrf.mxu1  ;;  %v6469_v48 = vmul.f32 %v8862_v5, %v4933_v20 }
 0x339   : > { %v4508_v2 = vadd.f32 %v11986_v21, %v8303_v25  ;;  %v7101_v27 = vrot.slane %v7014_v62, 2 }
 0x33a   : > { %v6836_v6 = vrot.slane %v6835_v22, 4  ;;  %v6467_v24 = vmul.f32 %v8857_v45, %v4931_v36  ;;  %v4499_v47 = vpop.f32.mrf.mxu1 }
 0x33b   : > { %v4500_v31 = vadd.f32 %v11986_v21, %v4499_v47  ;;  %v4936_v58 = vmax.f32 %v4508_v2, 0.0  ;;  %v7102_v50 = vsel %vm7072_vm8, %v7101_v27, %v7100_v23 }
 0x33c   : > { %v6837_v55 = vmax.f32 %v6835_v22, %v6836_v6  ;;  %v6842_v38 = vmax.f32 %v6466_v13, %v6467_v24  ;;  %v8304_v30 = vpop.f32.mrf.mxu1  ;;  %v8875_v24 = vpop.permute.xlu0 %8874 }
 0x33d   : > { %v4934_v56 = vmax.f32 %v4500_v31, 0.0  ;;  %v4511_v49 = vadd.f32 %v11986_v21, %v8304_v30  ;;  %v6472_v15 = vmul.f32 %v8871_v39, %v4936_v58  ;;  %v8877_v33 = vunpack.i.h.bf16 %v8875_v24 }
 0x33e   : > { %v6838_v34 = vrot.slane %v6837_v55, 2  ;;  %v6843_v14 = vmax.f32 %v6842_v38, %v6468_v60  ;;  %v4502_v52 = vpop.f32.mrf.mxu1  ;;  %v8880_v60 = vpop.permute.xlu1 %8879 }
 0x33f   : > { %v6470_v51 = vmul.f32 %v8866_v18, %v4934_v56  ;;  %v4503_v46 = vadd.f32 %v11986_v21, %v4502_v52  ;;  %v4937_v32 = vmax.f32 %v4511_v49, 0.0  ;;  %v8881_v38 = vunpack.i.l.bf16 %v8880_v60 }
 0x340   : > { %v6839_v8 = vmax.f32 %v6837_v55, %v6838_v34  ;;  %v6844_v26 = vmax.f32 %v6843_v14, %v6469_v48  ;;  %v8876_v55 = vunpack.i.l.bf16 %v8875_v24  ;;  %v8882_v48 = vunpack.i.h.bf16 %v8880_v60  ;;  %v8885_v19 = vpop.permute.xlu0 %8884 }
 0x341   : > { %v4935_v57 = vmax.f32 %v4503_v46, 0.0  ;;  %v8307_v1 = vpop.f32.mrf.mxu1  ;;  %v6473_v35 = vmul.f32 %v8872_v59, %v4937_v32  ;;  %v8886_v52 = vunpack.i.l.bf16 %v8885_v19 }
 0x342   : > { %v6840_v54 = vrot.slane %v6839_v8, 1  ;;  %v6845_v17 = vmax.f32 %v6844_v26, %v6470_v51  ;;  %v4524_v28 = vadd.f32 %v11986_v21, %v8307_v1  ;;  %v8890_v40 = vpop.permute.xlu1 %8889 }
 0x343   : > { %v6471_v10 = vmul.f32 %v8867_v41, %v4935_v57  ;;  %v4515_v9 = vpop.f32.mrf.mxu1  ;;  %v8891_v61 = vunpack.i.l.bf16 %v8890_v40 }
 0x344   : > { %v6841_v53 = vmax.f32 %v6839_v8, %v6840_v54  ;;  %v4516_v12 = vadd.f32 %v11986_v21, %v4515_v9  ;;  %v4940_v47 = vmax.f32 %v4524_v28, 0.0 }
 0x345   : > { %v6846_v42 = vmax.f32 %v6845_v17, %v6471_v10  ;;  %v8308_v45 = vpop.f32.mrf.mxu1  ;;  %v8887_v17 = vunpack.i.h.bf16 %v8885_v19 }
 0x346   : > { %v6976_v11 = vmul.f32 %v11924_v29, %v6841_v53  ;;  %v4938_v13 = vmax.f32 %v4516_v12, 0.0  ;;  %v4527_v20 = vadd.f32 %v11986_v21, %v8308_v45  ;;  %v6476_v14 = vmul.f32 %v8881_v38, %v4940_v47 }
 0x347   : > { %v6847_v36 = vmax.f32 %v6846_v42, %v6472_v15  ;;  %v4518_v25 = vpop.f32.mrf.mxu1 }
 0x348   : > { %v7015_v22 = vadd.f32 %v11932_v16, %v6976_v11  ;;  %v4519_v44 = vadd.f32 %v11986_v21, %v4518_v25  ;;  %v6474_v31 = vmul.f32 %v8876_v55, %v4938_v13  ;;  %v4941_v18 = vmax.f32 %v4527_v20, 0.0 }
 0x349   : > { %v6848_v3 = vmax.f32 %v6847_v36, %v6473_v35  ;;  %v8311_v0 = vpop.f32.mrf.mxu1  ;;  %v8892_v11 = vunpack.i.h.bf16 %v8890_v40  ;;  %v8895_v36 = vpop.permute.xlu0 %8894 }
 0x34a   : > { %v7103_v6 = vrot.slane %v7015_v22, 1  ;;  %v4939_v5 = vmax.f32 %v4519_v44, 0.0  ;;  %v4540_v4 = vadd.f32 %v11986_v21, %v8311_v0  ;;  %v6477_v26 = vmul.f32 %v8882_v48, %v4941_v18 }
 0x34b   : > { %v4531_v34 = vpop.f32.mrf.mxu1  ;;  %v6849_v51 = vrot.slane %v6848_v3, 4  ;;  %v8897_v25 = vunpack.i.h.bf16 %v8895_v36  ;;  %v8896_v13 = vunpack.i.l.bf16 %v8895_v36 }
 0x34c   : > { %v7104_v37 = vsel %vm7075_vm9, %v7103_v6, %v7102_v50  ;;  %v6475_v63 = vmul.f32 %v8877_v33, %v4939_v5  ;;  %v4532_v30 = vadd.f32 %v11986_v21, %v4531_v34  ;;  %v4944_v57 = vmax.f32 %v4540_v4, 0.0 }
 0x34d   : > { %7125 = vst [vmem:[%s10961_s16 + $0x10] sm:$0xff] %v7104_v37  ;;  %v8312_v56 = vpop.f32.mrf.mxu1  ;;  %v6850_v53 = vmax.f32 %v6848_v3, %v6849_v51  ;;  %v8900_v37 = vpop.permute.xlu1 %8899 }
 0x34e   : > { %v6855_v2 = vmax.f32 %v6474_v31, %v6475_v63  ;;  %v4942_v8 = vmax.f32 %v4532_v30, 0.0  ;;  %v4543_v62 = vadd.f32 %v11986_v21, %v8312_v56  ;;  %v6480_v9 = vmul.f32 %v8891_v61, %v4944_v57  ;;  %v8905_v63 = vpop.permute.xlu0 %8904 }
 0x34f   : > { %v4534_v46 = vpop.f32.mrf.mxu1  ;;  %v6851_v42 = vrot.slane %v6850_v53, 2  ;;  %v8901_v47 = vunpack.i.l.bf16 %v8900_v37  ;;  %v8902_v38 = vunpack.i.h.bf16 %v8900_v37 }
 0x350   : > { %v6856_v49 = vmax.f32 %v6855_v2, %v6476_v14  ;;  %v4535_v54 = vadd.f32 %v11986_v21, %v4534_v46  ;;  %v6478_v41 = vmul.f32 %v8886_v52, %v4942_v8  ;;  %v4945_v32 = vmax.f32 %v4543_v62, 0.0 }
 0x351   : > { %v6852_v3 = vmax.f32 %v6850_v53, %v6851_v42  ;;  %v8906_v2 = vunpack.i.l.bf16 %v8905_v63  ;;  %v8910_v57 = vpop.permute.xlu1 %8909 }
 0x352   : > { %v6857_v58 = vmax.f32 %v6856_v49, %v6477_v26  ;;  %v4943_v43 = vmax.f32 %v4535_v54, 0.0  ;;  %v6481_v7 = vmul.f32 %v8892_v11, %v4945_v32  ;;  %v8911_v61 = vunpack.i.l.bf16 %v8910_v57 }
 0x353   : > { %v8315_v39 = vpop.f32.mrf.mxu1  ;;  %v6853_v31 = vrot.slane %v6852_v3, 1 }
 0x354   : > { %v6858_v1 = vmax.f32 %v6857_v58, %v6478_v41  ;;  %v6479_v10 = vmul.f32 %v8887_v17, %v4943_v43  ;;  %v4556_v45 = vadd.f32 %v11986_v21, %v8315_v39  ;;  %v8907_v17 = vunpack.i.h.bf16 %v8905_v63 }
 0x355   : > { %v4547_v27 = vpop.f32.mrf.mxu1  ;;  %v6854_v26 = vmax.f32 %v6852_v3, %v6853_v31 }
 0x356   : > { %v6859_v59 = vmax.f32 %v6858_v1, %v6479_v10  ;;  %v4548_v15 = vadd.f32 %v11986_v21, %v4547_v27  ;;  %v4948_v44 = vmax.f32 %v4556_v45, 0.0 }
 0x357   : > { %v8316_v12 = vpop.f32.mrf.mxu1  ;;  %v6977_v32 = vmul.f32 %v11924_v29, %v6854_v26 }
 0x358   : > { %v6860_v22 = vmax.f32 %v6859_v59, %v6480_v9  ;;  %v4559_v23 = vadd.f32 %v11986_v21, %v8316_v12  ;;  %v4946_v50 = vmax.f32 %v4548_v15, 0.0  ;;  %v6484_v30 = vmul.f32 %v8901_v47, %v4948_v44  ;;  %v8920_v47 = vpop.permute.xlu1 %8919 }
 0x359   : > { %v4550_v35 = vpop.f32.mrf.mxu1  ;;  %v8912_v15 = vunpack.i.h.bf16 %v8910_v57 }
 0x35a   : > { %v6861_v28 = vmax.f32 %v6860_v22, %v6481_v7  ;;  %v4551_v6 = vadd.f32 %v11986_v21, %v4550_v35  ;;  %v4949_v33 = vmax.f32 %v4559_v23, 0.0  ;;  %v6482_v0 = vmul.f32 %v8896_v13, %v4946_v50 }
 0x35b   : > { %v8319_v55 = vpop.f32.mrf.mxu1  ;;  %v7016_v23 = vadd.f32 %v11932_v16, %v6977_v32 }
 0x35c   : > { %v6862_v20 = vrot.slane %v6861_v28, 4  ;;  %v4947_v24 = vmax.f32 %v4551_v6, 0.0  ;;  %v6485_v56 = vmul.f32 %v8902_v38, %v4949_v33  ;;  %v4572_v52 = vadd.f32 %v11986_v21, %v8319_v55  ;;  %v8915_v6 = vpop.permute.xlu0 %8914 }
 0x35d   : > { %v4563_v18 = vpop.f32.mrf.mxu1  ;;  %v8916_v37 = vunpack.i.l.bf16 %v8915_v6 }
 0x35e   : > { %v6863_v5 = vmax.f32 %v6861_v28, %v6862_v20  ;;  %v6483_v60 = vmul.f32 %v8897_v25, %v4947_v24  ;;  %v4564_v14 = vadd.f32 %v11986_v21, %v4563_v18  ;;  %v4952_v40 = vmax.f32 %v4572_v52, 0.0 }
 0x35f   : > { %v8320_v19 = vpop.f32.mrf.mxu1  ;;  %v8917_v24 = vunpack.i.h.bf16 %v8915_v6 }
 0x360   : > { %v6864_v34 = vrot.slane %v6863_v5, 2  ;;  %v6868_v48 = vmax.f32 %v6482_v0, %v6483_v60  ;;  %v4950_v51 = vmax.f32 %v4564_v14, 0.0  ;;  %v4575_v49 = vadd.f32 %v11986_v21, %v8320_v19 }
 0x361   : > { %v4566_v46 = vpop.f32.mrf.mxu1  ;;  %v6488_v12 = vmul.f32 %v8911_v61, %v4952_v40  ;;  %v8921_v60 = vunpack.i.l.bf16 %v8920_v47  ;;  %v8930_v61 = vpop.permute.xlu1 %8929 }
 0x362   : > { %v6865_v4 = vmax.f32 %v6863_v5, %v6864_v34  ;;  %v6869_v8 = vmax.f32 %v6868_v48, %v6484_v30  ;;  %v6486_v54 = vmul.f32 %v8906_v2, %v4950_v51  ;;  %v4567_v58 = vadd.f32 %v11986_v21, %v4566_v46  ;;  %v8925_v48 = vpop.permute.xlu0 %8924 }
 0x363   : > { %v8323_v39 = vpop.f32.mrf.mxu1  ;;  %v4953_v27 = vmax.f32 %v4575_v49, 0.0  ;;  %v8922_v30 = vunpack.i.h.bf16 %v8920_v47  ;;  %v8926_v19 = vunpack.i.l.bf16 %v8925_v48 }
 0x364   : > { %v6866_v62 = vrot.slane %v6865_v4, 1  ;;  %v6870_v41 = vmax.f32 %v6869_v8, %v6485_v56  ;;  %v4951_v1 = vmax.f32 %v4567_v58, 0.0  ;;  %v4588_v45 = vadd.f32 %v11986_v21, %v8323_v39 }
 0x365   : > { %v4579_v9 = vpop.f32.mrf.mxu1  ;;  %v6489_v36 = vmul.f32 %v8912_v15, %v4953_v27  ;;  %v8932_v15 = vunpack.i.h.bf16 %v8930_v61 }
 0x366   : > { %v6867_v43 = vmax.f32 %v6865_v4, %v6866_v62  ;;  %v6871_v53 = vmax.f32 %v6870_v41, %v6486_v54  ;;  %v6487_v11 = vmul.f32 %v8907_v17, %v4951_v1  ;;  %v4580_v59 = vadd.f32 %v11986_v21, %v4579_v9 }
 0x367   : > { %v8324_v22 = vpop.f32.mrf.mxu1  ;;  %v4956_v33 = vmax.f32 %v4588_v45, 0.0 }
 0x368   : > { %v6978_v10 = vmul.f32 %v11924_v29, %v6867_v43  ;;  %v6872_v7 = vmax.f32 %v6871_v53, %v6487_v11  ;;  %v4954_v25 = vmax.f32 %v4580_v59, 0.0  ;;  %v4591_v3 = vadd.f32 %v11986_v21, %v8324_v22  ;;  %v8935_v22 = vpop.permute.xlu0 %8934 }
 0x369   : > { %v4582_v50 = vpop.f32.mrf.mxu1  ;;  %v6492_v14 = vmul.f32 %v8921_v60, %v4956_v33  ;;  %v8927_v43 = vunpack.i.h.bf16 %v8925_v48 }
 0x36a   : > { %v7017_v42 = vadd.f32 %v11932_v16, %v6978_v10  ;;  %v6873_v28 = vmax.f32 %v6872_v7, %v6488_v12  ;;  %v4583_v13 = vadd.f32 %v11986_v21, %v4582_v50  ;;  %v6490_v38 = vmul.f32 %v8916_v37, %v4954_v25 }
 0x36b   : > { %v8327_v0 = vpop.f32.mrf.mxu1  ;;  %v4957_v31 = vmax.f32 %v4591_v3, 0.0  ;;  %v8931_v10 = vunpack.i.l.bf16 %v8930_v61 }
 0x36c   : > { %v7105_v35 = vrot.slane %v7017_v42, 7  ;;  %v6874_v44 = vmax.f32 %v6873_v28, %v6489_v36  ;;  %v4955_v55 = vmax.f32 %v4583_v13, 0.0  ;;  %v4604_v26 = vadd.f32 %v11986_v21, %v8327_v0  ;;  %v12044_v13 = vpop.permute.xlu0 %8944 }
 0x36d   : > { %v4595_v34 = vpop.f32.mrf.mxu1  ;;  %v6493_v52 = vmul.f32 %v8922_v30, %v4957_v31 }
 0x36e   : > { %v7106_v20 = vsel %vm7057_vm3, %v7105_v35, %v7016_v23  ;;  %v6875_v5 = vrot.slane %v6874_v44, 4  ;;  %v6491_v18 = vmul.f32 %v8917_v24, %v4955_v55  ;;  %v4596_v56 = vadd.f32 %v11986_v21, %v4595_v34 }
 0x36f   : > { %v8328_v8 = vpop.f32.mrf.mxu1  ;;  %v4960_v40 = vmax.f32 %v4604_v26, 0.0 }
 0x370   : > { %v6876_v63 = vmax.f32 %v6874_v44, %v6875_v5  ;;  %v6881_v2 = vmax.f32 %v6490_v38, %v6491_v18  ;;  %v4958_v49 = vmax.f32 %v4596_v56, 0.0  ;;  %v4607_v58 = vadd.f32 %v11986_v21, %v8328_v8  ;;  %v12046_v44 = vpop.permute.xlu1 %8939  ;;  %v12050_v0 = vpop.permute.xlu0 %8954 }
 0x371   : > { %v4598_v62 = vpop.f32.mrf.mxu1  ;;  %v6496_v42 = vmul.f32 %v8931_v10, %v4960_v40 }
 0x372   : > { %v6877_v4 = vrot.slane %v6876_v63, 2  ;;  %v6882_v51 = vmax.f32 %v6881_v2, %v6492_v14  ;;  %v6494_v54 = vmul.f32 %v8926_v19, %v4958_v49  ;;  %v4599_v17 = vadd.f32 %v11986_v21, %v4598_v62 }
 0x373   : > { %v8331_v39 = vpop.f32.mrf.mxu1  ;;  %v4961_v27 = vmax.f32 %v4607_v58, 0.0  ;;  %v8937_v19 = vunpack.i.h.bf16 %v8935_v22  ;;  %v8936_v49 = vunpack.i.l.bf16 %v8935_v22 }
 0x374   : > { %v6878_v46 = vmax.f32 %v6876_v63, %v6877_v4  ;;  %v6883_v41 = vmax.f32 %v6882_v51, %v6493_v52  ;;  %v4959_v1 = vmax.f32 %v4599_v17, 0.0  ;;  %v12052_v60 = vpop.permute.xlu1 %8949  ;;  %v12057_v14 = vpop.permute.xlu0 %8964  ;;  %v4620_v2 = vadd.f32 %v11986_v21, %v8331_v39 }
 0x375   : > { %v4611_v9 = vpop.f32.mrf.mxu1  ;;  %v6497_v23 = vmul.f32 %v8932_v15, %v4961_v27  ;;  %v8956_v39 = vunpack.i.l.bf16 %v12050_v0 }
 0x376   : > { %v6879_v57 = vrot.slane %v6878_v46, 1  ;;  %v6884_v53 = vmax.f32 %v6883_v41, %v6494_v54  ;;  %v6495_v11 = vmul.f32 %v8927_v43, %v4959_v1  ;;  %v4612_v18 = vadd.f32 %v11986_v21, %v4611_v9 }
 0x377   : > { %v8332_v7 = vpop.f32.mrf.mxu1  ;;  %v8941_v54 = vunpack.i.l.bf16 %v12046_v44  ;;  %v4964_v41 = vmax.f32 %v4620_v2, 0.0  ;;  %v8952_v1 = vunpack.i.h.bf16 %v12052_v60 }
 0x378   : > { %v6880_v32 = vmax.f32 %v6878_v46, %v6879_v57  ;;  %v6885_v12 = vmax.f32 %v6884_v53, %v6495_v11  ;;  %v12061_v4 = vpop.permute.xlu1 %8959  ;;  %v4962_v52 = vmax.f32 %v4612_v18, 0.0  ;;  %v12074_v61 = vpop.permute.xlu0 %8974 }
 0x379   : > { %v4614_v36 = vpop.f32.mrf.mxu1  ;;  %v6500_v15 = vmul.f32 %v8941_v54, %v4964_v41  ;;  %v8951_v41 = vunpack.i.l.bf16 %v12052_v60 }
 0x37a   : > { %v6979_v59 = vmul.f32 %v11924_v29, %v6880_v32  ;;  %v6886_v35 = vmax.f32 %v6885_v12, %v6496_v42  ;;  %v6498_v43 = vmul.f32 %v8936_v49, %v4962_v52  ;;  %v8947_v52 = vunpack.i.h.bf16 %v12044_v13 }
 0x37c   : > { %v7018_v45 = vadd.f32 %v11932_v16, %v6979_v59  ;;  %v6887_v50 = vmax.f32 %v6886_v35, %v6497_v23  ;;  %v12076_v27 = vpop.permute.xlu1 %8969  ;;  %v8962_v59 = vunpack.i.h.bf16 %v12061_v4 }
 0x37e   : > { %v7107_v28 = vrot.slane %v7018_v45, 6  ;;  %v6888_v25 = vrot.slane %v6887_v50, 4 }
 0x380   : > { %v7108_v6 = vsel %vm7060_vm4, %v7107_v28, %v7106_v20  ;;  %v6889_v24 = vmax.f32 %v6887_v50, %v6888_v25  ;;  %v4615_v20 = vadd.f32 %v11986_v21, %v4614_v36  ;;  %v8942_v50 = vunpack.i.h.bf16 %v12046_v44 }
 0x381   : > { %v8946_v44 = vunpack.i.l.bf16 %v12044_v13 }
 0x382   : > { %v6890_v33 = vrot.slane %v6889_v24, 2  ;;  %v4963_v30 = vmax.f32 %v4615_v20, 0.0 }
 0x384   : > { %v12042_v3 = vpop.f32.mrf.mxu1  ;;  %v6891_v47 = vmax.f32 %v6889_v24, %v6890_v33 }
 0x386   : > { %v4627_v37 = vpop.f32.mrf.mxu1  ;;  %v6892_v38 = vrot.slane %v6891_v47, 1 }
 0x387   : > { %v4628_v22 = vadd.f32 %v11986_v21, %v4627_v37  ;;  %v12087_v37 = vpop.permute.xlu1 %8979 }
 0x388   : > { %v12048_v55 = vpop.f32.mrf.mxu1  ;;  %v6893_v31 = vmax.f32 %v6891_v47, %v6892_v38  ;;  %v12084_v47 = vpop.permute.xlu0 %8984 }
 0x389   : > { %v4966_v18 = vmax.f32 %v4628_v22, 0.0  ;;  %v4639_v60 = vadd.f32 %v11986_v21, %v12048_v55 }
 0x38a   : > { %v4630_v5 = vpop.f32.mrf.mxu1  ;;  %v6980_v34 = vmul.f32 %v11924_v29, %v6893_v31  ;;  %v6499_v29 = vmul.f32 %v8937_v19, %v4963_v30 }
 0x38b   : > { %v4631_v24 = vadd.f32 %v11986_v21, %v4630_v5  ;;  %v6502_v49 = vmul.f32 %v8946_v44, %v4966_v18 }
 0x38c   : > { %v8339_v63 = vpop.f32.mrf.mxu1  ;;  %v7019_v8 = vadd.f32 %v11932_v16, %v6980_v34  ;;  %v4623_v16 = vadd.f32 %v11986_v21, %v8332_v7  ;;  %v6894_v11 = vmax.f32 %v6498_v43, %v6499_v29  ;;  %v12101_v43 = vpop.permute.xlu1 %8989 }
 0x38d   : > { %v4652_v26 = vadd.f32 %v11986_v21, %v8339_v63 }
 0x38e   : > { %v4643_v48 = vpop.f32.mrf.mxu1  ;;  %v7109_v46 = vrot.slane %v7019_v8, 5  ;;  %v4965_v7 = vmax.f32 %v4623_v16, 0.0  ;;  %v6895_v25 = vmax.f32 %v6894_v11, %v6500_v15 }
 0x38f   : > { %v4644_v56 = vadd.f32 %v11986_v21, %v4643_v48  ;;  %v4972_v32 = vmax.f32 %v4652_v26, 0.0  ;;  %v8981_v48 = vunpack.i.l.bf16 %v12087_v37  ;;  %v4636_v26 = vadd.f32 %v11986_v21, %v12042_v3 }
 0x390   : > { %v8340_v51 = vpop.f32.mrf.mxu1  ;;  %v12068_v57 = vsel %vm7063_vm5, %v7109_v46, %v7108_v6  ;;  %v8972_v6 = vunpack.i.h.bf16 %v12076_v27  ;;  %v6501_v31 = vmul.f32 %v8942_v50, %v4965_v7 }
 0x391   : > { %v4970_v58 = vmax.f32 %v4644_v56, 0.0  ;;  %v4655_v40 = vadd.f32 %v11986_v21, %v8340_v51  ;;  %v6508_v36 = vmul.f32 %v8962_v59, %v4972_v32  ;;  %v4967_v56 = vmax.f32 %v4631_v24, 0.0  ;;  %v9000_v24 = vpop.permute.xlu1 %8999 }
 0x392   : > { %v4646_v62 = vpop.f32.mrf.mxu1  ;;  %v6896_v2 = vmax.f32 %v6895_v25, %v6501_v31  ;;  %v8987_v51 = vunpack.i.h.bf16 %v12084_v47  ;;  %v4968_v11 = vmax.f32 %v4636_v26, 0.0  ;;  %v9001_v31 = vunpack.i.l.bf16 %v9000_v24 }
 0x393   : > { %v4647_v17 = vadd.f32 %v11986_v21, %v4646_v62  ;;  %v6506_v42 = vmul.f32 %v8952_v1, %v4970_v58  ;;  %v4973_v45 = vmax.f32 %v4655_v40, 0.0  ;;  %v12098_v58 = vpop.permute.xlu0 %8994  ;;  %v6503_v16 = vmul.f32 %v8947_v52, %v4967_v56 }
 0x394   : > { %v6897_v13 = vmax.f32 %v6896_v2, %v6502_v49 }
 0x395   : > { %v8343_v53 = vpop.f32.mrf.mxu1  ;;  %v4971_v10 = vmax.f32 %v4647_v17, 0.0  ;;  %v6509_v63 = vmul.f32 %v8972_v6, %v4973_v45  ;;  %v8996_v45 = vunpack.i.l.bf16 %v12098_v58 }
 0x396   : > { %v4668_v46 = vadd.f32 %v11986_v21, %v8343_v53 }
 0x397   : > { %v4659_v9 = vpop.f32.mrf.mxu1  ;;  %v6507_v12 = vmul.f32 %v8956_v39, %v4971_v10  ;;  %v8957_v39 = vunpack.i.h.bf16 %v12050_v0  ;;  %v8977_v0 = vunpack.i.h.bf16 %v12074_v61  ;;  %v12113_v50 = vpop.permute.xlu0 %9004 }
 0x398   : > { %v4660_v23 = vadd.f32 %v11986_v21, %v4659_v9  ;;  %v4976_v9 = vmax.f32 %v4668_v46, 0.0 }
 0x399   : > { %v8344_v35 = vpop.f32.mrf.mxu1  ;;  %v6907_v28 = vmax.f32 %v6506_v42, %v6507_v12  ;;  %v8961_v42 = vunpack.i.l.bf16 %v12061_v4  ;;  %v8971_v12 = vunpack.i.l.bf16 %v12076_v27  ;;  %v6504_v4 = vmul.f32 %v8951_v41, %v4968_v11  ;;  %v12122_v41 = vpop.permute.xlu1 %9009 }
 0x39a   : > { %v4974_v34 = vmax.f32 %v4660_v23, 0.0  ;;  %v4671_v59 = vadd.f32 %v11986_v21, %v8344_v35  ;;  %v6898_v23 = vmax.f32 %v6897_v13, %v6503_v16  ;;  %v6512_v27 = vmul.f32 %v8996_v45, %v4976_v9 }
 0x39b   : > { %v4662_v33 = vpop.f32.mrf.mxu1  ;;  %v6908_v38 = vmax.f32 %v6907_v28, %v6508_v36  ;;  %v9011_v11 = vunpack.i.l.bf16 %v12122_v41 }
 0x39c   : > { %v4663_v20 = vadd.f32 %v11986_v21, %v4662_v33  ;;  %v6510_v29 = vmul.f32 %v8981_v48, %v4974_v34  ;;  %v4969_v33 = vmax.f32 %v4639_v60, 0.0  ;;  %v6899_v44 = vmax.f32 %v6898_v23, %v6504_v4 }
 0x39d   : > { %v6909_v5 = vmax.f32 %v6908_v38, %v6509_v63  ;;  %v4977_v38 = vmax.f32 %v4671_v59, 0.0 }
 0x39e   : > { %v8347_v30 = vpop.f32.mrf.mxu1  ;;  %v4975_v19 = vmax.f32 %v4663_v20, 0.0  ;;  %v6505_v52 = vmul.f32 %v9001_v31, %v4969_v33 }
 0x39f   : > { %v4684_v17 = vadd.f32 %v11986_v21, %v8347_v30  ;;  %v6910_v40 = vmax.f32 %v6909_v5, %v6510_v29  ;;  %v9006_v30 = vunpack.i.l.bf16 %v12113_v50  ;;  %v8986_v5 = vunpack.i.l.bf16 %v12084_v47 }
 0x3a0   : > { %v4675_v8 = vpop.f32.mrf.mxu1  ;;  %v6511_v1 = vmul.f32 %v8987_v51, %v4975_v19  ;;  %v8992_v29 = vunpack.i.h.bf16 %v12101_v43 }
 0x3a1   : > { %v4676_v62 = vadd.f32 %v11986_v21, %v4675_v8  ;;  %v4980_v7 = vmax.f32 %v4684_v17, 0.0  ;;  %v6513_v51 = vmul.f32 %v9006_v30, %v4977_v38  ;;  %v6900_v17 = vmax.f32 %v6899_v44, %v6505_v52 }
 0x3a2   : > { %v8348_v54 = vpop.f32.mrf.mxu1  ;;  %v6911_v36 = vmax.f32 %v6910_v40, %v6511_v1 }
 0x3a3   : > { %v4978_v53 = vmax.f32 %v4676_v62, 0.0  ;;  %v4687_v32 = vadd.f32 %v11986_v21, %v8348_v54  ;;  %v6516_v18 = vmul.f32 %v8971_v12, %v4980_v7  ;;  %v6901_v9 = vrot.slane %v6900_v17, 4 }
 0x3a4   : > { %v4678_v3 = vpop.f32.mrf.mxu1  ;;  %v6912_v48 = vmax.f32 %v6911_v36, %v6512_v27 }
 0x3a5   : > { %v4679_v10 = vadd.f32 %v11986_v21, %v4678_v3  ;;  %v6514_v55 = vmul.f32 %v8957_v39, %v4978_v53  ;;  %v4981_v6 = vmax.f32 %v4687_v32, 0.0  ;;  %v9002_v39 = vunpack.i.h.bf16 %v9000_v24 }
 0x3a6   : > { %v8351_v15 = vpop.f32.mrf.mxu1  ;;  %v6913_v13 = vmax.f32 %v6912_v48, %v6513_v51  ;;  %v6902_v24 = vmax.f32 %v6900_v17, %v6901_v9 }
 0x3a7   : > { %v4979_v22 = vmax.f32 %v4679_v10, 0.0  ;;  %v4700_v2 = vadd.f32 %v11986_v21, %v8351_v15  ;;  %v6517_v19 = vmul.f32 %v8977_v0, %v4981_v6 }
 0x3a8   : > { %v4691_v28 = vpop.f32.mrf.mxu1  ;;  %v6914_v59 = vrot.slane %v6913_v13, 4 }
 0x3a9   : > { %v6515_v25 = vmul.f32 %v8961_v42, %v4979_v22  ;;  %v4692_v35 = vadd.f32 %v11986_v21, %v4691_v28  ;;  %v4984_v16 = vmax.f32 %v4700_v2, 0.0  ;;  %v8967_v28 = vunpack.i.h.bf16 %v12057_v14 }
 0x3aa   : > { %v8352_v20 = vpop.f32.mrf.mxu1  ;;  %v6915_v4 = vmax.f32 %v6913_v13, %v6914_v59  ;;  %v9007_v13 = vunpack.i.h.bf16 %v12113_v50 }
 0x3ab   : > { %v6920_v63 = vmax.f32 %v6514_v55, %v6515_v25  ;;  %v4982_v34 = vmax.f32 %v4692_v35, 0.0  ;;  %v4703_v26 = vadd.f32 %v11986_v21, %v8352_v20  ;;  %v6520_v15 = vmul.f32 %v9002_v39, %v4984_v16 }
 0x3ac   : > { %v4694_v56 = vpop.f32.mrf.mxu1  ;;  %v8966_v55 = vunpack.i.l.bf16 %v12057_v14  ;;  %v8976_v35 = vunpack.i.l.bf16 %v12074_v61  ;;  %v8991_v61 = vunpack.i.l.bf16 %v12101_v43  ;;  %v9012_v39 = vunpack.i.h.bf16 %v12122_v41 }
 0x3ad   : > { %v6921_v8 = vmax.f32 %v6920_v63, %v6516_v18  ;;  %v4695_v49 = vadd.f32 %v11986_v21, %v4694_v56  ;;  %v6518_v62 = vmul.f32 %v8986_v5, %v4982_v34  ;;  %v4985_v53 = vmax.f32 %v4703_v26, 0.0 }
 0x3ae   : > { %v8355_v46 = vpop.f32.mrf.mxu1  ;;  %v8982_v63 = vunpack.i.h.bf16 %v12087_v37  ;;  %v6903_v56 = vrot.slane %v6902_v24, 2  ;;  %v6916_v5 = vrot.slane %v6915_v4, 2  ;;  %v8997_v37 = vunpack.i.h.bf16 %v12098_v58 }
 0x3af   : > { %v6922_v54 = vmax.f32 %v6921_v8, %v6517_v19  ;;  %v4983_v40 = vmax.f32 %v4695_v49, 0.0  ;;  %v4716_v60 = vadd.f32 %v11986_v21, %v8355_v46  ;;  %v6521_v45 = vmul.f32 %v9011_v11, %v4985_v53 }
 0x3b0   : > { %v4707_v47 = vpop.f32.mrf.mxu1  ;;  %v6904_v43 = vmax.f32 %v6902_v24, %v6903_v56  ;;  %v6917_v16 = vmax.f32 %v6915_v4, %v6916_v5 }
 0x3b1   : > { %v6923_v1 = vmax.f32 %v6922_v54, %v6518_v62  ;;  %v4708_v3 = vadd.f32 %v11986_v21, %v4707_v47  ;;  %v6519_v32 = vmul.f32 %v8992_v29, %v4983_v40  ;;  %v4988_v6 = vmax.f32 %v4716_v60, 0.0 }
 0x3b2   : > { %v8356_v10 = vpop.f32.mrf.mxu1 }
 0x3b3   : > { %v6924_v42 = vmax.f32 %v6923_v1, %v6519_v32  ;;  %v4986_v7 = vmax.f32 %v4708_v3, 0.0  ;;  %v4719_v22 = vadd.f32 %v11986_v21, %v8356_v10  ;;  %v6524_v44 = vmul.f32 %v8976_v35, %v4988_v6 }
 0x3b4   : > { %v4710_v12 = vpop.f32.mrf.mxu1  ;;  %v6918_v10 = vrot.slane %v6917_v16, 1 }
 0x3b5   : > { %v4711_v0 = vadd.f32 %v11986_v21, %v4710_v12  ;;  %v6925_v23 = vmax.f32 %v6924_v42, %v6520_v15  ;;  %v6522_v38 = vmul.f32 %v8966_v55, %v4986_v7  ;;  %v4989_v20 = vmax.f32 %v4719_v22, 0.0  ;;  %v9289_v7 = vld [vmem:[%s12161_s5] ss:$0 sm:$0xff] }
 0x3b6   : > { %v6919_v15 = vmax.f32 %v6917_v16, %v6918_v10 }
 0x3b7   : > { %v4987_v25 = vmax.f32 %v4711_v0, 0.0  ;;  %v6926_v33 = vmax.f32 %v6925_v23, %v6521_v45  ;;  %v6525_v52 = vmul.f32 %v8982_v63, %v4989_v20 }
 0x3b8   : > { %v6982_v0 = vmul.f32 %v9289_v7, %v6919_v15 }
 0x3b9   : > { %v8359_v36 = vpop.f32.mrf.mxu1  ;;  %v6523_v31 = vmul.f32 %v8967_v28, %v4987_v25  ;;  %v6927_v34 = vrot.slane %v6926_v33, 4 }
 0x3ba   : > { %v4732_v14 = vadd.f32 %v11986_v21, %v8359_v36  ;;  %v9290_v36 = vld [vmem:[%s12162_s6] ss:$0 sm:$0xff] }
 0x3bb   : > { %v4723_v27 = vpop.f32.mrf.mxu1  ;;  %v6933_v48 = vmax.f32 %v6522_v38, %v6523_v31  ;;  %v6928_v19 = vmax.f32 %v6926_v33, %v6927_v34  ;;  %v7021_v55 = vadd.f32 %v9290_v36, %v6982_v0 }
 0x3bc   : > { %v4724_v18 = vadd.f32 %v11986_v21, %v4723_v27  ;;  %v4992_v29 = vmax.f32 %v4732_v14, 0.0 }
 0x3bd   : > { %v8360_v30 = vpop.f32.mrf.mxu1  ;;  %v6934_v51 = vmax.f32 %v6933_v48, %v6524_v44  ;;  %v6929_v46 = vrot.slane %v6928_v19, 2  ;;  %v7113_v4 = vrot.slane %v7021_v55, 3 }
 0x3be   : > { %v4990_v2 = vmax.f32 %v4724_v18, 0.0  ;;  %v4735_v26 = vadd.f32 %v11986_v21, %v8360_v30  ;;  %v6528_v53 = vmul.f32 %v9007_v13, %v4992_v29 }
 0x3bf   : > { %v4726_v8 = vpop.f32.mrf.mxu1  ;;  %v6935_v54 = vmax.f32 %v6934_v51, %v6525_v52  ;;  %v6930_v3 = vmax.f32 %v6928_v19, %v6929_v46 }
 0x3c0   : > { %v4727_v49 = vadd.f32 %v11986_v21, %v4726_v8  ;;  %v6526_v62 = vmul.f32 %v8991_v61, %v4990_v2  ;;  %v4993_v47 = vmax.f32 %v4735_v26, 0.0  ;;  %v6905_v21 = vrot.slane %v6904_v43, 1 }
 0x3c1   : > { %v6931_v60 = vrot.slane %v6930_v3, 1 }
 0x3c2   : > { %v4991_v17 = vmax.f32 %v4727_v49, 0.0  ;;  %v6936_v40 = vmax.f32 %v6935_v54, %v6526_v62  ;;  %v6529_v58 = vmul.f32 %v9012_v39, %v4993_v47  ;;  %v6906_v59 = vmax.f32 %v6904_v43, %v6905_v21 }
 0x3c3   : > { %v6932_v50 = vmax.f32 %v6930_v3, %v6931_v60 }
 0x3c4   : > { %v6527_v1 = vmul.f32 %v8997_v37, %v4991_v17  ;;  %v6981_v22 = vmul.f32 %v9289_v7, %v6906_v59 }
 0x3c5   : > { %v6983_v45 = vmul.f32 %v9289_v7, %v6932_v50 }
 0x3c6   : > { %v6937_v32 = vmax.f32 %v6936_v40, %v6527_v1  ;;  %v7020_v28 = vadd.f32 %v9290_v36, %v6981_v22 }
 0x3c7   : > { %v7022_v25 = vadd.f32 %v9290_v36, %v6983_v45 }
 0x3c8   : > { %v6938_v11 = vmax.f32 %v6937_v32, %v6528_v53  ;;  %v7111_v24 = vrot.slane %v7020_v28, 4 }
 0x3c9   : > { %v7115_v27 = vrot.slane %v7022_v25, 2 }
 0x3ca   : > { %v6939_v9 = vmax.f32 %v6938_v11, %v6529_v58  ;;  %v7112_v20 = vsel %vm7066_vm6, %v7111_v24, %v12068_v57 }
 0x3cb   : > { %v7114_v31 = vsel %vm7069_vm7, %v7113_v4, %v7112_v20 }
 0x3cc   : > { %v6940_v42 = vrot.slane %v6939_v9, 4  ;;  %v7116_v63 = vsel %vm7072_vm8, %v7115_v27, %v7114_v31 }
 0x3ce   : > { %v6941_v12 = vmax.f32 %v6939_v9, %v6940_v42 }
 0x3d0   : > { %v6942_v41 = vrot.slane %v6941_v12, 2 }
 0x3d2   : > { %v6943_v23 = vmax.f32 %v6941_v12, %v6942_v41 }
 0x3d4   : > { %v6944_v6 = vrot.slane %v6943_v23, 1 }
 0x3d6   : > { %v6945_v35 = vmax.f32 %v6943_v23, %v6944_v6 }
 0x3d8   : > { %v6984_v33 = vmul.f32 %v9289_v7, %v6945_v35 }
 0x3da   : > { %v7023_v38 = vadd.f32 %v9290_v36, %v6984_v33 }
 0x3dc   : > { %v7117_v18 = vrot.slane %v7023_v38, 1 }
 0x3de   : > { %v7118_v34 = vsel %vm7075_vm9, %v7117_v18, %v7116_v63 }
 0x3df   : > { %7126 = vst [vmem:[%s10961_s16 + $0x18] sm:$0xff] %v7118_v34 }
 0x3e0 PF: > { %s17_s24 = sadd.s32 1, %s9297_s24  }
 0x3e1   : > { %p14_p5 = scmp.ge.s32.totalorder %s17_s24, 4  }
 0x3e3   :  { %16 = sbr.rel (!%p14_p5) target bundleno = 1 (0x1), region = 78 }

</bundles_post_ra>
